<compile_context>
chip_gen: v7x
topology: tpu7x:2x2x1
jax: 0.10.0
libtpu: 0.0.40
codegen_flags: <defaults>
</compile_context>

<pallas_src>
import jax
import jax.numpy as jnp
from jax.experimental import pallas as pl
from jax.experimental.pallas import tpu as pltpu

EMBEDDING_DIM = 50
IMAGE_SIZE = 28 * 28          # 784
LATENT_DIM = 100
NUM_CLASSES = 10
BN_EPS = 1e-5                 # PyTorch nn.BatchNorm1d default eps
LEAKY_SLOPE = 0.2

K1 = LATENT_DIM + EMBEDDING_DIM   # 150 raw input features
K1_PAD = 256                      # zero-padded input features (lane aligned)
H1, H2, H3 = 256, 512, 1024       # hidden widths
N_PAD = 896                       # 7 * 128, lane-dense padded output width (784 -> 896)


def _leaky_relu(x):
    return jnp.where(x > 0, x, LEAKY_SLOPE * x)


def _batchnorm_train(h, gamma, beta):
    # One-pass biased batch statistics (training mode), folded into scale/shift:
    #   scale = gamma * rsqrt(var + eps);  shift = beta - mean * scale.
    mean = jnp.mean(h, axis=0, keepdims=True)
    mean_sq = jnp.mean(h * h, axis=0, keepdims=True)
    var = jnp.maximum(mean_sq - mean * mean, 0.0)
    scale = gamma * jax.lax.rsqrt(var + BN_EPS)
    shift = beta - mean * scale
    return h * scale + shift


def generator_kernel(x_ref,
                     w1_ref, b1_ref,
                     w2_ref, b2_ref, g2_ref, be2_ref,
                     w3_ref, b3_ref, g3_ref, be3_ref,
                     w4_ref, b4_ref,
                     out_ref):
    x = x_ref[...]                                                       # [B, 256] bf16

    # Linear(150->256) (zero-padded K) + LeakyReLU(0.2)
    h1 = jnp.dot(x, w1_ref[...],
                 preferred_element_type=jnp.float32) + b1_ref[...]
    h1 = _leaky_relu(h1)

    # Linear(256->512) + BatchNorm1d(512) + LeakyReLU(0.2)
    h2 = jnp.dot(h1.astype(jnp.bfloat16), w2_ref[...],
                 preferred_element_type=jnp.float32) + b2_ref[...]
    h2 = _leaky_relu(_batchnorm_train(h2, g2_ref[...], be2_ref[...]))

    # Linear(512->1024) + BatchNorm1d(1024) + LeakyReLU(0.2)
    h3 = jnp.dot(h2.astype(jnp.bfloat16), w3_ref[...],
                 preferred_element_type=jnp.float32) + b3_ref[...]
    h3 = _leaky_relu(_batchnorm_train(h3, g3_ref[...], be3_ref[...]))

    # Linear(1024 -> 896 padded) + Tanh; single lane-dense [B, 896] store.
    h4 = jnp.dot(h3.astype(jnp.bfloat16), w4_ref[...],
                 preferred_element_type=jnp.float32) + b4_ref[...]
    out_ref[...] = jnp.tanh(h4)


def generator_forward(noise, labels, params):
    """noise: [B, LATENT_DIM] f32, labels: [B] int32 -> img [B, 1, 28, 28] f32."""
    # Glue: embedding lookup + concat (matches torch.cat((noise, embed(labels)), dim=1)).
    emb = jnp.take(params["label_embed"], labels, axis=0)                # [B, 50]
    x = jnp.concatenate([noise, emb], axis=1)                            # [B, 150]
    B = x.shape[0]
    x = jnp.pad(x, ((0, 0), (0, K1_PAD - K1))).astype(jnp.bfloat16)      # [B, 256] bf16

    const = lambda i: (0, 0)
    in_specs = [
        pl.BlockSpec((B, K1_PAD), const),            # x
        pl.BlockSpec((K1_PAD, H1), const),           # w1
        pl.BlockSpec((1, H1), const),                # b1
        pl.BlockSpec((H1, H2), const),               # w2
        pl.BlockSpec((1, H2), const),                # b2
        pl.BlockSpec((1, H2), const),                # g2
        pl.BlockSpec((1, H2), const),                # be2
        pl.BlockSpec((H2, H3), const),               # w3
        pl.BlockSpec((1, H3), const),                # b3
        pl.BlockSpec((1, H3), const),                # g3
        pl.BlockSpec((1, H3), const),                # be3
        pl.BlockSpec((H3, N_PAD), const),            # w4
        pl.BlockSpec((1, N_PAD), const),             # b4
    ]
    out_spec = pl.BlockSpec((B, N_PAD), const)

    weight_elems = K1_PAD * H1 + H1 * H2 + H2 * H3 + H3 * N_PAD
    cost = pl.CostEstimate(
        flops=2 * B * weight_elems,
        transcendentals=B * N_PAD + H2 + H3,                         # tanh + BN rsqrts
        bytes_accessed=(2 * weight_elems                             # bf16 weights
                        + 4 * (H1 + 3 * H2 + 3 * H3 + N_PAD)         # f32 biases / BN params
                        + 2 * B * K1_PAD + 4 * B * N_PAD),           # x in (bf16), out (f32)
    )

    flat = pl.pallas_call(
        generator_kernel,
        out_shape=jax.ShapeDtypeStruct((B, N_PAD), jnp.float32),
        grid=(1,),
        in_specs=in_specs,
        out_specs=out_spec,
        compiler_params=pltpu.CompilerParams(
            # No carried state across grid steps; footprint (~3-4 MiB) fits the
            # default scoped VMEM limit on v5e/v6e/v7x, so no vmem_limit override.
            dimension_semantics=("parallel",),
        ),
        cost_estimate=cost,
    )(
        x,
        params["w1"], params["b1"],
        params["w2"], params["b2"], params["g2"], params["be2"],
        params["w3"], params["b3"], params["g3"], params["be3"],
        params["w4"], params["b4"],
    )

    return flat[:, :IMAGE_SIZE].reshape(B, 1, 28, 28)


def init_params(key):
    """Deterministic init. Linear weights stored transposed [in, out], bf16, pre-padded."""
    ks = jax.random.split(key, 9)

    def linear(kw, kb, fan_in, fan_out, pad_in=0, pad_out=0):
        bound = 1.0 / jnp.sqrt(fan_in)
        w = jax.random.uniform(kw, (fan_in, fan_out), jnp.float32, -bound, bound)
        b = jax.random.uniform(kb, (1, fan_out), jnp.float32, -bound, bound)
        w = jnp.pad(w, ((0, pad_in), (0, pad_out)))
        b = jnp.pad(b, ((0, 0), (0, pad_out)))
        return w.astype(jnp.bfloat16), b             # weights bf16, bias f32

    w1, b1 = linear(ks[0], ks[1], K1, H1, pad_in=K1_PAD - K1)
    w2, b2 = linear(ks[2], ks[3], H1, H2)
    w3, b3 = linear(ks[4], ks[5], H2, H3)
    w4, b4 = linear(ks[6], ks[7], H3, IMAGE_SIZE, pad_out=N_PAD - IMAGE_SIZE)

    return {
        "label_embed": jax.random.normal(ks[8], (NUM_CLASSES, EMBEDDING_DIM), jnp.float32),
        "w1": w1, "b1": b1,
        "w2": w2, "b2": b2,
        "g2": jnp.ones((1, H2), jnp.float32), "be2": jnp.zeros((1, H2), jnp.float32),
        "w3": w3, "b3": b3,
        "g3": jnp.ones((1, H3), jnp.float32), "be3": jnp.zeros((1, H3), jnp.float32),
        "w4": w4, "b4": b4,
    }


if __name__ == "__main__":
    key = jax.random.PRNGKey(0)
    k_params, k_noise, k_labels = jax.random.split(key, 3)

    batch = 8                      # keep batch a multiple of 8 (sublane-aligned)
    params = init_params(k_params)
    noise = jax.random.normal(k_noise, (batch, LATENT_DIM), jnp.float32)
    labels = jax.random.randint(k_labels, (batch,), 0, NUM_CLASSES, jnp.int32)

    # TODO(synk): BatchNorm running_mean/running_var are not tracked (pure training-mode
    # forward with batch statistics, matching the PyTorch module's forward in train()).
    img = generator_forward(noise, labels, params)
    jax.block_until_ready(img)

    assert img.shape == (batch, 1, 28, 28), img.shape
    assert img.dtype == jnp.float32
    print("KERNEL_OK")
</pallas_src>

<mosaic_0001>
module attributes {stable_mosaic.version = 11 : i64} {
  func.func @generator_kernel(%arg0: i32, %arg1: memref<8x256xbf16, #tpu.memory_space<vmem>>, %arg2: memref<256x256xbf16, #tpu.memory_space<vmem>>, %arg3: memref<1x256xf32, #tpu.memory_space<vmem>>, %arg4: memref<256x512xbf16, #tpu.memory_space<vmem>>, %arg5: memref<1x512xf32, #tpu.memory_space<vmem>>, %arg6: memref<1x512xf32, #tpu.memory_space<vmem>>, %arg7: memref<1x512xf32, #tpu.memory_space<vmem>>, %arg8: memref<512x1024xbf16, #tpu.memory_space<vmem>>, %arg9: memref<1x1024xf32, #tpu.memory_space<vmem>>, %arg10: memref<1x1024xf32, #tpu.memory_space<vmem>>, %arg11: memref<1x1024xf32, #tpu.memory_space<vmem>>, %arg12: memref<1024x896xbf16, #tpu.memory_space<vmem>>, %arg13: memref<1x896xf32, #tpu.memory_space<vmem>>, %arg14: memref<8x896xf32, #tpu.memory_space<vmem>>) attributes {dimension_semantics = [#tpu.dimension_semantics<parallel>], iteration_bounds = array<i64: 1>, scalar_prefetch = 0 : i64, scratch_operands = 0 : i64, tpu.core_type = #tpu.core_type<tc>, window_params = [{pipeline_mode = #tpu.pipeline_mode<synchronous>, transform_indices = @transform_0, window_bounds = array<i64: 8, 256>}, {pipeline_mode = #tpu.pipeline_mode<synchronous>, transform_indices = @transform_1, window_bounds = array<i64: 256, 256>}, {pipeline_mode = #tpu.pipeline_mode<synchronous>, transform_indices = @transform_2, window_bounds = array<i64: 1, 256>}, {pipeline_mode = #tpu.pipeline_mode<synchronous>, transform_indices = @transform_3, window_bounds = array<i64: 256, 512>}, {pipeline_mode = #tpu.pipeline_mode<synchronous>, transform_indices = @transform_4, window_bounds = array<i64: 1, 512>}, {pipeline_mode = #tpu.pipeline_mode<synchronous>, transform_indices = @transform_5, window_bounds = array<i64: 1, 512>}, {pipeline_mode = #tpu.pipeline_mode<synchronous>, transform_indices = @transform_6, window_bounds = array<i64: 1, 512>}, {pipeline_mode = #tpu.pipeline_mode<synchronous>, transform_indices = @transform_7, window_bounds = array<i64: 512, 1024>}, {pipeline_mode = #tpu.pipeline_mode<synchronous>, transform_indices = @transform_8, window_bounds = array<i64: 1, 1024>}, {pipeline_mode = #tpu.pipeline_mode<synchronous>, transform_indices = @transform_9, window_bounds = array<i64: 1, 1024>}, {pipeline_mode = #tpu.pipeline_mode<synchronous>, transform_indices = @transform_10, window_bounds = array<i64: 1, 1024>}, {pipeline_mode = #tpu.pipeline_mode<synchronous>, transform_indices = @transform_11, window_bounds = array<i64: 1024, 896>}, {pipeline_mode = #tpu.pipeline_mode<synchronous>, transform_indices = @transform_12, window_bounds = array<i64: 1, 896>}, {pipeline_mode = #tpu.pipeline_mode<synchronous>, transform_indices = @transform_13, window_bounds = array<i64: 8, 896>}]} {
    %c0 = arith.constant 0 : index
    %c0_0 = arith.constant 0 : index
    %0 = vector.load %arg1[%c0, %c0_0] : memref<8x256xbf16, #tpu.memory_space<vmem>>, vector<8x256xbf16>
    %c0_1 = arith.constant 0 : index
    %c0_2 = arith.constant 0 : index
    %1 = vector.load %arg2[%c0_1, %c0_2] : memref<256x256xbf16, #tpu.memory_space<vmem>>, vector<256x256xbf16>
    %cst = arith.constant dense<0.000000e+00> : vector<8x256xf32>
    %2 = tpu.matmul %0, %1, %cst {dimension_numbers = #tpu.dot_dimension_numbers<[1], [0], [0], [1], [0, 0, 1, 1], [], []>} : vector<8x256xbf16>, vector<256x256xbf16>, vector<8x256xf32> -> vector<8x256xf32>
    %c0_3 = arith.constant 0 : index
    %c0_4 = arith.constant 0 : index
    %3 = vector.load %arg3[%c0_3, %c0_4] : memref<1x256xf32, #tpu.memory_space<vmem>>, vector<1x256xf32>
    %4 = vector.broadcast %3 : vector<1x256xf32> to vector<8x256xf32>
    %5 = arith.addf %2, %4 : vector<8x256xf32>
    %cst_5 = arith.constant 0.000000e+00 : f32
    %6 = vector.broadcast %cst_5 : f32 to vector<8x256xf32>
    %7 = arith.cmpf ogt, %5, %6 : vector<8x256xf32>
    %cst_6 = arith.constant 2.000000e-01 : f32
    %8 = vector.broadcast %cst_6 : f32 to vector<8x256xf32>
    %9 = arith.mulf %8, %5 : vector<8x256xf32>
    %10 = arith.select %7, %5, %9 : vector<8x256xi1>, vector<8x256xf32>
    %11 = arith.truncf %10 : vector<8x256xf32> to vector<8x256xbf16>
    %c0_7 = arith.constant 0 : index
    %c0_8 = arith.constant 0 : index
    %12 = vector.load %arg4[%c0_7, %c0_8] : memref<256x512xbf16, #tpu.memory_space<vmem>>, vector<256x512xbf16>
    %cst_9 = arith.constant dense<0.000000e+00> : vector<8x512xf32>
    %13 = tpu.matmul %11, %12, %cst_9 {dimension_numbers = #tpu.dot_dimension_numbers<[1], [0], [0], [1], [0, 0, 1, 1], [], []>} : vector<8x256xbf16>, vector<256x512xbf16>, vector<8x512xf32> -> vector<8x512xf32>
    %c0_10 = arith.constant 0 : index
    %c0_11 = arith.constant 0 : index
    %14 = vector.load %arg5[%c0_10, %c0_11] : memref<1x512xf32, #tpu.memory_space<vmem>>, vector<1x512xf32>
    %15 = vector.broadcast %14 : vector<1x512xf32> to vector<8x512xf32>
    %16 = arith.addf %13, %15 : vector<8x512xf32>
    %c0_12 = arith.constant 0 : index
    %c0_13 = arith.constant 0 : index
    %17 = vector.load %arg6[%c0_12, %c0_13] : memref<1x512xf32, #tpu.memory_space<vmem>>, vector<1x512xf32>
    %c0_14 = arith.constant 0 : index
    %c0_15 = arith.constant 0 : index
    %18 = vector.load %arg7[%c0_14, %c0_15] : memref<1x512xf32, #tpu.memory_space<vmem>>, vector<1x512xf32>
    %cst_16 = arith.constant dense<0.000000e+00> : vector<512xf32>
    %19 = vector.multi_reduction <add>, %16, %cst_16 [0] : vector<8x512xf32> to vector<512xf32>
    %20 = vector.shape_cast %19 : vector<512xf32> to vector<1x512xf32>
    %cst_17 = arith.constant 8.000000e+00 : f32
    %21 = vector.broadcast %cst_17 : f32 to vector<1x512xf32>
    %22 = arith.divf %20, %21 : vector<1x512xf32>
    %23 = arith.mulf %16, %16 : vector<8x512xf32>
    %cst_18 = arith.constant dense<0.000000e+00> : vector<512xf32>
    %24 = vector.multi_reduction <add>, %23, %cst_18 [0] : vector<8x512xf32> to vector<512xf32>
    %25 = vector.shape_cast %24 : vector<512xf32> to vector<1x512xf32>
    %cst_19 = arith.constant 8.000000e+00 : f32
    %26 = vector.broadcast %cst_19 : f32 to vector<1x512xf32>
    %27 = arith.divf %25, %26 : vector<1x512xf32>
    %28 = arith.mulf %22, %22 : vector<1x512xf32>
    %29 = arith.subf %27, %28 : vector<1x512xf32>
    %cst_20 = arith.constant 0.000000e+00 : f32
    %30 = vector.broadcast %cst_20 : f32 to vector<1x512xf32>
    %31 = arith.maximumf %29, %30 : vector<1x512xf32>
    %cst_21 = arith.constant 9.99999974E-6 : f32
    %32 = vector.broadcast %cst_21 : f32 to vector<1x512xf32>
    %33 = arith.addf %31, %32 : vector<1x512xf32>
    %34 = math.rsqrt %33 : vector<1x512xf32>
    %35 = arith.mulf %17, %34 : vector<1x512xf32>
    %36 = arith.mulf %22, %35 : vector<1x512xf32>
    %37 = arith.subf %18, %36 : vector<1x512xf32>
    %38 = vector.broadcast %35 : vector<1x512xf32> to vector<8x512xf32>
    %39 = arith.mulf %16, %38 : vector<8x512xf32>
    %40 = vector.broadcast %37 : vector<1x512xf32> to vector<8x512xf32>
    %41 = arith.addf %39, %40 : vector<8x512xf32>
    %cst_22 = arith.constant 0.000000e+00 : f32
    %42 = vector.broadcast %cst_22 : f32 to vector<8x512xf32>
    %43 = arith.cmpf ogt, %41, %42 : vector<8x512xf32>
    %cst_23 = arith.constant 2.000000e-01 : f32
    %44 = vector.broadcast %cst_23 : f32 to vector<8x512xf32>
    %45 = arith.mulf %44, %41 : vector<8x512xf32>
    %46 = arith.select %43, %41, %45 : vector<8x512xi1>, vector<8x512xf32>
    %47 = arith.truncf %46 : vector<8x512xf32> to vector<8x512xbf16>
    %c0_24 = arith.constant 0 : index
    %c0_25 = arith.constant 0 : index
    %48 = vector.load %arg8[%c0_24, %c0_25] : memref<512x1024xbf16, #tpu.memory_space<vmem>>, vector<512x1024xbf16>
    %cst_26 = arith.constant dense<0.000000e+00> : vector<8x1024xf32>
    %49 = tpu.matmul %47, %48, %cst_26 {dimension_numbers = #tpu.dot_dimension_numbers<[1], [0], [0], [1], [0, 0, 1, 1], [], []>} : vector<8x512xbf16>, vector<512x1024xbf16>, vector<8x1024xf32> -> vector<8x1024xf32>
    %c0_27 = arith.constant 0 : index
    %c0_28 = arith.constant 0 : index
    %50 = vector.load %arg9[%c0_27, %c0_28] : memref<1x1024xf32, #tpu.memory_space<vmem>>, vector<1x1024xf32>
    %51 = vector.broadcast %50 : vector<1x1024xf32> to vector<8x1024xf32>
    %52 = arith.addf %49, %51 : vector<8x1024xf32>
    %c0_29 = arith.constant 0 : index
    %c0_30 = arith.constant 0 : index
    %53 = vector.load %arg10[%c0_29, %c0_30] : memref<1x1024xf32, #tpu.memory_space<vmem>>, vector<1x1024xf32>
    %c0_31 = arith.constant 0 : index
    %c0_32 = arith.constant 0 : index
    %54 = vector.load %arg11[%c0_31, %c0_32] : memref<1x1024xf32, #tpu.memory_space<vmem>>, vector<1x1024xf32>
    %cst_33 = arith.constant dense<0.000000e+00> : vector<1024xf32>
    %55 = vector.multi_reduction <add>, %52, %cst_33 [0] : vector<8x1024xf32> to vector<1024xf32>
    %56 = vector.shape_cast %55 : vector<1024xf32> to vector<1x1024xf32>
    %cst_34 = arith.constant 8.000000e+00 : f32
    %57 = vector.broadcast %cst_34 : f32 to vector<1x1024xf32>
    %58 = arith.divf %56, %57 : vector<1x1024xf32>
    %59 = arith.mulf %52, %52 : vector<8x1024xf32>
    %cst_35 = arith.constant dense<0.000000e+00> : vector<1024xf32>
    %60 = vector.multi_reduction <add>, %59, %cst_35 [0] : vector<8x1024xf32> to vector<1024xf32>
    %61 = vector.shape_cast %60 : vector<1024xf32> to vector<1x1024xf32>
    %cst_36 = arith.constant 8.000000e+00 : f32
    %62 = vector.broadcast %cst_36 : f32 to vector<1x1024xf32>
    %63 = arith.divf %61, %62 : vector<1x1024xf32>
    %64 = arith.mulf %58, %58 : vector<1x1024xf32>
    %65 = arith.subf %63, %64 : vector<1x1024xf32>
    %cst_37 = arith.constant 0.000000e+00 : f32
    %66 = vector.broadcast %cst_37 : f32 to vector<1x1024xf32>
    %67 = arith.maximumf %65, %66 : vector<1x1024xf32>
    %cst_38 = arith.constant 9.99999974E-6 : f32
    %68 = vector.broadcast %cst_38 : f32 to vector<1x1024xf32>
    %69 = arith.addf %67, %68 : vector<1x1024xf32>
    %70 = math.rsqrt %69 : vector<1x1024xf32>
    %71 = arith.mulf %53, %70 : vector<1x1024xf32>
    %72 = arith.mulf %58, %71 : vector<1x1024xf32>
    %73 = arith.subf %54, %72 : vector<1x1024xf32>
    %74 = vector.broadcast %71 : vector<1x1024xf32> to vector<8x1024xf32>
    %75 = arith.mulf %52, %74 : vector<8x1024xf32>
    %76 = vector.broadcast %73 : vector<1x1024xf32> to vector<8x1024xf32>
    %77 = arith.addf %75, %76 : vector<8x1024xf32>
    %cst_39 = arith.constant 0.000000e+00 : f32
    %78 = vector.broadcast %cst_39 : f32 to vector<8x1024xf32>
    %79 = arith.cmpf ogt, %77, %78 : vector<8x1024xf32>
    %cst_40 = arith.constant 2.000000e-01 : f32
    %80 = vector.broadcast %cst_40 : f32 to vector<8x1024xf32>
    %81 = arith.mulf %80, %77 : vector<8x1024xf32>
    %82 = arith.select %79, %77, %81 : vector<8x1024xi1>, vector<8x1024xf32>
    %83 = arith.truncf %82 : vector<8x1024xf32> to vector<8x1024xbf16>
    %c0_41 = arith.constant 0 : index
    %c0_42 = arith.constant 0 : index
    %84 = vector.load %arg12[%c0_41, %c0_42] : memref<1024x896xbf16, #tpu.memory_space<vmem>>, vector<1024x896xbf16>
    %cst_43 = arith.constant dense<0.000000e+00> : vector<8x896xf32>
    %85 = tpu.matmul %83, %84, %cst_43 {dimension_numbers = #tpu.dot_dimension_numbers<[1], [0], [0], [1], [0, 0, 1, 1], [], []>} : vector<8x1024xbf16>, vector<1024x896xbf16>, vector<8x896xf32> -> vector<8x896xf32>
    %c0_44 = arith.constant 0 : index
    %c0_45 = arith.constant 0 : index
    %86 = vector.load %arg13[%c0_44, %c0_45] : memref<1x896xf32, #tpu.memory_space<vmem>>, vector<1x896xf32>
    %87 = vector.broadcast %86 : vector<1x896xf32> to vector<8x896xf32>
    %88 = arith.addf %85, %87 : vector<8x896xf32>
    %89 = math.tanh %88 : vector<8x896xf32>
    %c0_46 = arith.constant 0 : index
    %c0_47 = arith.constant 0 : index
    %90 = vector.load %arg14[%c0_46, %c0_47] : memref<8x896xf32, #tpu.memory_space<vmem>>, vector<8x896xf32>
    tpu.vector_store %arg14[%c0_46, %c0_47], %89 {strides = array<i32>} : memref<8x896xf32, #tpu.memory_space<vmem>>, vector<8x896xf32>,
    return
  }
  func.func @transform_0(%arg0: i32) -> (i32, i32) {
    %c0_i32 = arith.constant 0 : i32
    %c0_i32_0 = arith.constant 0 : i32
    %c0_i32_1 = arith.constant 0 : i32
    return %c0_i32, %c0_i32_0 : i32, i32
  }
  func.func @transform_1(%arg0: i32) -> (i32, i32) {
    %c0_i32 = arith.constant 0 : i32
    %c0_i32_0 = arith.constant 0 : i32
    %c0_i32_1 = arith.constant 0 : i32
    return %c0_i32, %c0_i32_0 : i32, i32
  }
  func.func @transform_2(%arg0: i32) -> (i32, i32) {
    %c0_i32 = arith.constant 0 : i32
    %c0_i32_0 = arith.constant 0 : i32
    %c0_i32_1 = arith.constant 0 : i32
    return %c0_i32, %c0_i32_0 : i32, i32
  }
  func.func @transform_3(%arg0: i32) -> (i32, i32) {
    %c0_i32 = arith.constant 0 : i32
    %c0_i32_0 = arith.constant 0 : i32
    %c0_i32_1 = arith.constant 0 : i32
    return %c0_i32, %c0_i32_0 : i32, i32
  }
  func.func @transform_4(%arg0: i32) -> (i32, i32) {
    %c0_i32 = arith.constant 0 : i32
    %c0_i32_0 = arith.constant 0 : i32
    %c0_i32_1 = arith.constant 0 : i32
    return %c0_i32, %c0_i32_0 : i32, i32
  }
  func.func @transform_5(%arg0: i32) -> (i32, i32) {
    %c0_i32 = arith.constant 0 : i32
    %c0_i32_0 = arith.constant 0 : i32
    %c0_i32_1 = arith.constant 0 : i32
    return %c0_i32, %c0_i32_0 : i32, i32
  }
  func.func @transform_6(%arg0: i32) -> (i32, i32) {
    %c0_i32 = arith.constant 0 : i32
    %c0_i32_0 = arith.constant 0 : i32
    %c0_i32_1 = arith.constant 0 : i32
    return %c0_i32, %c0_i32_0 : i32, i32
  }
  func.func @transform_7(%arg0: i32) -> (i32, i32) {
    %c0_i32 = arith.constant 0 : i32
    %c0_i32_0 = arith.constant 0 : i32
    %c0_i32_1 = arith.constant 0 : i32
    return %c0_i32, %c0_i32_0 : i32, i32
  }
  func.func @transform_8(%arg0: i32) -> (i32, i32) {
    %c0_i32 = arith.constant 0 : i32
    %c0_i32_0 = arith.constant 0 : i32
    %c0_i32_1 = arith.constant 0 : i32
    return %c0_i32, %c0_i32_0 : i32, i32
  }
  func.func @transform_9(%arg0: i32) -> (i32, i32) {
    %c0_i32 = arith.constant 0 : i32
    %c0_i32_0 = arith.constant 0 : i32
    %c0_i32_1 = arith.constant 0 : i32
    return %c0_i32, %c0_i32_0 : i32, i32
  }
  func.func @transform_10(%arg0: i32) -> (i32, i32) {
    %c0_i32 = arith.constant 0 : i32
    %c0_i32_0 = arith.constant 0 : i32
    %c0_i32_1 = arith.constant 0 : i32
    return %c0_i32, %c0_i32_0 : i32, i32
  }
  func.func @transform_11(%arg0: i32) -> (i32, i32) {
    %c0_i32 = arith.constant 0 : i32
    %c0_i32_0 = arith.constant 0 : i32
    %c0_i32_1 = arith.constant 0 : i32
    return %c0_i32, %c0_i32_0 : i32, i32
  }
  func.func @transform_12(%arg0: i32) -> (i32, i32) {
    %c0_i32 = arith.constant 0 : i32
    %c0_i32_0 = arith.constant 0 : i32
    %c0_i32_1 = arith.constant 0 : i32
    return %c0_i32, %c0_i32_0 : i32, i32
  }
  func.func @transform_13(%arg0: i32) -> (i32, i32) {
    %c0_i32 = arith.constant 0 : i32
    %c0_i32_0 = arith.constant 0 : i32
    %c0_i32_1 = arith.constant 0 : i32
    return %c0_i32, %c0_i32_0 : i32, i32
  }
}

</mosaic_0001>

<bundles_post_ra>
// kernel: tpu_custom_call.1
= control target key start
LH: loop header
LB: loop body
LE: loop exit
PB: predicated region body
PF: predicated region fallthrough
CT: control target
= control target key end

     0   :  { %18 = vsyncpa [#allocation3], 0  ;;  %s9786_s0 = inlined_call_operand.hbm [shape: bf16[8,256], index: 0, kind: input, shape index: {}]   ;;  %s9787_s1 = inlined_call_operand.hbm [shape: bf16[256,256], index: 1, kind: input, shape index: {}]   ;;  %s9788_s2 = inlined_call_operand.hbm [shape: f32[1,256], index: 2, kind: input, shape index: {}]   ;;  %s9789_s3 = inlined_call_operand.hbm [shape: bf16[256,512], index: 3, kind: input, shape index: {}]   ;;  %s9790_s4 = inlined_call_operand.hbm [shape: f32[1,512], index: 4, kind: input, shape index: {}]   ;;  %s9791_s5 = inlined_call_operand.hbm [shape: f32[1,512], index: 5, kind: input, shape index: {}]   ;;  %s9792_s6 = inlined_call_operand.hbm [shape: f32[1,512], index: 6, kind: input, shape index: {}]   ;;  %s9793_s7 = inlined_call_operand.hbm [shape: bf16[512,1024], index: 7, kind: input, shape index: {}]   ;;  %s9794_s8 = inlined_call_operand.hbm [shape: f32[1,1024], index: 8, kind: input, shape index: {}]   ;;  %s9795_s9 = inlined_call_operand.hbm [shape: f32[1,1024], index: 9, kind: input, shape index: {}]   ;;  %s9796_s10 = inlined_call_operand.hbm [shape: f32[1,1024], index: 10, kind: input, shape index: {}]   ;;  %s9797_s11 = inlined_call_operand.hbm [shape: bf16[1024,896], index: 11, kind: input, shape index: {}]   ;;  %s9798_s12 = inlined_call_operand.hbm [shape: f32[1,896], index: 12, kind: input, shape index: {}]   ;;  %s9799_s13 = inlined_call_operand.hbm [shape: f32[8,896], index: 13, kind: output, shape index: {}]  }
   0x1   :  { %19 = vsyncpa [#allocation6], 0 }
   0x2   :  { %20 = vsyncpa [#allocation9], 0 }
   0x3   :  { %21 = vsyncpa [#allocation12], 0 }
   0x4   :  { %22 = vsyncpa [#allocation15], 0 }
   0x5   :  { %23 = vsyncpa [#allocation18], 0 }
   0x6   :  { %24 = vsyncpa [#allocation21], 0 }
   0x7   :  { %25 = vsyncpa [#allocation4], 0  ;;  %s9157_s25 = smov [#allocation5]   ;;  %s8833_s29 = scalar_lea.hbm %s9787_s1, 4096 }
   0x8   :  { %s41_s26 = sshll.u32 %s9157_s25, 4  ;;  %p8834_p0 = scmp.ne.s32.totalorder %s9787_s1, %s8833_s29  ;;  %s42_s26 = int_to_ptr.vmem [resolvable:$true] %s41_s26 }
   0x9   :  { %p8837_p1 = scmp.lt.u32.totalorder %s8833_s29, %s9787_s1 }
   0xb   :  { %p8839_p2 = pnand %p8837_p1, %p8834_p0 }
   0xd   :  { %8842 = shalt.err (!%p8839_p2)
}
   0xe   :  { %s8843_s17 = scalar_lea.vmem %s42_s26, 4096  ;;  %p8848_p4 = scmp.lt.s32.totalorder %s42_s26, %s42_s26 }
   0xf   :  { %p8844_p3 = scmp.ne.s32.totalorder %s42_s26, %s8843_s17  ;;  %p8849_p5 = scmp.lt.s32.totalorder %s8843_s17, %s8843_s17 }
  0x11   :  { %p8850_p6 = por %p8849_p5, %p8848_p4 }
  0x13   :  { %p8851_p7 = pnand %p8850_p6, %p8844_p3 }
  0x15   :  { %8854 = shalt.err (!%p8851_p7)
}
  0x16   :  { %s9158_s18 = smov 128   ;;  %s9159_s19 = smov 8  }
  0x17   :  { %47 = dma.hbm_to_vmem [thread:$0]  %s9787_s1, 4096, %s42_s26, [#allocation6], %s9158_s18, %s9158_s18, %s9159_s19  }
  0x18   :  { %s9160_s22 = smov [#allocation8]   ;;  %s8855_s27 = scalar_lea.hbm %s9789_s3, 8192 }
  0x19   :  { %s63_s23 = sshll.u32 %s9160_s22, 4  ;;  %p8856_p8 = scmp.ne.s32.totalorder %s9789_s3, %s8855_s27  ;;  %s64_s23 = int_to_ptr.vmem [resolvable:$true] %s63_s23 }
  0x1a   :  { %p8859_p9 = scmp.lt.u32.totalorder %s8855_s27, %s9789_s3 }
  0x1c   :  { %p8861_p10 = pnand %p8859_p9, %p8856_p8 }
  0x1e   :  { %8864 = shalt.err (!%p8861_p10)
}
  0x1f   :  { %s8865_s15 = scalar_lea.vmem %s64_s23, 8192  ;;  %p8870_p12 = scmp.lt.s32.totalorder %s64_s23, %s64_s23 }
  0x20   :  { %p8866_p11 = scmp.ne.s32.totalorder %s64_s23, %s8865_s15  ;;  %p8871_p13 = scmp.lt.s32.totalorder %s8865_s15, %s8865_s15 }
  0x22   :  { %p8872_p0 = por %p8871_p13, %p8870_p12 }
  0x24   :  { %p8873_p1 = pnand %p8872_p0, %p8866_p11 }
  0x26   :  { %8876 = shalt.err (!%p8873_p1)
}
  0x27   :  { %s9161_s1 = smov 256   ;;  %s9162_s26 = smov 16  }
  0x28   :  { %69 = dma.hbm_to_vmem [thread:$0]  %s9789_s3, 8192, %s64_s23, [#allocation9], %s9161_s1, %s9161_s1, %s9162_s26  }
  0x29   :  { %s9163_s18 = smov [#allocation11]   ;;  %s9164_s20 = smov [#allocation14]  }
  0x2a   :  { %s86_s19 = sshll.u32 %s9163_s18, 4  ;;  %s105_s21 = sshll.u32 %s9164_s20, 4  ;;  %s87_s19 = int_to_ptr.vmem [resolvable:$true] %s86_s19  ;;  %s9274_s21 = int_to_ptr.vmem [resolvable:$true] %s105_s21 }
  0x2b   :  { %s8877_s25 = scalar_lea.hbm %s9791_s5, 64 }
  0x2c   :  { %p8878_p2 = scmp.ne.s32.totalorder %s9791_s5, %s8877_s25  ;;  %p8881_p3 = scmp.lt.u32.totalorder %s8877_s25, %s9791_s5 }
  0x2e   :  { %p8883_p4 = pnand %p8881_p3, %p8878_p2 }
  0x30   :  { %8886 = shalt.err (!%p8883_p4)
}
  0x31   :  { %s8887_s3 = scalar_lea.vmem %s87_s19, 64  ;;  %p8892_p6 = scmp.lt.s32.totalorder %s87_s19, %s87_s19 }
  0x32   :  { %p8888_p5 = scmp.ne.s32.totalorder %s87_s19, %s8887_s3  ;;  %p8893_p7 = scmp.lt.s32.totalorder %s8887_s3, %s8887_s3 }
  0x34   :  { %p8894_p8 = por %p8893_p7, %p8892_p6 }
  0x36   :  { %p8895_p9 = pnand %p8894_p8, %p8888_p5 }
  0x38   :  { %8898 = shalt.err (!%p8895_p9)
}
  0x39   :  { %89 = dma.hbm_to_vmem [thread:$0]  %s9791_s5, 64, %s87_s19, [#allocation12]  }
  0x3a   :  { %s8899_s26 = scalar_lea.hbm %s9793_s7, 32768 }
  0x3b   :  { %p8900_p10 = scmp.ne.s32.totalorder %s9793_s7, %s8899_s26  ;;  %p8903_p11 = scmp.lt.u32.totalorder %s8899_s26, %s9793_s7 }
  0x3d   :  { %p8905_p12 = pnand %p8903_p11, %p8900_p10 }
  0x3f   :  { %8908 = shalt.err (!%p8905_p12)
}
  0x40   :  { %s8909_s22 = scalar_lea.vmem %s9274_s21, 32768  ;;  %p8914_p0 = scmp.lt.s32.totalorder %s9274_s21, %s9274_s21 }
  0x41   :  { %p8910_p13 = scmp.ne.s32.totalorder %s9274_s21, %s8909_s22  ;;  %p8915_p1 = scmp.lt.s32.totalorder %s8909_s22, %s8909_s22 }
  0x43   :  { %p8916_p2 = por %p8915_p1, %p8914_p0 }
  0x45   :  { %p8917_p3 = pnand %p8916_p2, %p8910_p13 }
  0x47   :  { %8920 = shalt.err (!%p8917_p3)
}
  0x48   :  { %s9165_s5 = smov 512   ;;  %s9166_s19 = smov 32  }
  0x49   :  { %111 = dma.hbm_to_vmem [thread:$0]  %s9793_s7, 32768, %s9274_s21, [#allocation15], %s9165_s5, %s9165_s5, %s9166_s19  }
  0x4a   :  { %s9167_s27 = smov [#allocation17]   ;;  %s9168_s29 = smov [#allocation20]  }
  0x4b   :  { %s128_s28 = sshll.u32 %s9167_s27, 4  ;;  %s147_s30 = sshll.u32 %s9168_s29, 4  ;;  %s129_s28 = int_to_ptr.vmem [resolvable:$true] %s128_s28  ;;  %s9305_s30 = int_to_ptr.vmem [resolvable:$true] %s147_s30 }
  0x4c   :  { %s8921_s14 = scalar_lea.hbm %s9795_s9, 128 }
  0x4d   :  { %p8922_p4 = scmp.ne.s32.totalorder %s9795_s9, %s8921_s14  ;;  %p8925_p5 = scmp.lt.u32.totalorder %s8921_s14, %s9795_s9 }
  0x4f   :  { %p8927_p6 = pnand %p8925_p5, %p8922_p4 }
  0x51   :  { %8930 = shalt.err (!%p8927_p6)
}
  0x52   :  { %s8931_s7 = scalar_lea.vmem %s129_s28, 128  ;;  %p8936_p8 = scmp.lt.s32.totalorder %s129_s28, %s129_s28 }
  0x53   :  { %p8932_p7 = scmp.ne.s32.totalorder %s129_s28, %s8931_s7  ;;  %p8937_p9 = scmp.lt.s32.totalorder %s8931_s7, %s8931_s7 }
  0x55   :  { %p8938_p10 = por %p8937_p9, %p8936_p8 }
  0x57   :  { %p8939_p11 = pnand %p8938_p10, %p8932_p7 }
  0x59   :  { %8942 = shalt.err (!%p8939_p11)
}
  0x5a   :  { %131 = dma.hbm_to_vmem [thread:$0]  %s9795_s9, 128, %s129_s28, [#allocation18]  }
  0x5b   :  { %s8943_s22 = scalar_lea.hbm %s9797_s11, 57344 }
  0x5c   :  { %p8944_p12 = scmp.ne.s32.totalorder %s9797_s11, %s8943_s22  ;;  %p8947_p13 = scmp.lt.u32.totalorder %s8943_s22, %s9797_s11 }
  0x5e   :  { %p8949_p0 = pnand %p8947_p13, %p8944_p12 }
  0x60   :  { %8952 = shalt.err (!%p8949_p0)
}
  0x61   :  { %s8953_s27 = scalar_lea.vmem %s9305_s30, 57344  ;;  %p8958_p2 = scmp.lt.s32.totalorder %s9305_s30, %s9305_s30 }
  0x62   :  { %p8954_p1 = scmp.ne.s32.totalorder %s9305_s30, %s8953_s27  ;;  %p8959_p3 = scmp.lt.s32.totalorder %s8953_s27, %s8953_s27 }
  0x64   :  { %p8960_p4 = por %p8959_p3, %p8958_p2 }
  0x66   :  { %p8961_p5 = pnand %p8960_p4, %p8954_p1 }
  0x68   :  { %8964 = shalt.err (!%p8961_p5)
}
  0x69   :  { %s9169_s9 = smov 448   ;;  %s9170_s28 = smov 28  }
  0x6a   :  { %153 = dma.hbm_to_vmem [thread:$0]  %s9797_s11, 57344, %s9305_s30, [#allocation21], %s9169_s9, %s9169_s9, %s9170_s28  }
  0x6b   :  { %s9171_s23 = smov [#allocation2]   ;;  %s9172_s15 = smov [#allocation7]  }
  0x6c   :  { %s32_s14 = sshll.u32 %s9171_s23, 4  ;;  %s54_s1 = sshll.u32 %s9172_s15, 4  ;;  %s33_s14 = int_to_ptr.vmem [resolvable:$true] %s32_s14  ;;  %s55_s1 = int_to_ptr.vmem [resolvable:$true] %s54_s1 }
  0x6d   :  { %s8965_s7 = scalar_lea.hbm %s9786_s0, 128 }
  0x6e   :  { %p8966_p6 = scmp.ne.s32.totalorder %s9786_s0, %s8965_s7  ;;  %p8969_p7 = scmp.lt.u32.totalorder %s8965_s7, %s9786_s0 }
  0x70   :  { %p8971_p8 = pnand %p8969_p7, %p8966_p6 }
  0x72   :  { %8974 = shalt.err (!%p8971_p8)
}
  0x73   :  { %s8975_s11 = scalar_lea.vmem %s33_s14, 128  ;;  %p8980_p10 = scmp.lt.s32.totalorder %s33_s14, %s33_s14 }
  0x74   :  { %p8976_p9 = scmp.ne.s32.totalorder %s33_s14, %s8975_s11  ;;  %p8981_p11 = scmp.lt.s32.totalorder %s8975_s11, %s8975_s11 }
  0x76   :  { %p8982_p12 = por %p8981_p11, %p8980_p10 }
  0x78   :  { %p8983_p13 = pnand %p8982_p12, %p8976_p9 }
  0x7a   :  { %8986 = shalt.err (!%p8983_p13)
}
  0x7b   :  { %35 = dma.hbm_to_vmem [thread:$0]  %s9786_s0, 128, %s33_s14, [#allocation3]  }
  0x7c   :  { %s8987_s24 = scalar_lea.hbm %s9788_s2, 32 }
  0x7d   :  { %p8988_p0 = scmp.ne.s32.totalorder %s9788_s2, %s8987_s24  ;;  %p8991_p1 = scmp.lt.u32.totalorder %s8987_s24, %s9788_s2 }
  0x7f   :  { %p8993_p2 = pnand %p8991_p1, %p8988_p0 }
  0x81   :  { %8996 = shalt.err (!%p8993_p2)
}
  0x82   :  { %s8997_s29 = scalar_lea.vmem %s55_s1, 32  ;;  %p9002_p4 = scmp.lt.s32.totalorder %s55_s1, %s55_s1 }
  0x83   :  { %p8998_p3 = scmp.ne.s32.totalorder %s55_s1, %s8997_s29  ;;  %p9003_p5 = scmp.lt.s32.totalorder %s8997_s29, %s8997_s29 }
  0x85   :  { %p9004_p6 = por %p9003_p5, %p9002_p4 }
  0x87   :  { %p9005_p7 = pnand %p9004_p6, %p8998_p3 }
  0x89   :  { %9008 = shalt.err (!%p9005_p7)
}
  0x8a   :  { %57 = dma.hbm_to_vmem [thread:$0]  %s9788_s2, 32, %s55_s1, [#allocation6]  }
  0x8b   :  { %s9173_s23 = smov [#allocation10]   ;;  %s9174_s15 = smov [#allocation13]  }
  0x8c   :  { %s76_s14 = sshll.u32 %s9173_s23, 4  ;;  %s96_s26 = sshll.u32 %s9174_s15, 4  ;;  %s77_s14 = int_to_ptr.vmem [resolvable:$true] %s76_s14  ;;  %s97_s26 = int_to_ptr.vmem [resolvable:$true] %s96_s26 }
  0x8d   :  { %s9009_s21 = scalar_lea.hbm %s9790_s4, 64 }
  0x8e   :  { %p9010_p8 = scmp.ne.s32.totalorder %s9790_s4, %s9009_s21  ;;  %p9013_p9 = scmp.lt.u32.totalorder %s9009_s21, %s9790_s4 }
  0x90   :  { %p9015_p10 = pnand %p9013_p9, %p9010_p8 }
  0x92   :  { %9018 = shalt.err (!%p9015_p10)
}
  0x93   :  { %s9019_s2 = scalar_lea.vmem %s77_s14, 64  ;;  %p9024_p12 = scmp.lt.s32.totalorder %s77_s14, %s77_s14 }
  0x94   :  { %p9020_p11 = scmp.ne.s32.totalorder %s77_s14, %s9019_s2  ;;  %p9025_p13 = scmp.lt.s32.totalorder %s9019_s2, %s9019_s2 }
  0x96   :  { %p9026_p0 = por %p9025_p13, %p9024_p12 }
  0x98   :  { %p9027_p1 = pnand %p9026_p0, %p9020_p11 }
  0x9a   :  { %9030 = shalt.err (!%p9027_p1)
}
  0x9b   :  { %79 = dma.hbm_to_vmem [thread:$0]  %s9790_s4, 64, %s77_s14, [#allocation9]  }
  0x9c   :  { %s9031_s19 = scalar_lea.hbm %s9792_s6, 64 }
  0x9d   :  { %p9032_p2 = scmp.ne.s32.totalorder %s9792_s6, %s9031_s19  ;;  %p9035_p3 = scmp.lt.u32.totalorder %s9031_s19, %s9792_s6 }
  0x9f   :  { %p9037_p4 = pnand %p9035_p3, %p9032_p2 }
  0xa1   :  { %9040 = shalt.err (!%p9037_p4)
}
  0xa2   :  { %s9041_s28 = scalar_lea.vmem %s97_s26, 64  ;;  %p9046_p6 = scmp.lt.s32.totalorder %s97_s26, %s97_s26 }
  0xa3   :  { %p9042_p5 = scmp.ne.s32.totalorder %s97_s26, %s9041_s28  ;;  %p9047_p7 = scmp.lt.s32.totalorder %s9041_s28, %s9041_s28 }
  0xa5   :  { %p9048_p8 = por %p9047_p7, %p9046_p6 }
  0xa7   :  { %p9049_p9 = pnand %p9048_p8, %p9042_p5 }
  0xa9   :  { %9052 = shalt.err (!%p9049_p9)
}
  0xaa   :  { %99 = dma.hbm_to_vmem [thread:$0]  %s9792_s6, 64, %s97_s26, [#allocation12]  }
  0xab   :  { %s9175_s0 = smov [#allocation16]   ;;  %s9176_s23 = smov [#allocation19]  }
  0xac   :  { %s118_s3 = sshll.u32 %s9175_s0, 4  ;;  %s138_s14 = sshll.u32 %s9176_s23, 4  ;;  %s119_s3 = int_to_ptr.vmem [resolvable:$true] %s118_s3  ;;  %s139_s14 = int_to_ptr.vmem [resolvable:$true] %s138_s14 }
  0xad   :  { %s9053_s7 = scalar_lea.hbm %s9794_s8, 128 }
  0xae   :  { %p9054_p10 = scmp.ne.s32.totalorder %s9794_s8, %s9053_s7  ;;  %p9057_p11 = scmp.lt.u32.totalorder %s9053_s7, %s9794_s8 }
  0xb0   :  { %p9059_p12 = pnand %p9057_p11, %p9054_p10 }
  0xb2   :  { %9062 = shalt.err (!%p9059_p12)
}
  0xb3   :  { %s9063_s6 = scalar_lea.vmem %s119_s3, 128  ;;  %p9068_p0 = scmp.lt.s32.totalorder %s119_s3, %s119_s3 }
  0xb4   :  { %p9064_p13 = scmp.ne.s32.totalorder %s119_s3, %s9063_s6  ;;  %p9069_p1 = scmp.lt.s32.totalorder %s9063_s6, %s9063_s6 }
  0xb6   :  { %p9070_p2 = por %p9069_p1, %p9068_p0 }
  0xb8   :  { %p9071_p3 = pnand %p9070_p2, %p9064_p13 }
  0xba   :  { %9074 = shalt.err (!%p9071_p3)
}
  0xbb   :  { %121 = dma.hbm_to_vmem [thread:$0]  %s9794_s8, 128, %s119_s3, [#allocation15]  }
  0xbc   :  { %s9075_s30 = scalar_lea.hbm %s9796_s10, 128 }
  0xbd   :  { %p9076_p4 = scmp.ne.s32.totalorder %s9796_s10, %s9075_s30  ;;  %p9079_p5 = scmp.lt.u32.totalorder %s9075_s30, %s9796_s10 }
  0xbf   :  { %p9081_p6 = pnand %p9079_p5, %p9076_p4 }
  0xc1   :  { %9084 = shalt.err (!%p9081_p6)
}
  0xc2   :  { %s9085_s25 = scalar_lea.vmem %s139_s14, 128  ;;  %p9090_p8 = scmp.lt.s32.totalorder %s139_s14, %s139_s14 }
  0xc3   :  { %p9086_p7 = scmp.ne.s32.totalorder %s139_s14, %s9085_s25  ;;  %p9091_p9 = scmp.lt.s32.totalorder %s9085_s25, %s9085_s25 }
  0xc5   :  { %p9092_p10 = por %p9091_p9, %p9090_p8 }
  0xc7   :  { %p9093_p11 = pnand %p9092_p10, %p9086_p7 }
  0xc9   :  { %9096 = shalt.err (!%p9093_p11)
}
  0xca   :  { %141 = dma.hbm_to_vmem [thread:$0]  %s9796_s10, 128, %s139_s14, [#allocation18]  }
  0xcb   :  { %s9177_s9 = smov [#allocation22]   ;;  %s9097_s0 = scalar_lea.hbm %s9798_s12, 112 }
  0xcc   :  { %s160_s28 = sshll.u32 %s9177_s9, 4  ;;  %p9098_p12 = scmp.ne.s32.totalorder %s9798_s12, %s9097_s0  ;;  %s161_s28 = int_to_ptr.vmem [resolvable:$true] %s160_s28 }
  0xcd   :  { %p9101_p13 = scmp.lt.u32.totalorder %s9097_s0, %s9798_s12 }
  0xcf   :  { %p9103_p0 = pnand %p9101_p13, %p9098_p12 }
  0xd1   :  { %9106 = shalt.err (!%p9103_p0)
}
  0xd2   :  { %s9107_s7 = scalar_lea.vmem %s161_s28, 112  ;;  %s9111_s10 = scalar_lea.vmem %s161_s28, 128 }
  0xd3   :  { %p9108_p1 = scmp.ne.s32.totalorder %s161_s28, %s9107_s7  ;;  %p9112_p2 = scmp.lt.s32.totalorder %s161_s28, %s161_s28 }
  0xd4   :  { %p9113_p3 = scmp.lt.s32.totalorder %s9111_s10, %s9107_s7 }
  0xd6   :  { %p9114_p4 = por %p9113_p3, %p9112_p2 }
  0xd8   :  { %p9115_p5 = pnand %p9114_p4, %p9108_p1 }
  0xda   :  { %9118 = shalt.err (!%p9115_p5)
}
  0xdb   :  { %163 = dma.hbm_to_vmem [thread:$0]  %s9798_s12, 112, %s161_s28, [#allocation21]  }
  0xdc   :  { %9141 = dma.done.wait [#allocation3], 128  }
  0xdd   :  { %9142 = vsyncadd [#allocation3], 4294967168 }
  0xde   :  { %9143 = dma.done.wait [#allocation6], 4128  }
  0xdf   :  { %9144 = vsyncadd [#allocation6], 4294963168 }
  0xe0   :  { %9145 = dma.done.wait [#allocation9], 8256  }
  0xe1   :  { %9146 = vsyncadd [#allocation9], 4294959040 }
  0xe2   :  { %9147 = dma.done.wait [#allocation12], 128  }
  0xe3   :  { %9148 = vsyncadd [#allocation12], 4294967168 }
  0xe4   :  { %9149 = dma.done.wait [#allocation15], 32896  }
  0xe5   :  { %9150 = vsyncadd [#allocation15], 4294934400 }
  0xe6   :  { %9151 = dma.done.wait [#allocation18], 256  }
  0xe7   :  { %9152 = vsyncadd [#allocation18], 4294967040 }
  0xe8   :  { %9153 = dma.done.wait [#allocation21], 57456  }
  0xe9   :  { %9154 = vsyncadd [#allocation21], 4294909840  ;;  %v8009_v0 = vld [vmem:[#allocation5 + $0x4] ss:$8 sps:$4 sm:$0xff]   ;;  %v8011_v1 = vld [vmem:[#allocation5] ss:$8 sps:$4 sm:$0xff]  }
  0xea   :  { %416 = vmatprep.subr.bf16.mxu0 %v8009_v0  ;;  %v8012_v2 = vld [vmem:[#allocation5 + $0x14] ss:$8 sps:$4 sm:$0xff]   ;;  %v8014_v3 = vld [vmem:[#allocation5 + $0x10] ss:$8 sps:$4 sm:$0xff]   ;;  %v8015_v4 = vld [vmem:[#allocation5 + $0x24] ss:$8 sps:$4 sm:$0xff]  }
  0xeb   :  { %417 = vmatpush1.bf16.msra.mxu0 %v8011_v1  ;;  %v8017_v5 = vld [vmem:[#allocation5 + $0x20] ss:$8 sps:$4 sm:$0xff]   ;;  %v8018_v6 = vld [vmem:[#allocation5 + $0x34] ss:$8 sps:$4 sm:$0xff]   ;;  %v8020_v7 = vld [vmem:[#allocation5 + $0x30] ss:$8 sps:$4 sm:$0xff]  }
  0xec   :  { %418 = vmatprep.subr.bf16.mxu0 %v8012_v2  ;;  %v8021_v8 = vld [vmem:[#allocation5 + $0x44] ss:$8 sps:$4 sm:$0xff]   ;;  %v8023_v9 = vld [vmem:[#allocation5 + $0x40] ss:$8 sps:$4 sm:$0xff]   ;;  %v8024_v10 = vld [vmem:[#allocation5 + $0x54] ss:$8 sps:$4 sm:$0xff]  }
  0xed   :  { %v8026_v11 = vld [vmem:[#allocation5 + $0x50] ss:$8 sps:$4 sm:$0xff]   ;;  %v8027_v12 = vld [vmem:[#allocation5 + $0x64] ss:$8 sps:$4 sm:$0xff]   ;;  %v8029_v16 = vld [vmem:[#allocation5 + $0x60] ss:$8 sps:$4 sm:$0xff]  }
  0xee   :  { %v9420_v13 = vld [vmem:[#allocation2] sm:$0xff]  ;;  %v8064_v18 = vld [vmem:[#allocation8] ss:$16 sps:$4 sm:$0xff]   ;;  %s9179_s12 = smov [#allocation23]  }
  0xef   :  { %419 = vmatpush1.bf16.msra.mxu0 %v8014_v3  ;;  %v7031_v14 = vcombine.high %v9420_v13, %v9420_v13  ;;  %v8059_v15 = vld [vmem:[#allocation8 + $0x4] ss:$16 sps:$4 sm:$0xff]   ;;  %v8070_v21 = vld [vmem:[#allocation8 + $0x20] ss:$16 sps:$4 sm:$0xff]   ;;  %v8063_v53 = vld [vmem:[#allocation8 + $0xc] ss:$16 sps:$4 sm:$0xff]   ;;  %v7030_v59 = vcombine.low %v9420_v13, %v9420_v13 }
  0xf0   :  { %420 = vmatprep.subr.bf16.mxu0 %v8015_v4  ;;  %v8030_v17 = vld [vmem:[#allocation5 + $0x74] ss:$8 sps:$4 sm:$0xff]   ;;  %871 = vmatprep.subr.bf16.mxu1 %v8059_v15  ;;  %v8032_v20 = vld [vmem:[#allocation5 + $0x70] ss:$8 sps:$4 sm:$0xff]   ;;  %v8033_v23 = vld [vmem:[#allocation5 + $0x84] ss:$8 sps:$4 sm:$0xff]  }
  0xf1   :  { %448 = vmatprep.mubr.bf16.mxu0 %v7031_v14  ;;  %v8065_v19 = vld [vmem:[#allocation8 + $0x24] ss:$16 sps:$4 sm:$0xff]   ;;  %872 = vmatpush1.bf16.msra.mxu1 %v8064_v18  ;;  %v8076_v24 = vld [vmem:[#allocation8 + $0x40] ss:$16 sps:$4 sm:$0xff]   ;;  %v8061_v57 = vld [vmem:[#allocation8 + $0x8] ss:$16 sps:$4 sm:$0xff]  }
  0xf2   :  { %873 = vmatprep.subr.bf16.mxu1 %v8065_v19  ;;  %v8071_v22 = vld [vmem:[#allocation8 + $0x44] ss:$16 sps:$4 sm:$0xff]   ;;  %v8082_v29 = vld [vmem:[#allocation8 + $0x60] ss:$16 sps:$4 sm:$0xff]   ;;  %v8069_v60 = vld [vmem:[#allocation8 + $0x2c] ss:$16 sps:$4 sm:$0xff]  }
  0xf3   :  { %421 = vmatpush1.bf16.msra.mxu0 %v8017_v5  ;;  %v8035_v25 = vld [vmem:[#allocation5 + $0x80] ss:$8 sps:$4 sm:$0xff]   ;;  %v8036_v27 = vld [vmem:[#allocation5 + $0x94] ss:$8 sps:$4 sm:$0xff]   ;;  %v8038_v28 = vld [vmem:[#allocation5 + $0x90] ss:$8 sps:$4 sm:$0xff]  }
  0xf4   :  { %422 = vmatprep.subr.bf16.mxu0 %v8018_v6  ;;  %v8077_v26 = vld [vmem:[#allocation8 + $0x64] ss:$16 sps:$4 sm:$0xff]   ;;  %v8088_v32 = vld [vmem:[#allocation8 + $0x80] ss:$16 sps:$4 sm:$0xff]   ;;  %v8067_v62 = vld [vmem:[#allocation8 + $0x28] ss:$16 sps:$4 sm:$0xff]  }
  0xf5   :  { %874 = vmatpush1.bf16.msra.mxu1 %v8070_v21  ;;  %v8083_v30 = vld [vmem:[#allocation8 + $0x84] ss:$16 sps:$4 sm:$0xff]   ;;  %v8094_v37 = vld [vmem:[#allocation8 + $0xa0] ss:$16 sps:$4 sm:$0xff]   ;;  %v8075_v0 = vld [vmem:[#allocation8 + $0x4c] ss:$16 sps:$4 sm:$0xff]  }
  0xf6   :  { %875 = vmatprep.subr.bf16.mxu1 %v8071_v22  ;;  %v8039_v31 = vld [vmem:[#allocation5 + $0xa4] ss:$8 sps:$4 sm:$0xff]   ;;  %v8041_v33 = vld [vmem:[#allocation5 + $0xa0] ss:$8 sps:$4 sm:$0xff]   ;;  %v8042_v35 = vld [vmem:[#allocation5 + $0xb4] ss:$8 sps:$4 sm:$0xff]  }
  0xf7   :  { %423 = vmatpush1.bf16.msra.mxu0 %v8020_v7  ;;  %v8089_v34 = vld [vmem:[#allocation8 + $0xa4] ss:$16 sps:$4 sm:$0xff]   ;;  %v8100_v40 = vld [vmem:[#allocation8 + $0xc0] ss:$16 sps:$4 sm:$0xff]   ;;  %v8073_v2 = vld [vmem:[#allocation8 + $0x48] ss:$16 sps:$4 sm:$0xff]  }
  0xf8   :  { %424 = vmatprep.subr.bf16.mxu0 %v8021_v8  ;;  %v8044_v36 = vld [vmem:[#allocation5 + $0xb0] ss:$8 sps:$4 sm:$0xff]   ;;  %v8045_v39 = vld [vmem:[#allocation5 + $0xc4] ss:$8 sps:$4 sm:$0xff]   ;;  %v8047_v41 = vld [vmem:[#allocation5 + $0xc0] ss:$8 sps:$4 sm:$0xff]  }
  0xf9   :  { %876 = vmatpush1.bf16.msra.mxu1 %v8076_v24  ;;  %v8095_v38 = vld [vmem:[#allocation8 + $0xc4] ss:$16 sps:$4 sm:$0xff]   ;;  %v8106_v45 = vld [vmem:[#allocation8 + $0xe0] ss:$16 sps:$4 sm:$0xff]   ;;  %v8081_v4 = vld [vmem:[#allocation8 + $0x6c] ss:$16 sps:$4 sm:$0xff]  }
  0xfa   :  { %877 = vmatprep.subr.bf16.mxu1 %v8077_v26  ;;  %v8101_v42 = vld [vmem:[#allocation8 + $0xe4] ss:$16 sps:$4 sm:$0xff]   ;;  %v8112_v48 = vld [vmem:[#allocation8 + $0x100] ss:$16 sps:$4 sm:$0xff]   ;;  %v8079_v6 = vld [vmem:[#allocation8 + $0x68] ss:$16 sps:$4 sm:$0xff]  }
  0xfb   :  { %425 = vmatpush1.bf16.msra.mxu0 %v8023_v9  ;;  %v8048_v43 = vld [vmem:[#allocation5 + $0xd4] ss:$8 sps:$4 sm:$0xff]   ;;  %v8050_v44 = vld [vmem:[#allocation5 + $0xd0] ss:$8 sps:$4 sm:$0xff]   ;;  %v8051_v47 = vld [vmem:[#allocation5 + $0xe4] ss:$8 sps:$4 sm:$0xff]  }
  0xfc   :  { %426 = vmatprep.subr.bf16.mxu0 %v8024_v10  ;;  %v8107_v46 = vld [vmem:[#allocation8 + $0x104] ss:$16 sps:$4 sm:$0xff]   ;;  %v8118_v54 = vld [vmem:[#allocation8 + $0x120] ss:$16 sps:$4 sm:$0xff]   ;;  %v8087_v7 = vld [vmem:[#allocation8 + $0x8c] ss:$16 sps:$4 sm:$0xff]  }
  0xfd   :  { %878 = vmatpush1.bf16.msra.mxu1 %v8082_v29  ;;  %v8053_v49 = vld [vmem:[#allocation5 + $0xe0] ss:$8 sps:$4 sm:$0xff]   ;;  %v8054_v51 = vld [vmem:[#allocation5 + $0xf4] ss:$8 sps:$4 sm:$0xff]   ;;  %v8056_v52 = vld [vmem:[#allocation5 + $0xf0] ss:$8 sps:$4 sm:$0xff]  }
  0xfe   :  { %879 = vmatprep.subr.bf16.mxu1 %v8083_v30  ;;  %v8113_v50 = vld [vmem:[#allocation8 + $0x124] ss:$16 sps:$4 sm:$0xff]   ;;  %v8124_v56 = vld [vmem:[#allocation8 + $0x140] ss:$16 sps:$4 sm:$0xff]   ;;  %v8085_v8 = vld [vmem:[#allocation8 + $0x88] ss:$16 sps:$4 sm:$0xff]  }
  0xff   :  { %427 = vmatpush1.bf16.msra.mxu0 %v8026_v11  ;;  %v8119_v55 = vld [vmem:[#allocation8 + $0x144] ss:$16 sps:$4 sm:$0xff]   ;;  %v8130_v61 = vld [vmem:[#allocation8 + $0x160] ss:$16 sps:$4 sm:$0xff]   ;;  %v8093_v9 = vld [vmem:[#allocation8 + $0xac] ss:$16 sps:$4 sm:$0xff]  }
 0x100   :  { %428 = vmatprep.subr.bf16.mxu0 %v8027_v12  ;;  %v8125_v58 = vld [vmem:[#allocation8 + $0x164] ss:$16 sps:$4 sm:$0xff]   ;;  %v8136_v1 = vld [vmem:[#allocation8 + $0x180] ss:$16 sps:$4 sm:$0xff]   ;;  %v8091_v10 = vld [vmem:[#allocation8 + $0xa8] ss:$16 sps:$4 sm:$0xff]  }
 0x101   :  { %880 = vmatpush1.bf16.msra.mxu1 %v8088_v32  ;;  %v8131_v63 = vld [vmem:[#allocation8 + $0x184] ss:$16 sps:$4 sm:$0xff]   ;;  %v8142_v5 = vld [vmem:[#allocation8 + $0x1a0] ss:$16 sps:$4 sm:$0xff]   ;;  %v8099_v11 = vld [vmem:[#allocation8 + $0xcc] ss:$16 sps:$4 sm:$0xff]  }
 0x102   :  { %881 = vmatprep.subr.bf16.mxu1 %v8089_v34  ;;  %v8137_v3 = vld [vmem:[#allocation8 + $0x1a4] ss:$16 sps:$4 sm:$0xff]   ;;  %v8097_v12 = vld [vmem:[#allocation8 + $0xc8] ss:$16 sps:$4 sm:$0xff]   ;;  %v8105_v13 = vld [vmem:[#allocation8 + $0xec] ss:$16 sps:$4 sm:$0xff]  }
 0x103   :  { %429 = vmatpush1.bf16.msra.mxu0 %v8029_v16  ;;  %v8103_v14 = vld [vmem:[#allocation8 + $0xe8] ss:$16 sps:$4 sm:$0xff]   ;;  %v8111_v15 = vld [vmem:[#allocation8 + $0x10c] ss:$16 sps:$4 sm:$0xff]   ;;  %v8148_v30 = vld [vmem:[#allocation8 + $0x1c0] ss:$16 sps:$4 sm:$0xff]  }
 0x104   :  { %430 = vmatprep.subr.bf16.mxu0 %v8030_v17  ;;  %v8109_v16 = vld [vmem:[#allocation8 + $0x108] ss:$16 sps:$4 sm:$0xff]   ;;  %v8117_v17 = vld [vmem:[#allocation8 + $0x12c] ss:$16 sps:$4 sm:$0xff]   ;;  %v8154_v34 = vld [vmem:[#allocation8 + $0x1e0] ss:$16 sps:$4 sm:$0xff]  }
 0x105   :  { %882 = vmatpush1.bf16.msra.mxu1 %v8094_v37  ;;  %v8115_v18 = vld [vmem:[#allocation8 + $0x128] ss:$16 sps:$4 sm:$0xff]   ;;  %v8123_v19 = vld [vmem:[#allocation8 + $0x14c] ss:$16 sps:$4 sm:$0xff]   ;;  %s7015_s17 = sshll.u32 %s9179_s12, 4  ;;  %s7016_s17 = int_to_ptr.vmem [resolvable:$true] %s7015_s17 }
 0x106   :  { %883 = vmatprep.subr.bf16.mxu1 %v8095_v38  ;;  %v8129_v21 = vld [vmem:[#allocation8 + $0x16c] ss:$16 sps:$4 sm:$0xff]   ;;  %v8127_v22 = vld [vmem:[#allocation8 + $0x168] ss:$16 sps:$4 sm:$0xff]   ;;  %s9119_s18 = scalar_lea.vmem %s7016_s17, 896  ;;  %p9124_p7 = scmp.lt.s32.totalorder %s7016_s17, %s7016_s17 }
 0x107   :  { %431 = vmatpush1.bf16.msra.mxu0 %v8032_v20  ;;  %v8121_v20 = vld [vmem:[#allocation8 + $0x148] ss:$16 sps:$4 sm:$0xff]   ;;  %v237_v38 = vld [vmem:[#allocation7] sm:$0x3]  ;;  %p9120_p6 = scmp.ne.s32.totalorder %s7016_s17, %s9119_s18  ;;  %p9125_p8 = scmp.lt.s32.totalorder %s9119_s18, %s9119_s18 }
 0x108   :  { %432 = vmatprep.subr.bf16.mxu0 %v8033_v23  ;;  %v8135_v23 = vld [vmem:[#allocation8 + $0x18c] ss:$16 sps:$4 sm:$0xff]   ;;  %v8133_v24 = vld [vmem:[#allocation8 + $0x188] ss:$16 sps:$4 sm:$0xff]  }
 0x109   :  { %884 = vmatpush1.bf16.msra.mxu1 %v8100_v40  ;;  %v8139_v26 = vld [vmem:[#allocation8 + $0x1a8] ss:$16 sps:$4 sm:$0xff]   ;;  %p9126_p9 = por %p9125_p8, %p9124_p7 }
 0x10a   :  { %885 = vmatprep.subr.bf16.mxu1 %v8101_v42  ;;  %v8145_v29 = vld [vmem:[#allocation8 + $0x1c8] ss:$16 sps:$4 sm:$0xff]  }
 0x10b   :  { %433 = vmatpush1.bf16.msra.mxu0 %v8035_v25  ;;  %v8141_v25 = vld [vmem:[#allocation8 + $0x1ac] ss:$16 sps:$4 sm:$0xff]   ;;  %v8151_v32 = vld [vmem:[#allocation8 + $0x1e8] ss:$16 sps:$4 sm:$0xff]   ;;  %p9127_p10 = pnand %p9126_p9, %p9120_p6 }
 0x10c   :  { %434 = vmatprep.subr.bf16.mxu0 %v8036_v27  ;;  %v8143_v27 = vld [vmem:[#allocation8 + $0x1c4] ss:$16 sps:$4 sm:$0xff]  }
 0x10d   :  { %886 = vmatpush1.bf16.msra.mxu1 %v8106_v45 }
 0x10e   :  { %887 = vmatprep.subr.bf16.mxu1 %v8107_v46 }
 0x10f   :  { %435 = vmatpush1.bf16.msra.mxu0 %v8038_v28  ;;  %v8147_v28 = vld [vmem:[#allocation8 + $0x1cc] ss:$16 sps:$4 sm:$0xff]  }
 0x110   :  { %436 = vmatprep.subr.bf16.mxu0 %v8039_v31  ;;  %v8149_v31 = vld [vmem:[#allocation8 + $0x1e4] ss:$16 sps:$4 sm:$0xff]  }
 0x111   :  { %888 = vmatpush1.bf16.msra.mxu1 %v8112_v48 }
 0x112   :  { %889 = vmatprep.subr.bf16.mxu1 %v8113_v50 }
 0x113   :  { %437 = vmatpush1.bf16.msra.mxu0 %v8041_v33  ;;  %v8153_v33 = vld [vmem:[#allocation8 + $0x1ec] ss:$16 sps:$4 sm:$0xff]  }
 0x114   :  { %438 = vmatprep.subr.bf16.mxu0 %v8042_v35  ;;  %v239_v35 = vlaneseq }
 0x115   :  { %890 = vmatpush1.bf16.msra.mxu1 %v8118_v54  ;;  %v1166_v54 = vld [vmem:[#allocation14] sm:$0xff] }
 0x116   :  { %891 = vmatprep.subr.bf16.mxu1 %v8119_v55  ;;  %v1170_v55 = vld [vmem:[#allocation14 + $0x20] sm:$0xff] }
 0x117   :  { %439 = vmatpush1.bf16.msra.mxu0 %v8044_v36  ;;  %v9426_v36 = vshrl.u32 %v239_v35, 7 }
 0x118   :  { %440 = vmatprep.subr.bf16.mxu0 %v8045_v39 }
 0x119   :  { %892 = vmatpush1.bf16.msra.mxu1 %v8124_v56  ;;  %v9429_v37 = vsub.s32 0, %v9426_v36  ;;  %v9432_v39 = vsub.s32 1, %v9426_v36  ;;  %v1167_v56 = vld [vmem:[#allocation14 + $0x8] sm:$0xff] }
 0x11a   :  { %893 = vmatprep.subr.bf16.mxu1 %v8125_v58  ;;  %v1171_v58 = vld [vmem:[#allocation14 + $0x28] sm:$0xff] }
 0x11b   :  { %441 = vmatpush1.bf16.msra.mxu0 %v8047_v41  ;;  %v242_v40 = vrot.slane %v237_v38, %v9429_v37  ;;  %v246_v41 = vrot.slane %v237_v38, %v9432_v39 }
 0x11c   :  { %442 = vmatprep.subr.bf16.mxu0 %v8048_v43 }
 0x11d   :  { %894 = vmatpush1.bf16.msra.mxu1 %v8130_v61  ;;  %v7131_v61 = vcombine.high %v1167_v56, %v1171_v58 }
 0x11e   :  { %895 = vmatprep.subr.bf16.mxu1 %v8131_v63  ;;  %v1178_v63 = vld [vmem:[#allocation14 + $0x60] sm:$0xff] }
 0x11f   :  { %443 = vmatpush1.bf16.msra.mxu0 %v8050_v44 }
 0x120   :  { %444 = vmatprep.subr.bf16.mxu0 %v8051_v47 }
 0x121   :  { %896 = vmatpush1.bf16.msra.mxu1 %v8136_v1 }
 0x122   :  { %897 = vmatprep.subr.bf16.mxu1 %v8137_v3 }
 0x123   :  { %445 = vmatpush1.bf16.msra.mxu0 %v8053_v49 }
 0x124   :  { %446 = vmatprep.subr.bf16.mxu0 %v8054_v51 }
 0x125   :  { %898 = vmatpush1.bf16.msra.mxu1 %v8142_v5 }
 0x126   :  { %899 = vmatprep.subr.bf16.mxu1 %v8143_v27 }
 0x127   :  { %447 = vmatpush1.bf16.msra.mxu0 %v8056_v52 }
 0x128   :  { %912 = vmatprep.subr.bf16.mxu0 %v8063_v53 }
 0x129   :  { %900 = vmatpush1.bf16.msra.mxu1 %v8148_v30  ;;  %v1206_v30 = vld [vmem:[#allocation14 + $0x140] sm:$0xff] }
 0x12a   :  { %449 = vmatmul.mubr.bf16.vlgmr.msra.gmra.mrb[0].mxu0 %v7030_v59  ;;  %901 = vmatprep.subr.bf16.mxu1 %v8149_v31  ;;  %v7128_v59 = vcombine.low %v1166_v54, %v1170_v55  ;;  %v1210_v31 = vld [vmem:[#allocation14 + $0x160] sm:$0xff] }
 0x12b   :  { %913 = vmatpush1.bf16.msra.mxu0 %v8061_v57  ;;  %v7129_v57 = vcombine.high %v1166_v54, %v1170_v55  ;;  %v7168_v35 = vcombine.low %v1206_v30, %v1210_v31 }
 0x12c   :  { %914 = vmatprep.subr.bf16.mxu0 %v8069_v60  ;;  %v7130_v60 = vcombine.low %v1167_v56, %v1171_v58  ;;  %v1234_v58 = vld [vmem:[#allocation14 + $0x220] sm:$0xff] }
 0x12d   :  { %902 = vmatpush1.bf16.msra.mxu1 %v8154_v34  ;;  %v1211_v34 = vld [vmem:[#allocation14 + $0x168] sm:$0xff] }
 0x12e   :  { %2744 = vmatprep.subr.bf16.mxu1 %v7129_v57  ;;  %v1230_v57 = vld [vmem:[#allocation14 + $0x200] sm:$0xff] }
 0x12f   :  { %915 = vmatpush1.bf16.msra.mxu0 %v8067_v62  ;;  %v1174_v62 = vld [vmem:[#allocation14 + $0x40] sm:$0xff] }
 0x130   :  { %916 = vmatprep.subr.bf16.mxu0 %v8075_v0  ;;  %v1175_v0 = vld [vmem:[#allocation14 + $0x48] sm:$0xff]  ;;  %v7137_v1 = vcombine.high %v1174_v62, %v1178_v63  ;;  %v7136_v3 = vcombine.low %v1174_v62, %v1178_v63  ;;  %v7192_v62 = vcombine.low %v1230_v57, %v1234_v58 }
 0x133   :  { %917 = vmatpush1.bf16.msra.mxu0 %v8073_v2  ;;  %v1179_v2 = vld [vmem:[#allocation14 + $0x68] sm:$0xff] }
 0x134   :  { %918 = vmatprep.subr.bf16.mxu0 %v8081_v4  ;;  %v7138_v4 = vcombine.low %v1175_v0, %v1179_v2  ;;  %v7139_v5 = vcombine.high %v1175_v0, %v1179_v2  ;;  %v1242_v2 = vld [vmem:[#allocation14 + $0x260] sm:$0xff] }
 0x137   :  { %919 = vmatpush1.bf16.msra.mxu0 %v8079_v6  ;;  %v1182_v6 = vld [vmem:[#allocation14 + $0x80] sm:$0xff] }
 0x138   :  { %920 = vmatprep.subr.bf16.mxu0 %v8087_v7  ;;  %v1186_v7 = vld [vmem:[#allocation14 + $0xa0] sm:$0xff] }
 0x13b   :  { %921 = vmatpush1.bf16.msra.mxu0 %v8085_v8  ;;  %v1183_v8 = vld [vmem:[#allocation14 + $0x88] sm:$0xff] }
 0x13c   :  { %922 = vmatprep.subr.bf16.mxu0 %v8093_v9  ;;  %v7145_v9 = vcombine.high %v1182_v6, %v1186_v7 }
 0x13f   :  { %923 = vmatpush1.bf16.msra.mxu0 %v8091_v10  ;;  %v1187_v10 = vld [vmem:[#allocation14 + $0xa8] sm:$0xff] }
 0x140   :  { %924 = vmatprep.subr.bf16.mxu0 %v8099_v11  ;;  %v7144_v11 = vcombine.low %v1182_v6, %v1186_v7 }
 0x143   :  { %925 = vmatpush1.bf16.msra.mxu0 %v8097_v12  ;;  %v7146_v12 = vcombine.low %v1183_v8, %v1187_v10 }
 0x144   :  { %926 = vmatprep.subr.bf16.mxu0 %v8105_v13  ;;  %v7147_v13 = vcombine.high %v1183_v8, %v1187_v10  ;;  %v1250_v10 = vld [vmem:[#allocation14 + $0x2a0] sm:$0xff] }
 0x147   :  { %927 = vmatpush1.bf16.msra.mxu0 %v8103_v14  ;;  %v1190_v14 = vld [vmem:[#allocation14 + $0xc0] sm:$0xff] }
 0x148   :  { %928 = vmatprep.subr.bf16.mxu0 %v8111_v15  ;;  %v1194_v15 = vld [vmem:[#allocation14 + $0xe0] sm:$0xff] }
 0x14b   :  { %929 = vmatpush1.bf16.msra.mxu0 %v8109_v16  ;;  %v1191_v16 = vld [vmem:[#allocation14 + $0xc8] sm:$0xff] }
 0x14c   :  { %930 = vmatprep.subr.bf16.mxu0 %v8117_v17  ;;  %v7153_v17 = vcombine.high %v1190_v14, %v1194_v15 }
 0x14f   :  { %931 = vmatpush1.bf16.msra.mxu0 %v8115_v18  ;;  %v1195_v18 = vld [vmem:[#allocation14 + $0xe8] sm:$0xff] }
 0x150   :  { %932 = vmatprep.subr.bf16.mxu0 %v8123_v19  ;;  %v7152_v19 = vcombine.low %v1190_v14, %v1194_v15 }
 0x153   :  { %933 = vmatpush1.bf16.msra.mxu0 %v8121_v20  ;;  %v7154_v20 = vcombine.low %v1191_v16, %v1195_v18 }
 0x154   :  { %934 = vmatprep.subr.bf16.mxu0 %v8129_v21  ;;  %v7155_v21 = vcombine.high %v1191_v16, %v1195_v18  ;;  %v1258_v18 = vld [vmem:[#allocation14 + $0x2e0] sm:$0xff] }
 0x157   :  { %935 = vmatpush1.bf16.msra.mxu0 %v8127_v22  ;;  %v1198_v22 = vld [vmem:[#allocation14 + $0x100] sm:$0xff] }
 0x158   :  { %936 = vmatprep.subr.bf16.mxu0 %v8135_v23  ;;  %v1202_v23 = vld [vmem:[#allocation14 + $0x120] sm:$0xff] }
 0x159   :  { %v7160_v27 = vcombine.low %v1198_v22, %v1202_v23 }
 0x15b   :  { %937 = vmatpush1.bf16.msra.mxu0 %v8133_v24  ;;  %v1199_v24 = vld [vmem:[#allocation14 + $0x108] sm:$0xff] }
 0x15c   :  { %938 = vmatprep.subr.bf16.mxu0 %v8141_v25  ;;  %v7161_v25 = vcombine.high %v1198_v22, %v1202_v23 }
 0x15f   :  { %939 = vmatpush1.bf16.msra.mxu0 %v8139_v26  ;;  %v1203_v26 = vld [vmem:[#allocation14 + $0x128] sm:$0xff] }
 0x160   :  { %940 = vmatprep.subr.bf16.mxu0 %v8147_v28  ;;  %v7162_v28 = vcombine.low %v1199_v24, %v1203_v26 }
 0x163   :  { %941 = vmatpush1.bf16.msra.mxu0 %v8145_v29  ;;  %v7163_v29 = vcombine.high %v1199_v24, %v1203_v26  ;;  %v1266_v26 = vld [vmem:[#allocation14 + $0x320] sm:$0xff] }
 0x164   :  { %942 = vmatprep.subr.bf16.mxu0 %v8153_v33  ;;  %v7169_v33 = vcombine.high %v1206_v30, %v1210_v31 }
 0x167   :  { %943 = vmatpush1.bf16.msra.mxu0 %v8151_v32  ;;  %v1207_v32 = vld [vmem:[#allocation14 + $0x148] sm:$0xff] }
 0x168   :  { %2826 = vmatprep.subr.bf16.mxu0 %v7131_v61  ;;  %v7170_v38 = vcombine.low %v1207_v32, %v1211_v34  ;;  %v1235_v61 = vld [vmem:[#allocation14 + $0x228] sm:$0xff] }
 0x1fd   :  { %v450_v42 = vpop.f32.mrb[0].mxu0 }
 0x1fe   :  { %v451_v43 = vadd.f32 %v450_v42, %v242_v40  ;;  %v452_v44 = vpop.f32.mrb[1].mxu0  ;;  %v7171_v40 = vcombine.high %v1207_v32, %v1211_v34  ;;  %v1218_v42 = vld [vmem:[#allocation14 + $0x1a0] sm:$0xff] }
 0x1ff   :  { %v453_v45 = vadd.f32 %v452_v44, %v246_v41  ;;  %v454_v46 = vpop.f32.mrb[2].mxu0  ;;  %v1214_v41 = vld [vmem:[#allocation14 + $0x180] sm:$0xff] }
 0x200   :  { %vm457_vm0 = vcmp.gt.f32.partialorder %v451_v43, 0.0  ;;  %v459_v47 = vmul.f32 0.2, %v451_v43  ;;  %v455_v48 = vpop.f32.mrb[3].mxu0  ;;  %v7177_v44 = vcombine.high %v1214_v41, %v1218_v42  ;;  %v7176_v46 = vcombine.low %v1214_v41, %v1218_v42  ;;  %v1274_v34 = vld [vmem:[#allocation14 + $0x360] sm:$0xff] }
 0x201   :  { %v460_v49 = vmul.f32 0.2, %v453_v45  ;;  %vm458_vm1 = vcmp.gt.f32.partialorder %v453_v45, 0.0 }
 0x202   :  { %v461_v50 = vsel %vm457_vm0, %v451_v43, %v459_v47  ;;  %v1215_v43 = vld [vmem:[#allocation14 + $0x188] sm:$0xff] }
 0x203   :  { %v462_v51 = vsel %vm458_vm1, %v453_v45, %v460_v49  ;;  %v463_v53 = vpack.c.bf16 %v461_v50, %v461_v50  ;;  %v1219_v45 = vld [vmem:[#allocation14 + $0x1a8] sm:$0xff]  ;;  %v1222_v49 = vld [vmem:[#allocation14 + $0x1c0] sm:$0xff] }
 0x204   :  { %v464_v52 = vpack.c.bf16 %v462_v51, %v462_v51  ;;  %v7178_v47 = vcombine.low %v1215_v43, %v1219_v45  ;;  %v7179_v48 = vcombine.high %v1215_v43, %v1219_v45  ;;  %v1226_v50 = vld [vmem:[#allocation14 + $0x1e0] sm:$0xff]  ;;  %v1223_v51 = vld [vmem:[#allocation14 + $0x1c8] sm:$0xff] }
 0x205   :  { %v7184_v54 = vcombine.low %v1222_v49, %v1226_v50  ;;  %v1282_v45 = vld [vmem:[#allocation14 + $0x3a0] sm:$0xff] }
 0x206   :  { %903 = vmatprep.mubr.bf16.mxu1 %v464_v52  ;;  %944 = vmatprep.mubr.bf16.mxu0 %v464_v52  ;;  %v7185_v52 = vcombine.high %v1222_v49, %v1226_v50 }
 0x207   :  { %904 = vmatmul.mubr.bf16.vlgmr.msra.gmra.mrb[0].mxu1 %v463_v53  ;;  %945 = vmatmul.mubr.bf16.vlgmr.msra.gmra.mrb[4].mxu0 %v463_v53  ;;  %v1227_v53 = vld [vmem:[#allocation14 + $0x1e8] sm:$0xff] }
 0x208   :  { %2745 = vmatpush1.bf16.msra.mxu1 %v7128_v59  ;;  %2827 = vmatpush1.bf16.msra.mxu0 %v7130_v60  ;;  %v7186_v55 = vcombine.low %v1223_v51, %v1227_v53  ;;  %v7187_v56 = vcombine.high %v1223_v51, %v1227_v53  ;;  %v1231_v59 = vld [vmem:[#allocation14 + $0x208] sm:$0xff]  ;;  %v7193_v60 = vcombine.high %v1230_v57, %v1234_v58  ;;  %v1290_v53 = vld [vmem:[#allocation14 + $0x3e0] sm:$0xff] }
 0x209   :  { %2746 = vmatprep.subr.bf16.mxu1 %v7137_v1  ;;  %2828 = vmatprep.subr.bf16.mxu0 %v7139_v5  ;;  %v7194_v63 = vcombine.low %v1231_v59, %v1235_v61  ;;  %v7195_v0 = vcombine.high %v1231_v59, %v1235_v61  ;;  %v1238_v1 = vld [vmem:[#allocation14 + $0x240] sm:$0xff]  ;;  %v1243_v5 = vld [vmem:[#allocation14 + $0x268] sm:$0xff] }
 0x20a   :  { %v7200_v6 = vcombine.low %v1238_v1, %v1242_v2  ;;  %v1291_v57 = vld [vmem:[#allocation14 + $0x3e8] sm:$0xff]  ;;  %v9438_v61 = vld [vmem:[#allocation14 + $0x420] sm:$0xff] }
 0x20c   :  { %2747 = vmatpush1.bf16.msra.mxu1 %v7136_v3  ;;  %2829 = vmatpush1.bf16.msra.mxu0 %v7138_v4  ;;  %v1239_v3 = vld [vmem:[#allocation14 + $0x248] sm:$0xff]  ;;  %v7201_v4 = vcombine.high %v1238_v1, %v1242_v2 }
 0x20d   :  { %2748 = vmatprep.subr.bf16.mxu1 %v7145_v9  ;;  %2830 = vmatprep.subr.bf16.mxu0 %v7147_v13  ;;  %v7202_v7 = vcombine.low %v1239_v3, %v1243_v5  ;;  %v7203_v8 = vcombine.high %v1239_v3, %v1243_v5  ;;  %v1246_v9 = vld [vmem:[#allocation14 + $0x280] sm:$0xff]  ;;  %v1251_v13 = vld [vmem:[#allocation14 + $0x2a8] sm:$0xff]  ;;  %v529_v5 = vld [vmem:[#allocation10] sm:$0xf] }
 0x20e   :  { %v7208_v14 = vcombine.low %v1246_v9, %v1250_v10 }
 0x210   :  { %2749 = vmatpush1.bf16.msra.mxu1 %v7144_v11  ;;  %2831 = vmatpush1.bf16.msra.mxu0 %v7146_v12  ;;  %v1247_v11 = vld [vmem:[#allocation14 + $0x288] sm:$0xff]  ;;  %v7209_v12 = vcombine.high %v1246_v9, %v1250_v10  ;;  %v538_v9 = vrot.slane %v529_v5, %v9432_v39 }
 0x211   :  { %2750 = vmatprep.subr.bf16.mxu1 %v7153_v17  ;;  %2832 = vmatprep.subr.bf16.mxu0 %v7155_v21  ;;  %v7210_v15 = vcombine.low %v1247_v11, %v1251_v13  ;;  %v7211_v16 = vcombine.high %v1247_v11, %v1251_v13  ;;  %v1254_v17 = vld [vmem:[#allocation14 + $0x2c0] sm:$0xff]  ;;  %v1259_v21 = vld [vmem:[#allocation14 + $0x2e8] sm:$0xff] }
 0x212   :  { %v7216_v22 = vcombine.low %v1254_v17, %v1258_v18 }
 0x214   :  { %2751 = vmatpush1.bf16.msra.mxu1 %v7152_v19  ;;  %2833 = vmatpush1.bf16.msra.mxu0 %v7154_v20  ;;  %v1255_v19 = vld [vmem:[#allocation14 + $0x2c8] sm:$0xff]  ;;  %v7217_v20 = vcombine.high %v1254_v17, %v1258_v18 }
 0x215   :  { %2752 = vmatprep.subr.bf16.mxu1 %v7161_v25  ;;  %2834 = vmatprep.subr.bf16.mxu0 %v7163_v29  ;;  %v7218_v23 = vcombine.low %v1255_v19, %v1259_v21  ;;  %v7219_v24 = vcombine.high %v1255_v19, %v1259_v21  ;;  %v1262_v25 = vld [vmem:[#allocation14 + $0x300] sm:$0xff]  ;;  %v1267_v29 = vld [vmem:[#allocation14 + $0x328] sm:$0xff] }
 0x216   :  { %v7224_v30 = vcombine.low %v1262_v25, %v1266_v26 }
 0x218   :  { %2753 = vmatpush1.bf16.msra.mxu1 %v7160_v27  ;;  %2835 = vmatpush1.bf16.msra.mxu0 %v7162_v28  ;;  %v1263_v27 = vld [vmem:[#allocation14 + $0x308] sm:$0xff]  ;;  %v7225_v28 = vcombine.high %v1262_v25, %v1266_v26 }
 0x219   :  { %2754 = vmatprep.subr.bf16.mxu1 %v7169_v33  ;;  %2836 = vmatprep.subr.bf16.mxu0 %v7171_v40  ;;  %v7226_v31 = vcombine.low %v1263_v27, %v1267_v29  ;;  %v7227_v32 = vcombine.high %v1263_v27, %v1267_v29  ;;  %v1270_v33 = vld [vmem:[#allocation14 + $0x340] sm:$0xff]  ;;  %v1275_v40 = vld [vmem:[#allocation14 + $0x368] sm:$0xff] }
 0x21a   :  { %v7232_v41 = vcombine.low %v1270_v33, %v1274_v34 }
 0x21c   :  { %2755 = vmatpush1.bf16.msra.mxu1 %v7168_v35  ;;  %2837 = vmatpush1.bf16.msra.mxu0 %v7170_v38  ;;  %v1271_v35 = vld [vmem:[#allocation14 + $0x348] sm:$0xff]  ;;  %v7233_v38 = vcombine.high %v1270_v33, %v1274_v34 }
 0x21d   :  { %2756 = vmatprep.subr.bf16.mxu1 %v7177_v44  ;;  %2838 = vmatprep.subr.bf16.mxu0 %v7179_v48  ;;  %v7234_v42 = vcombine.low %v1271_v35, %v1275_v40  ;;  %v7235_v43 = vcombine.high %v1271_v35, %v1275_v40  ;;  %v1278_v44 = vld [vmem:[#allocation14 + $0x380] sm:$0xff]  ;;  %v1283_v48 = vld [vmem:[#allocation14 + $0x3a8] sm:$0xff] }
 0x21e   :  { %v7240_v49 = vcombine.low %v1278_v44, %v1282_v45 }
 0x220   :  { %2757 = vmatpush1.bf16.msra.mxu1 %v7176_v46  ;;  %2839 = vmatpush1.bf16.msra.mxu0 %v7178_v47  ;;  %v1279_v46 = vld [vmem:[#allocation14 + $0x388] sm:$0xff]  ;;  %v7241_v47 = vcombine.high %v1278_v44, %v1282_v45 }
 0x221   :  { %2758 = vmatprep.subr.bf16.mxu1 %v7185_v52  ;;  %2840 = vmatprep.subr.bf16.mxu0 %v7187_v56  ;;  %v7242_v50 = vcombine.low %v1279_v46, %v1283_v48  ;;  %v7243_v51 = vcombine.high %v1279_v46, %v1283_v48  ;;  %v1286_v52 = vld [vmem:[#allocation14 + $0x3c0] sm:$0xff] }
 0x222   :  { %v7249_v56 = vcombine.high %v1286_v52, %v1290_v53 }
 0x224   :  { %2759 = vmatpush1.bf16.msra.mxu1 %v7184_v54  ;;  %2841 = vmatpush1.bf16.msra.mxu0 %v7186_v55  ;;  %v1287_v54 = vld [vmem:[#allocation14 + $0x3c8] sm:$0xff]  ;;  %v7248_v55 = vcombine.low %v1286_v52, %v1290_v53 }
 0x225   :  { %2760 = vmatprep.subr.bf16.mxu1 %v7193_v60  ;;  %2842 = vmatprep.subr.bf16.mxu0 %v7195_v0  ;;  %v7250_v58 = vcombine.low %v1287_v54, %v1291_v57  ;;  %v7251_v59 = vcombine.high %v1287_v54, %v1291_v57  ;;  %v9436_v60 = vld [vmem:[#allocation14 + $0x400] sm:$0xff]  ;;  %v9444_v0 = vld [vmem:[#allocation14 + $0x428] sm:$0xff] }
 0x226   :  { %v7256_v1 = vcombine.low %v9436_v60, %v9438_v61 }
 0x228   :  { %2761 = vmatpush1.bf16.msra.mxu1 %v7192_v62  ;;  %2843 = vmatpush1.bf16.msra.mxu0 %v7194_v63  ;;  %v9440_v62 = vld [vmem:[#allocation14 + $0x408] sm:$0xff]  ;;  %v7257_v63 = vcombine.high %v9436_v60, %v9438_v61 }
 0x229   :  { %2762 = vmatprep.subr.bf16.mxu1 %v7201_v4  ;;  %2844 = vmatprep.subr.bf16.mxu0 %v7203_v8  ;;  %v7258_v2 = vcombine.low %v9440_v62, %v9444_v0  ;;  %v7259_v3 = vcombine.high %v9440_v62, %v9444_v0  ;;  %v9453_v4 = vsub.s32 2, %v9426_v36 }
 0x22b   :  { %v542_v8 = vrot.slane %v529_v5, %v9453_v4 }
 0x22c   :  { %2763 = vmatpush1.bf16.msra.mxu1 %v7200_v6  ;;  %2845 = vmatpush1.bf16.msra.mxu0 %v7202_v7  ;;  %v9456_v6 = vsub.s32 3, %v9426_v36  ;;  %v534_v7 = vrot.slane %v529_v5, %v9429_v37 }
 0x22d   :  { %2764 = vmatprep.subr.bf16.mxu1 %v7209_v12  ;;  %2846 = vmatprep.subr.bf16.mxu0 %v7211_v16 }
 0x22e   :  { %v546_v10 = vrot.slane %v529_v5, %v9456_v6 }
 0x230   :  { %2765 = vmatpush1.bf16.msra.mxu1 %v7208_v14  ;;  %2847 = vmatpush1.bf16.msra.mxu0 %v7210_v15 }
 0x231   :  { %2766 = vmatprep.subr.bf16.mxu1 %v7217_v20  ;;  %2848 = vmatprep.subr.bf16.mxu0 %v7219_v24 }
 0x234   :  { %2767 = vmatpush1.bf16.msra.mxu1 %v7216_v22  ;;  %2849 = vmatpush1.bf16.msra.mxu0 %v7218_v23 }
 0x235   :  { %2768 = vmatprep.subr.bf16.mxu1 %v7225_v28  ;;  %2850 = vmatprep.subr.bf16.mxu0 %v7227_v32 }
 0x238   :  { %2769 = vmatpush1.bf16.msra.mxu1 %v7224_v30  ;;  %2851 = vmatpush1.bf16.msra.mxu0 %v7226_v31 }
 0x239   :  { %2770 = vmatprep.subr.bf16.mxu1 %v7233_v38  ;;  %2852 = vmatprep.subr.bf16.mxu0 %v7235_v43 }
 0x23c   :  { %2771 = vmatpush1.bf16.msra.mxu1 %v7232_v41  ;;  %2853 = vmatpush1.bf16.msra.mxu0 %v7234_v42 }
 0x23d   :  { %2772 = vmatprep.subr.bf16.mxu1 %v7241_v47  ;;  %2854 = vmatprep.subr.bf16.mxu0 %v7243_v51 }
 0x240   :  { %2773 = vmatpush1.bf16.msra.mxu1 %v7240_v49  ;;  %2855 = vmatpush1.bf16.msra.mxu0 %v7242_v50 }
 0x241   :  { %2774 = vmatprep.subr.bf16.mxu1 %v7249_v56  ;;  %2856 = vmatprep.subr.bf16.mxu0 %v7251_v59 }
 0x244   :  { %2775 = vmatpush1.bf16.msra.mxu1 %v7248_v55  ;;  %2857 = vmatpush1.bf16.msra.mxu0 %v7250_v58 }
 0x245   :  { %2785 = vmatprep.subr.bf16.mxu1 %v7257_v63  ;;  %2867 = vmatprep.subr.bf16.mxu0 %v7259_v3 }
 0x2da   :  { %v905_v11 = vpop.f32.mrb[0].mxu1  ;;  %v946_v12 = vpop.f32.mrb[4].mxu0 }
 0x2db   :  { %v9462_v13 = vadd.f32 %v905_v11, %v534_v7  ;;  %v9464_v14 = vadd.f32 %v946_v12, %v542_v8  ;;  %v907_v15 = vpop.f32.mrb[1].mxu1  ;;  %v948_v16 = vpop.f32.mrb[5].mxu0 }
 0x2dc   :  { %v9466_v17 = vadd.f32 %v907_v15, %v538_v9  ;;  %v9468_v18 = vadd.f32 %v948_v16, %v546_v10  ;;  %v909_v19 = vpop.f32.mrb[2].mxu1  ;;  %v950_v20 = vpop.f32.mrb[6].mxu0 }
 0x2dd   :  { %v955_v21 = vrot.slane %v9462_v13, 4  ;;  %v984_v22 = vmul.f32 %v9462_v13, %v9462_v13  ;;  %v967_v23 = vrot.slane %v9464_v14, 4  ;;  %v986_v24 = vmul.f32 %v9464_v14, %v9464_v14  ;;  %v910_v25 = vpop.f32.mrb[3].mxu1  ;;  %v951_v26 = vpop.f32.mrb[7].mxu0 }
 0x2de   :  { %v961_v27 = vrot.slane %v9466_v17, 4  ;;  %v985_v28 = vmul.f32 %v9466_v17, %v9466_v17  ;;  %v973_v29 = vrot.slane %v9468_v18, 4  ;;  %v987_v30 = vmul.f32 %v9468_v18, %v9468_v18 }
 0x2df   :  { %v956_v31 = vadd.f32 %v955_v21, %v9462_v13  ;;  %v988_v32 = vrot.slane %v984_v22, 4  ;;  %v968_v33 = vadd.f32 %v967_v23, %v9464_v14  ;;  %v1000_v34 = vrot.slane %v986_v24, 4 }
 0x2e0   :  { %v962_v35 = vadd.f32 %v961_v27, %v9466_v17  ;;  %v994_v38 = vrot.slane %v985_v28, 4  ;;  %v974_v40 = vadd.f32 %v973_v29, %v9468_v18  ;;  %v1006_v41 = vrot.slane %v987_v30, 4 }
 0x2e1   :  { %v957_v42 = vrot.slane %v956_v31, 2  ;;  %v989_v43 = vadd.f32 %v988_v32, %v984_v22  ;;  %v969_v44 = vrot.slane %v968_v33, 2  ;;  %v1001_v45 = vadd.f32 %v1000_v34, %v986_v24 }
 0x2e2   :  { %v963_v46 = vrot.slane %v962_v35, 2  ;;  %v995_v47 = vadd.f32 %v994_v38, %v985_v28  ;;  %v975_v48 = vrot.slane %v974_v40, 2  ;;  %v1007_v49 = vadd.f32 %v1006_v41, %v987_v30 }
 0x2e3   :  { %v958_v50 = vadd.f32 %v957_v42, %v956_v31  ;;  %v990_v51 = vrot.slane %v989_v43, 2  ;;  %v970_v52 = vadd.f32 %v969_v44, %v968_v33  ;;  %v1002_v53 = vrot.slane %v1001_v45, 2 }
 0x2e4   :  { %v964_v54 = vadd.f32 %v963_v46, %v962_v35  ;;  %v996_v55 = vrot.slane %v995_v47, 2  ;;  %v976_v56 = vadd.f32 %v975_v48, %v974_v40  ;;  %v1008_v57 = vrot.slane %v1007_v49, 2 }
 0x2e5   :  { %v959_v58 = vrot.slane %v958_v50, 1  ;;  %v991_v59 = vadd.f32 %v990_v51, %v989_v43  ;;  %v971_v63 = vrot.slane %v970_v52, 1  ;;  %v1003_v3 = vadd.f32 %v1002_v53, %v1001_v45 }
 0x2e6   :  { %v965_v5 = vrot.slane %v964_v54, 1  ;;  %v997_v7 = vadd.f32 %v996_v55, %v995_v47  ;;  %v977_v8 = vrot.slane %v976_v56, 1  ;;  %v1009_v9 = vadd.f32 %v1008_v57, %v1007_v49 }
 0x2e7   :  { %v960_v10 = vadd.f32 %v959_v58, %v958_v50  ;;  %v992_v11 = vrot.slane %v991_v59, 1  ;;  %v972_v12 = vadd.f32 %v971_v63, %v970_v52  ;;  %v1004_v15 = vrot.slane %v1003_v3, 1 }
 0x2e8   :  { %v966_v16 = vadd.f32 %v965_v5, %v964_v54  ;;  %v998_v19 = vrot.slane %v997_v7, 1  ;;  %v978_v20 = vadd.f32 %v977_v8, %v976_v56  ;;  %v1010_v21 = vrot.slane %v1009_v9, 1 }
 0x2e9   :  { %v980_v22 = vmul.f32 0.125, %v960_v10  ;;  %v993_v23 = vadd.f32 %v992_v11, %v991_v59  ;;  %v982_v24 = vmul.f32 0.125, %v972_v12  ;;  %v1005_v25 = vadd.f32 %v1004_v15, %v1003_v3  ;;  %v953_v10 = vld [vmem:[#allocation11] sm:$0xf] }
 0x2ea   :  { %v981_v26 = vmul.f32 0.125, %v966_v16  ;;  %v999_v27 = vadd.f32 %v998_v19, %v997_v7  ;;  %v983_v28 = vmul.f32 0.125, %v978_v20  ;;  %v1011_v29 = vadd.f32 %v1010_v21, %v1009_v9 }
 0x2eb   :  { %v1012_v30 = vmul.f32 0.125, %v993_v23  ;;  %v1016_v31 = vmul.f32 %v980_v22, %v980_v22  ;;  %v1014_v32 = vmul.f32 0.125, %v1005_v25  ;;  %v1018_v33 = vmul.f32 %v982_v24, %v982_v24 }
 0x2ec   :  { %v1013_v34 = vmul.f32 0.125, %v999_v27  ;;  %v1017_v35 = vmul.f32 %v981_v26, %v981_v26  ;;  %v1015_v38 = vmul.f32 0.125, %v1011_v29  ;;  %v1019_v40 = vmul.f32 %v983_v28, %v983_v28 }
 0x2ed   :  { %v1020_v41 = vsub.f32 %v1012_v30, %v1016_v31  ;;  %v1022_v42 = vsub.f32 %v1014_v32, %v1018_v33  ;;  %v9178_v53 = vmov 1966171168  }
 0x2ee   :  { %v1021_v43 = vsub.f32 %v1013_v34, %v1017_v35  ;;  %v1023_v44 = vsub.f32 %v1015_v38, %v1019_v40  ;;  %v1043_v54 = vunpack.c.l.s4 %v9178_v53 }
 0x2ef   :  { %v1024_v45 = vmax.f32 %v1020_v41, 0.0  ;;  %v1026_v46 = vmax.f32 %v1022_v42, 0.0  ;;  %v954_v41 = vld [vmem:[#allocation13] sm:$0xf] }
 0x2f0   :  { %v1025_v47 = vmax.f32 %v1021_v43, 0.0  ;;  %v1027_v48 = vmax.f32 %v1023_v44, 0.0  ;;  %v1044_v55 = vunpack.c.0.s8 %v1043_v54 }
 0x2f1   :  { %v1028_v49 = vadd.f32 1e-05, %v1024_v45  ;;  %v1030_v50 = vadd.f32 1e-05, %v1026_v46 }
 0x2f2   :  { %v1029_v51 = vadd.f32 1e-05, %v1025_v47  ;;  %v1031_v52 = vadd.f32 1e-05, %v1027_v48  ;;  %v9487_v58 = vsub.s32 %v1044_v55, %v9426_v36  ;;  %v1302_v47 = vld [vmem:[#allocation14 + $0x440] sm:$0xff] }
 0x2f3   :  { %8795 = vrsqrt.f32 %v1028_v49 }
 0x2f4   :  { %8797 = vrsqrt.f32 %v1030_v50  ;;  %v1306_v50 = vld [vmem:[#allocation14 + $0x460] sm:$0xff] }
 0x2f5   :  { %8799 = vrsqrt.f32 %v1029_v51  ;;  %v1303_v51 = vld [vmem:[#allocation14 + $0x448] sm:$0xff] }
 0x2f6   :  { %8801 = vrsqrt.f32 %v1031_v52  ;;  %v1307_v52 = vld [vmem:[#allocation14 + $0x468] sm:$0xff] }
 0x2fd   :  { %v8796_v56 = vpop.eup %8795 }
 0x2fe   :  { %v8798_v57 = vpop.eup %8797 }
 0x2ff   :  { %v8800_v59 = vpop.eup %8799 }
 0x300   :  { %v8802_v63 = vpop.eup %8801  ;;  %v1040_v3 = vcombine.low %v8796_v56, %v8800_v59  ;;  %v1310_v56 = vld [vmem:[#allocation14 + $0x480] sm:$0xff]  ;;  %v7267_v59 = vcombine.high %v1303_v51, %v1307_v52 }
 0x301   :  { %v1041_v5 = vcombine.low %v8798_v57, %v8802_v63  ;;  %v7265_v57 = vcombine.high %v1302_v47, %v1306_v50  ;;  %v1314_v63 = vld [vmem:[#allocation14 + $0x4a0] sm:$0xff] }
 0x302   :  { %v1048_v7 = vrot.slane %v1040_v3, %v9487_v58  ;;  %v1311_v3 = vld [vmem:[#allocation14 + $0x488] sm:$0xff]  ;;  %v7272_v60 = vcombine.low %v1310_v56, %v1314_v63 }
 0x303   :  { %v1055_v8 = vrot.slane %v1041_v5, %v9487_v58  ;;  %v1315_v5 = vld [vmem:[#allocation14 + $0x4a8] sm:$0xff] }
 0x304   :  { %v7274_v61 = vcombine.low %v1311_v3, %v1315_v5 }
 0x305   :  { %v1056_v9 = vcombine.low %v1048_v7, %v1055_v8  ;;  %v7264_v8 = vcombine.low %v1302_v47, %v1306_v50  ;;  %v1358_v50 = vld [vmem:[#allocation14 + $0x600] sm:$0xff] }
 0x307   :  { %v1063_v11 = vrot.slane %v1056_v9, %v9487_v58  ;;  %v7266_v9 = vcombine.low %v1303_v51, %v1307_v52  ;;  %v1362_v51 = vld [vmem:[#allocation14 + $0x620] sm:$0xff]  ;;  %v1359_v52 = vld [vmem:[#allocation14 + $0x608] sm:$0xff] }
 0x309   :  { %v1065_v12 = vmul.f32 %v1063_v11, %v953_v10  ;;  %v7273_v10 = vcombine.high %v1310_v56, %v1314_v63  ;;  %v7275_v11 = vcombine.high %v1311_v3, %v1315_v5  ;;  %v1366_v3 = vld [vmem:[#allocation14 + $0x640] sm:$0xff] }
 0x30a   :  { %v1370_v5 = vld [vmem:[#allocation14 + $0x660] sm:$0xff] }
 0x30b   :  { %v1070_v15 = vrot.slane %v1065_v12, %v9429_v37  ;;  %v1074_v16 = vrot.slane %v1065_v12, %v9432_v39  ;;  %v1078_v19 = vrot.slane %v1065_v12, %v9453_v4  ;;  %v1082_v20 = vrot.slane %v1065_v12, %v9456_v6  ;;  %v1318_v12 = vld [vmem:[#allocation14 + $0x4c0] sm:$0xff] }
 0x30d   :  { %v1087_v21 = vmul.f32 %v1070_v15, %v980_v22  ;;  %v1088_v23 = vmul.f32 %v1074_v16, %v981_v26  ;;  %v1089_v25 = vmul.f32 %v1078_v19, %v982_v24  ;;  %v1090_v27 = vmul.f32 %v1082_v20, %v983_v28 }
 0x30e   :  { %v1124_v29 = vmul.f32 %v1082_v20, %v9468_v18  ;;  %v1122_v30 = vmul.f32 %v1074_v16, %v9466_v17  ;;  %v1121_v31 = vmul.f32 %v1070_v15, %v9462_v13  ;;  %v1123_v32 = vmul.f32 %v1078_v19, %v9464_v14  ;;  %v1322_v15 = vld [vmem:[#allocation14 + $0x4e0] sm:$0xff]  ;;  %v1319_v16 = vld [vmem:[#allocation14 + $0x4c8] sm:$0xff] }
 0x30f   :  { %v1095_v33 = vcombine.low %v1087_v21, %v1088_v23  ;;  %v1096_v34 = vcombine.low %v1089_v25, %v1090_v27  ;;  %v1323_v19 = vld [vmem:[#allocation14 + $0x4e8] sm:$0xff]  ;;  %v7281_v62 = vcombine.high %v1318_v12, %v1322_v15  ;;  %v7280_v23 = vcombine.low %v1318_v12, %v1322_v15 }
 0x310   :  { %v7283_v0 = vcombine.high %v1319_v16, %v1323_v19  ;;  %v1327_v20 = vld [vmem:[#allocation14 + $0x508] sm:$0xff]  ;;  %v7282_v25 = vcombine.low %v1319_v16, %v1323_v19  ;;  %v7329_v12 = vcombine.high %v1366_v3, %v1370_v5  ;;  %v1374_v16 = vld [vmem:[#allocation14 + $0x680] sm:$0xff] }
 0x311   :  { %v1103_v35 = vrot.slane %v1095_v33, %v9487_v58  ;;  %v1110_v38 = vrot.slane %v1096_v34, %v9487_v58  ;;  %v1331_v21 = vld [vmem:[#allocation14 + $0x528] sm:$0xff]  ;;  %v1378_v19 = vld [vmem:[#allocation14 + $0x6a0] sm:$0xff] }
 0x312   :  { %v1339_v33 = vld [vmem:[#allocation14 + $0x568] sm:$0xff] }
 0x313   :  { %v1111_v40 = vcombine.low %v1103_v35, %v1110_v38  ;;  %v7290_v35 = vcombine.low %v1327_v20, %v1331_v21 }
 0x315   :  { %v1118_v22 = vrot.slane %v1111_v40, %v9487_v58 }
 0x317   :  { %v1120_v24 = vsub.f32 %v954_v41, %v1118_v22  ;;  %v1342_v41 = vld [vmem:[#allocation14 + $0x580] sm:$0xff] }
 0x318   :  { %v1346_v22 = vld [vmem:[#allocation14 + $0x5a0] sm:$0xff] }
 0x319   :  { %v1141_v26 = vrot.slane %v1120_v24, %v9456_v6  ;;  %v1133_v18 = vrot.slane %v1120_v24, %v9432_v39  ;;  %v1129_v17 = vrot.slane %v1120_v24, %v9429_v37  ;;  %v1137_v13 = vrot.slane %v1120_v24, %v9453_v4  ;;  %v1343_v24 = vld [vmem:[#allocation14 + $0x588] sm:$0xff] }
 0x31b   :  { %v1149_v14 = vadd.f32 %v1141_v26, %v1124_v29  ;;  %v1147_v28 = vadd.f32 %v1133_v18, %v1122_v30  ;;  %v1146_v42 = vadd.f32 %v1129_v17, %v1121_v31  ;;  %v9507_v43 = vadd.f32 %v1137_v13, %v1123_v32  ;;  %v1334_v30 = vld [vmem:[#allocation14 + $0x540] sm:$0xff]  ;;  %v1335_v32 = vld [vmem:[#allocation14 + $0x548] sm:$0xff] }
 0x31c   :  { %v7291_v29 = vcombine.high %v1327_v20, %v1331_v21  ;;  %v1338_v31 = vld [vmem:[#allocation14 + $0x560] sm:$0xff]  ;;  %v7299_v40 = vcombine.high %v1335_v32, %v1339_v33  ;;  %v1347_v26 = vld [vmem:[#allocation14 + $0x5a8] sm:$0xff]  ;;  %v7298_v17 = vcombine.low %v1335_v32, %v1339_v33  ;;  %v7305_v13 = vcombine.high %v1342_v41, %v1346_v22 }
 0x31d   :  { %vm1151_vm2 = vcmp.gt.f32.partialorder %v1147_v28, 0.0  ;;  %v1155_v44 = vmul.f32 0.2, %v1147_v28  ;;  %vm1150_vm3 = vcmp.gt.f32.partialorder %v1146_v42, 0.0  ;;  %v1154_v45 = vmul.f32 0.2, %v1146_v42 }
 0x31e   :  { %vm1153_vm4 = vcmp.gt.f32.partialorder %v1149_v14, 0.0  ;;  %v1157_v46 = vmul.f32 0.2, %v1149_v14  ;;  %v7297_v38 = vcombine.high %v1334_v30, %v1338_v31  ;;  %v7296_v18 = vcombine.low %v1334_v30, %v1338_v31  ;;  %v1382_v20 = vld [vmem:[#allocation14 + $0x6c0] sm:$0xff] }
 0x31f   :  { %v1159_v48 = vsel %vm1151_vm2, %v1147_v28, %v1155_v44  ;;  %v1158_v49 = vsel %vm1150_vm3, %v1146_v42, %v1154_v45  ;;  %v1350_v28 = vld [vmem:[#allocation14 + $0x5c0] sm:$0xff]  ;;  %v1351_v44 = vld [vmem:[#allocation14 + $0x5c8] sm:$0xff]  ;;  %v7306_v47 = vcombine.low %v1343_v24, %v1347_v26  ;;  %vm1152_vm5 = vcmp.gt.f32.partialorder %v9507_v43, 0.0 }
 0x320   :  { %v9509_v53 = vpack.c.bf16 %v1159_v48, %v1159_v48  ;;  %v9511_v54 = vpack.c.bf16 %v1158_v49, %v1158_v49  ;;  %v1161_v55 = vsel %vm1153_vm4, %v1149_v14, %v1157_v46  ;;  %v7307_v14 = vcombine.high %v1343_v24, %v1347_v26  ;;  %v1354_v42 = vld [vmem:[#allocation14 + $0x5e0] sm:$0xff]  ;;  %v1355_v45 = vld [vmem:[#allocation14 + $0x5e8] sm:$0xff] }
 0x321   :  { %v9517_v7 = vpack.c.bf16 %v1161_v55, %v1161_v55  ;;  %v7304_v46 = vcombine.low %v1342_v41, %v1346_v22  ;;  %v7313_v48 = vcombine.high %v1350_v28, %v1354_v42  ;;  %v7315_v49 = vcombine.high %v1351_v44, %v1355_v45  ;;  %v1363_v55 = vld [vmem:[#allocation14 + $0x628] sm:$0xff]  ;;  %v1386_v21 = vld [vmem:[#allocation14 + $0x6e0] sm:$0xff] }
 0x322   :  { %2776 = vmatprep.mubr.bf16.mxu1 %v9509_v53  ;;  %2858 = vmatprep.mubr.bf16.mxu0 %v9509_v53  ;;  %v7312_v56 = vcombine.low %v1350_v28, %v1354_v42  ;;  %v7323_v63 = vcombine.high %v1359_v52, %v1363_v55  ;;  %v7345_v30 = vcombine.high %v1382_v20, %v1386_v21  ;;  %v1390_v32 = vld [vmem:[#allocation14 + $0x700] sm:$0xff] }
 0x323   :  { %2777 = vmatmul.mubr.bf16.vlgmr.msra.gmra.mrb[4].mxu1 %v9511_v54  ;;  %2859 = vmatmul.mubr.bf16.vlgmr.msra.gmra.mrb[8].mxu0 %v9511_v54  ;;  %v1394_v33 = vld [vmem:[#allocation14 + $0x720] sm:$0xff] }
 0x324   :  { %2786 = vmatpush1.bf16.msra.mxu1 %v7256_v1  ;;  %2868 = vmatpush1.bf16.msra.mxu0 %v7258_v2  ;;  %v1326_v1 = vld [vmem:[#allocation14 + $0x500] sm:$0xff]  ;;  %v7353_v41 = vcombine.high %v1390_v32, %v1394_v33 }
 0x325   :  { %2817 = vmatprep.mubr.bf16.mxu1 %v9517_v7  ;;  %2899 = vmatprep.mubr.bf16.mxu0 %v9517_v7  ;;  %v1330_v2 = vld [vmem:[#allocation14 + $0x520] sm:$0xff] }
 0x326   :  { %2787 = vmatprep.subr.bf16.mxu1 %v7265_v57  ;;  %2869 = vmatprep.subr.bf16.mxu0 %v7267_v59  ;;  %v7289_v27 = vcombine.high %v1326_v1, %v1330_v2  ;;  %v7288_v34 = vcombine.low %v1326_v1, %v1330_v2  ;;  %v7314_v57 = vcombine.low %v1351_v44, %v1355_v45  ;;  %v1398_v24 = vld [vmem:[#allocation14 + $0x740] sm:$0xff] }
 0x327   :  { %v7321_v59 = vcombine.high %v1358_v50, %v1362_v51  ;;  %v7337_v1 = vcombine.high %v1374_v16, %v1378_v19  ;;  %v1402_v26 = vld [vmem:[#allocation14 + $0x760] sm:$0xff] }
 0x328   :  { %2788 = vmatpush1.bf16.msra.mxu1 %v7264_v8  ;;  %2870 = vmatpush1.bf16.msra.mxu0 %v7266_v9  ;;  %v1367_v8 = vld [vmem:[#allocation14 + $0x648] sm:$0xff]  ;;  %v7361_v28 = vcombine.high %v1398_v24, %v1402_v26  ;;  %v1406_v44 = vld [vmem:[#allocation14 + $0x780] sm:$0xff] }
 0x329   :  { %2789 = vmatprep.subr.bf16.mxu1 %v7273_v10  ;;  %2871 = vmatprep.subr.bf16.mxu0 %v7275_v11  ;;  %v1371_v9 = vld [vmem:[#allocation14 + $0x668] sm:$0xff]  ;;  %v7320_v10 = vcombine.low %v1358_v50, %v1362_v51  ;;  %v7322_v11 = vcombine.low %v1359_v52, %v1363_v55  ;;  %v1410_v45 = vld [vmem:[#allocation14 + $0x7a0] sm:$0xff] }
 0x32a   :  { %v7331_v15 = vcombine.high %v1367_v8, %v1371_v9  ;;  %v7369_v50 = vcombine.high %v1406_v44, %v1410_v45  ;;  %v1414_v52 = vld [vmem:[#allocation14 + $0x7c0] sm:$0xff] }
 0x32b   :  { %v1418_v55 = vld [vmem:[#allocation14 + $0x7e0] sm:$0xff] }
 0x32c   :  { %2790 = vmatpush1.bf16.msra.mxu1 %v7272_v60  ;;  %2872 = vmatpush1.bf16.msra.mxu0 %v7274_v61  ;;  %v1375_v60 = vld [vmem:[#allocation14 + $0x688] sm:$0xff] }
 0x32d   :  { %2791 = vmatprep.subr.bf16.mxu1 %v7281_v62  ;;  %2873 = vmatprep.subr.bf16.mxu0 %v7283_v0  ;;  %v1379_v61 = vld [vmem:[#allocation14 + $0x6a8] sm:$0xff]  ;;  %v7328_v62 = vcombine.low %v1366_v3, %v1370_v5  ;;  %v7330_v0 = vcombine.low %v1367_v8, %v1371_v9  ;;  %v7377_v3 = vcombine.high %v1414_v52, %v1418_v55  ;;  %v1168_v8 = vld [vmem:[#allocation14 + $0x10] sm:$0xff]  ;;  %v1156_v9 = vmul.f32 0.2, %v9507_v43 }
 0x32e   :  { %v7339_v2 = vcombine.high %v1375_v60, %v1379_v61 }
 0x330   :  { %2792 = vmatpush1.bf16.msra.mxu1 %v7280_v23  ;;  %2874 = vmatpush1.bf16.msra.mxu0 %v7282_v25  ;;  %v1383_v23 = vld [vmem:[#allocation14 + $0x6c8] sm:$0xff] }
 0x331   :  { %2793 = vmatprep.subr.bf16.mxu1 %v7289_v27  ;;  %2875 = vmatprep.subr.bf16.mxu0 %v7291_v29  ;;  %v1387_v25 = vld [vmem:[#allocation14 + $0x6e8] sm:$0xff]  ;;  %v7336_v27 = vcombine.low %v1374_v16, %v1378_v19  ;;  %v7338_v29 = vcombine.low %v1375_v60, %v1379_v61  ;;  %v1160_v61 = vsel %vm1152_vm5, %v9507_v43, %v1156_v9  ;;  %v1185_v43 = vld [vmem:[#allocation14 + $0x98] sm:$0xff] }
 0x332   :  { %v7347_v31 = vcombine.high %v1383_v23, %v1387_v25 }
 0x334   :  { %2794 = vmatpush1.bf16.msra.mxu1 %v7288_v34  ;;  %2876 = vmatpush1.bf16.msra.mxu0 %v7290_v35  ;;  %v1391_v34 = vld [vmem:[#allocation14 + $0x708] sm:$0xff] }
 0x335   :  { %2795 = vmatprep.subr.bf16.mxu1 %v7297_v38  ;;  %2877 = vmatprep.subr.bf16.mxu0 %v7299_v40  ;;  %v1395_v35 = vld [vmem:[#allocation14 + $0x728] sm:$0xff]  ;;  %v7344_v38 = vcombine.low %v1382_v20, %v1386_v21  ;;  %v7346_v40 = vcombine.low %v1383_v23, %v1387_v25  ;;  %v9530_v21 = vpack.c.bf16 %v1160_v61, %v1160_v61 }
 0x336   :  { %v7355_v22 = vcombine.high %v1391_v34, %v1395_v35 }
 0x338   :  { %2796 = vmatpush1.bf16.msra.mxu1 %v7296_v18  ;;  %2878 = vmatpush1.bf16.msra.mxu0 %v7298_v17  ;;  %v1399_v18 = vld [vmem:[#allocation14 + $0x748] sm:$0xff] }
 0x339   :  { %2797 = vmatprep.subr.bf16.mxu1 %v7305_v13  ;;  %2879 = vmatprep.subr.bf16.mxu0 %v7307_v14  ;;  %v1403_v17 = vld [vmem:[#allocation14 + $0x768] sm:$0xff]  ;;  %v7352_v13 = vcombine.low %v1390_v32, %v1394_v33  ;;  %v7354_v14 = vcombine.low %v1391_v34, %v1395_v35 }
 0x33a   :  { %v7363_v42 = vcombine.high %v1399_v18, %v1403_v17 }
 0x33c   :  { %2798 = vmatpush1.bf16.msra.mxu1 %v7304_v46  ;;  %2880 = vmatpush1.bf16.msra.mxu0 %v7306_v47  ;;  %v1407_v46 = vld [vmem:[#allocation14 + $0x788] sm:$0xff] }
 0x33d   :  { %2799 = vmatprep.subr.bf16.mxu1 %v7313_v48  ;;  %2881 = vmatprep.subr.bf16.mxu0 %v7315_v49  ;;  %v1411_v47 = vld [vmem:[#allocation14 + $0x7a8] sm:$0xff]  ;;  %v7360_v48 = vcombine.low %v1398_v24, %v1402_v26  ;;  %v7362_v49 = vcombine.low %v1399_v18, %v1403_v17 }
 0x33e   :  { %v7371_v51 = vcombine.high %v1407_v46, %v1411_v47 }
 0x340   :  { %2800 = vmatpush1.bf16.msra.mxu1 %v7312_v56  ;;  %2882 = vmatpush1.bf16.msra.mxu0 %v7314_v57  ;;  %v1415_v56 = vld [vmem:[#allocation14 + $0x7c8] sm:$0xff] }
 0x341   :  { %2801 = vmatprep.subr.bf16.mxu1 %v7321_v59  ;;  %2883 = vmatprep.subr.bf16.mxu0 %v7323_v63  ;;  %v1419_v57 = vld [vmem:[#allocation14 + $0x7e8] sm:$0xff]  ;;  %v7368_v59 = vcombine.low %v1406_v44, %v1410_v45  ;;  %v7370_v63 = vcombine.low %v1407_v46, %v1411_v47  ;;  %v1208_v47 = vld [vmem:[#allocation14 + $0x150] sm:$0xff] }
 0x342   :  { %v7379_v5 = vcombine.high %v1415_v56, %v1419_v57  ;;  %v7378_v16 = vcombine.low %v1415_v56, %v1419_v57  ;;  %v1216_v57 = vld [vmem:[#allocation14 + $0x190] sm:$0xff] }
 0x344   :  { %2802 = vmatpush1.bf16.msra.mxu1 %v7320_v10  ;;  %2884 = vmatpush1.bf16.msra.mxu0 %v7322_v11  ;;  %v1172_v10 = vld [vmem:[#allocation14 + $0x30] sm:$0xff]  ;;  %v1169_v11 = vld [vmem:[#allocation14 + $0x18] sm:$0xff] }
 0x345   :  { %2803 = vmatprep.subr.bf16.mxu1 %v7329_v12  ;;  %2885 = vmatprep.subr.bf16.mxu0 %v7331_v15  ;;  %v1173_v12 = vld [vmem:[#allocation14 + $0x38] sm:$0xff]  ;;  %v7376_v15 = vcombine.low %v1414_v52, %v1418_v55  ;;  %v7133_v19 = vcombine.high %v1168_v8, %v1172_v10  ;;  %v7132_v20 = vcombine.low %v1168_v8, %v1172_v10 }
 0x346   :  { %v7135_v60 = vcombine.high %v1169_v11, %v1173_v12  ;;  %v7134_v23 = vcombine.low %v1169_v11, %v1173_v12  ;;  %v1224_v11 = vld [vmem:[#allocation14 + $0x1d0] sm:$0xff] }
 0x347   :  { %v1228_v12 = vld [vmem:[#allocation14 + $0x1f0] sm:$0xff] }
 0x348   :  { %2804 = vmatpush1.bf16.msra.mxu1 %v7328_v62  ;;  %2886 = vmatpush1.bf16.msra.mxu0 %v7330_v0  ;;  %v1176_v62 = vld [vmem:[#allocation14 + $0x50] sm:$0xff]  ;;  %v7189_v61 = vcombine.high %v1224_v11, %v1228_v12 }
 0x349   :  { %2805 = vmatprep.subr.bf16.mxu1 %v7337_v1  ;;  %2887 = vmatprep.subr.bf16.mxu0 %v7339_v2  ;;  %v1180_v0 = vld [vmem:[#allocation14 + $0x70] sm:$0xff]  ;;  %v1177_v1 = vld [vmem:[#allocation14 + $0x58] sm:$0xff] }
 0x34a   :  { %v1181_v2 = vld [vmem:[#allocation14 + $0x78] sm:$0xff]  ;;  %v7141_v25 = vcombine.high %v1176_v62, %v1180_v0  ;;  %v7140_v32 = vcombine.low %v1176_v62, %v1180_v0  ;;  %v1232_v0 = vld [vmem:[#allocation14 + $0x210] sm:$0xff] }
 0x34b   :  { %v7142_v33 = vcombine.low %v1177_v1, %v1181_v2 }
 0x34c   :  { %2806 = vmatpush1.bf16.msra.mxu1 %v7336_v27  ;;  %2888 = vmatpush1.bf16.msra.mxu0 %v7338_v29  ;;  %v7143_v27 = vcombine.high %v1177_v1, %v1181_v2  ;;  %v1184_v29 = vld [vmem:[#allocation14 + $0x90] sm:$0xff]  ;;  %v1233_v2 = vld [vmem:[#allocation14 + $0x218] sm:$0xff] }
 0x34d   :  { %2807 = vmatprep.subr.bf16.mxu1 %v7345_v30  ;;  %2889 = vmatprep.subr.bf16.mxu0 %v7347_v31  ;;  %v1188_v30 = vld [vmem:[#allocation14 + $0xb0] sm:$0xff]  ;;  %v1189_v31 = vld [vmem:[#allocation14 + $0xb8] sm:$0xff] }
 0x34e   :  { %v7149_v34 = vcombine.high %v1184_v29, %v1188_v30  ;;  %v7151_v35 = vcombine.high %v1185_v43, %v1189_v31  ;;  %v7148_v24 = vcombine.low %v1184_v29, %v1188_v30  ;;  %v7150_v26 = vcombine.low %v1185_v43, %v1189_v31  ;;  %v1236_v1 = vld [vmem:[#allocation14 + $0x230] sm:$0xff]  ;;  %v1241_v31 = vld [vmem:[#allocation14 + $0x258] sm:$0xff] }
 0x34f   :  { %v1240_v30 = vld [vmem:[#allocation14 + $0x250] sm:$0xff] }
 0x350   :  { %2808 = vmatpush1.bf16.msra.mxu1 %v7344_v38  ;;  %2890 = vmatpush1.bf16.msra.mxu0 %v7346_v40  ;;  %v1192_v38 = vld [vmem:[#allocation14 + $0xd0] sm:$0xff] }
 0x351   :  { %2809 = vmatprep.subr.bf16.mxu1 %v7353_v41  ;;  %2891 = vmatprep.subr.bf16.mxu0 %v7355_v22  ;;  %v1196_v40 = vld [vmem:[#allocation14 + $0xf0] sm:$0xff]  ;;  %v1193_v41 = vld [vmem:[#allocation14 + $0xd8] sm:$0xff] }
 0x352   :  { %v1197_v22 = vld [vmem:[#allocation14 + $0xf8] sm:$0xff]  ;;  %v7157_v18 = vcombine.high %v1192_v38, %v1196_v40  ;;  %v1244_v43 = vld [vmem:[#allocation14 + $0x270] sm:$0xff] }
 0x353   :  { %v7159_v17 = vcombine.high %v1193_v41, %v1197_v22  ;;  %v7158_v44 = vcombine.low %v1193_v41, %v1197_v22  ;;  %v1252_v41 = vld [vmem:[#allocation14 + $0x2b0] sm:$0xff]  ;;  %v1249_v22 = vld [vmem:[#allocation14 + $0x298] sm:$0xff] }
 0x354   :  { %2810 = vmatpush1.bf16.msra.mxu1 %v7352_v13  ;;  %2892 = vmatpush1.bf16.msra.mxu0 %v7354_v14  ;;  %v1200_v13 = vld [vmem:[#allocation14 + $0x110] sm:$0xff] }
 0x355   :  { %2811 = vmatprep.subr.bf16.mxu1 %v7361_v28  ;;  %2893 = vmatprep.subr.bf16.mxu0 %v7363_v42  ;;  %v1204_v14 = vld [vmem:[#allocation14 + $0x130] sm:$0xff]  ;;  %v1205_v28 = vld [vmem:[#allocation14 + $0x138] sm:$0xff]  ;;  %v7156_v42 = vcombine.low %v1192_v38, %v1196_v40 }
 0x356   :  { %v7165_v45 = vcombine.high %v1200_v13, %v1204_v14  ;;  %v1248_v40 = vld [vmem:[#allocation14 + $0x290] sm:$0xff] }
 0x358   :  { %2812 = vmatpush1.bf16.msra.mxu1 %v7360_v48  ;;  %2894 = vmatpush1.bf16.msra.mxu0 %v7362_v49  ;;  %v1212_v48 = vld [vmem:[#allocation14 + $0x170] sm:$0xff]  ;;  %v1209_v49 = vld [vmem:[#allocation14 + $0x158] sm:$0xff] }
 0x359   :  { %2813 = vmatprep.subr.bf16.mxu1 %v7369_v50  ;;  %2895 = vmatprep.subr.bf16.mxu0 %v7371_v51  ;;  %v1213_v50 = vld [vmem:[#allocation14 + $0x178] sm:$0xff]  ;;  %v7164_v51 = vcombine.low %v1200_v13, %v1204_v14  ;;  %v7173_v55 = vcombine.high %v1208_v47, %v1212_v48  ;;  %v1256_v14 = vld [vmem:[#allocation14 + $0x2d0] sm:$0xff] }
 0x35a   :  { %v7175_v56 = vcombine.high %v1209_v49, %v1213_v50  ;;  %v7174_v8 = vcombine.low %v1209_v49, %v1213_v50  ;;  %v1268_v49 = vld [vmem:[#allocation14 + $0x330] sm:$0xff]  ;;  %v1265_v50 = vld [vmem:[#allocation14 + $0x318] sm:$0xff] }
 0x35c   :  { %2814 = vmatpush1.bf16.msra.mxu1 %v7368_v59  ;;  %2896 = vmatpush1.bf16.msra.mxu0 %v7370_v63  ;;  %v1220_v59 = vld [vmem:[#allocation14 + $0x1b0] sm:$0xff]  ;;  %v1217_v63 = vld [vmem:[#allocation14 + $0x198] sm:$0xff] }
 0x35d   :  { %2815 = vmatprep.subr.bf16.mxu1 %v7377_v3  ;;  %2897 = vmatprep.subr.bf16.mxu0 %v7379_v5  ;;  %v1221_v3 = vld [vmem:[#allocation14 + $0x1b8] sm:$0xff]  ;;  %v7172_v5 = vcombine.low %v1208_v47, %v1212_v48  ;;  %v7181_v9 = vcombine.high %v1216_v57, %v1220_v59  ;;  %v1264_v48 = vld [vmem:[#allocation14 + $0x310] sm:$0xff] }
 0x35e   :  { %v7183_v10 = vcombine.high %v1217_v63, %v1221_v3 }
 0x360   :  { %2816 = vmatpush1.bf16.msra.mxu1 %v7376_v15  ;;  %2898 = vmatpush1.bf16.msra.mxu0 %v7378_v16  ;;  %v1225_v15 = vld [vmem:[#allocation14 + $0x1d8] sm:$0xff] }
 0x361   :  { %2908 = vmatprep.subr.bf16.mxu1 %v7133_v19  ;;  %2990 = vmatprep.subr.bf16.mxu0 %v7135_v60  ;;  %v1229_v16 = vld [vmem:[#allocation14 + $0x1f8] sm:$0xff]  ;;  %v7180_v19 = vcombine.low %v1216_v57, %v1220_v59  ;;  %v7182_v60 = vcombine.low %v1217_v63, %v1221_v3  ;;  %v1272_v59 = vld [vmem:[#allocation14 + $0x350] sm:$0xff] }
 0x362   :  { %v7191_v62 = vcombine.high %v1225_v15, %v1229_v16  ;;  %v1276_v63 = vld [vmem:[#allocation14 + $0x370] sm:$0xff]  ;;  %v1273_v3 = vld [vmem:[#allocation14 + $0x358] sm:$0xff] }
 0x363   :  { %2818 = vmatmul.mubr.bf16.vlgmr.msra.gmra.mrb[4].mxu1 %v9530_v21  ;;  %2900 = vmatmul.mubr.bf16.vlgmr.msra.gmra.mrb[8].mxu0 %v9530_v21 }
 0x364   :  { %2909 = vmatpush1.bf16.msra.mxu1 %v7132_v20  ;;  %2940 = vmatprep.mubr.bf16.mxu1 %v9509_v53  ;;  %v1237_v20 = vld [vmem:[#allocation14 + $0x238] sm:$0xff] }
 0x365   :  { %2991 = vmatpush1.bf16.msra.mxu0 %v7134_v23  ;;  %3022 = vmatprep.mubr.bf16.mxu0 %v9509_v53  ;;  %v1201_v53 = vld [vmem:[#allocation14 + $0x118] sm:$0xff]  ;;  %v7188_v23 = vcombine.low %v1224_v11, %v1228_v12  ;;  %v7199_v29 = vcombine.high %v1233_v2, %v1237_v20  ;;  %v1280_v12 = vld [vmem:[#allocation14 + $0x390] sm:$0xff] }
 0x366   :  { %2910 = vmatprep.subr.bf16.mxu1 %v7141_v25  ;;  %2992 = vmatprep.subr.bf16.mxu0 %v7143_v27  ;;  %v7167_v46 = vcombine.high %v1201_v53, %v1205_v28  ;;  %v7166_v52 = vcombine.low %v1201_v53, %v1205_v28  ;;  %v7190_v25 = vcombine.low %v1225_v15, %v1229_v16  ;;  %v1260_v53 = vld [vmem:[#allocation14 + $0x2f0] sm:$0xff]  ;;  %v1257_v28 = vld [vmem:[#allocation14 + $0x2d8] sm:$0xff] }
 0x367   :  { %v7197_v27 = vcombine.high %v1232_v0, %v1236_v1  ;;  %v1284_v15 = vld [vmem:[#allocation14 + $0x3b0] sm:$0xff]  ;;  %v1281_v16 = vld [vmem:[#allocation14 + $0x398] sm:$0xff] }
 0x368   :  { %2911 = vmatpush1.bf16.msra.mxu1 %v7140_v32  ;;  %v1245_v32 = vld [vmem:[#allocation14 + $0x278] sm:$0xff] }
 0x369   :  { %2993 = vmatpush1.bf16.msra.mxu0 %v7142_v33  ;;  %2912 = vmatprep.subr.bf16.mxu1 %v7149_v34  ;;  %v7196_v33 = vcombine.low %v1232_v0, %v1236_v1  ;;  %v7198_v34 = vcombine.low %v1233_v2, %v1237_v20  ;;  %v7207_v38 = vcombine.high %v1241_v31, %v1245_v32  ;;  %v1288_v1 = vld [vmem:[#allocation14 + $0x3d0] sm:$0xff]  ;;  %v1289_v20 = vld [vmem:[#allocation14 + $0x3d8] sm:$0xff] }
 0x36a   :  { %2994 = vmatprep.subr.bf16.mxu0 %v7151_v35  ;;  %v7205_v35 = vcombine.high %v1240_v30, %v1244_v43  ;;  %v1292_v2 = vld [vmem:[#allocation14 + $0x3f0] sm:$0xff] }
 0x36c   :  { %2913 = vmatpush1.bf16.msra.mxu1 %v7148_v24  ;;  %v1253_v24 = vld [vmem:[#allocation14 + $0x2b8] sm:$0xff] }
 0x36d   :  { %2995 = vmatpush1.bf16.msra.mxu0 %v7150_v26  ;;  %2914 = vmatprep.subr.bf16.mxu1 %v7157_v18  ;;  %v7204_v26 = vcombine.low %v1240_v30, %v1244_v43  ;;  %v7206_v18 = vcombine.low %v1241_v31, %v1245_v32  ;;  %v7215_v13 = vcombine.high %v1249_v22, %v1253_v24  ;;  %v1296_v43 = vld [vmem:[#allocation14 + $0x410] sm:$0xff]  ;;  %v1297_v32 = vld [vmem:[#allocation14 + $0x418] sm:$0xff] }
 0x36e   :  { %2996 = vmatprep.subr.bf16.mxu0 %v7159_v17  ;;  %v7213_v17 = vcombine.high %v1248_v40, %v1252_v41  ;;  %v1300_v31 = vld [vmem:[#allocation14 + $0x430] sm:$0xff] }
 0x370   :  { %2915 = vmatpush1.bf16.msra.mxu1 %v7156_v42  ;;  %v1261_v42 = vld [vmem:[#allocation14 + $0x2f8] sm:$0xff] }
 0x371   :  { %2997 = vmatpush1.bf16.msra.mxu0 %v7158_v44  ;;  %2916 = vmatprep.subr.bf16.mxu1 %v7165_v45  ;;  %v7212_v44 = vcombine.low %v1248_v40, %v1252_v41  ;;  %v7214_v45 = vcombine.low %v1249_v22, %v1253_v24  ;;  %v7223_v47 = vcombine.high %v1257_v28, %v1261_v42  ;;  %v1304_v41 = vld [vmem:[#allocation14 + $0x450] sm:$0xff] }
 0x372   :  { %2998 = vmatprep.subr.bf16.mxu0 %v7167_v46  ;;  %v7221_v46 = vcombine.high %v1256_v14, %v1260_v53  ;;  %v1308_v22 = vld [vmem:[#allocation14 + $0x470] sm:$0xff]  ;;  %v7260_v24 = vcombine.low %v1296_v43, %v1300_v31 }
 0x374   :  { %2917 = vmatpush1.bf16.msra.mxu1 %v7164_v51  ;;  %v1269_v51 = vld [vmem:[#allocation14 + $0x338] sm:$0xff] }
 0x375   :  { %2999 = vmatpush1.bf16.msra.mxu0 %v7166_v52  ;;  %2918 = vmatprep.subr.bf16.mxu1 %v7173_v55  ;;  %v7220_v52 = vcombine.low %v1256_v14, %v1260_v53  ;;  %v7222_v55 = vcombine.low %v1257_v28, %v1261_v42  ;;  %v7231_v57 = vcombine.high %v1265_v50, %v1269_v51  ;;  %v1312_v14 = vld [vmem:[#allocation14 + $0x490] sm:$0xff]  ;;  %v1313_v42 = vld [vmem:[#allocation14 + $0x498] sm:$0xff] }
 0x376   :  { %3000 = vmatprep.subr.bf16.mxu0 %v7175_v56  ;;  %v7229_v56 = vcombine.high %v1264_v48, %v1268_v49  ;;  %v1316_v53 = vld [vmem:[#allocation14 + $0x4b0] sm:$0xff] }
 0x378   :  { %2919 = vmatpush1.bf16.msra.mxu1 %v7172_v5  ;;  %v1277_v5 = vld [vmem:[#allocation14 + $0x378] sm:$0xff] }
 0x379   :  { %3001 = vmatpush1.bf16.msra.mxu0 %v7174_v8  ;;  %2920 = vmatprep.subr.bf16.mxu1 %v7181_v9  ;;  %v7228_v8 = vcombine.low %v1264_v48, %v1268_v49  ;;  %v7230_v9 = vcombine.low %v1265_v50, %v1269_v51  ;;  %v7239_v11 = vcombine.high %v1273_v3, %v1277_v5  ;;  %v1320_v49 = vld [vmem:[#allocation14 + $0x4d0] sm:$0xff]  ;;  %v1321_v51 = vld [vmem:[#allocation14 + $0x4d8] sm:$0xff] }
 0x37a   :  { %3002 = vmatprep.subr.bf16.mxu0 %v7183_v10  ;;  %v7237_v10 = vcombine.high %v1272_v59, %v1276_v63  ;;  %v1324_v50 = vld [vmem:[#allocation14 + $0x4f0] sm:$0xff] }
 0x37c   :  { %2921 = vmatpush1.bf16.msra.mxu1 %v7180_v19  ;;  %v1285_v19 = vld [vmem:[#allocation14 + $0x3b8] sm:$0xff] }
 0x37d   :  { %3003 = vmatpush1.bf16.msra.mxu0 %v7182_v60  ;;  %2922 = vmatprep.subr.bf16.mxu1 %v7189_v61  ;;  %v7236_v60 = vcombine.low %v1272_v59, %v1276_v63  ;;  %v7238_v61 = vcombine.low %v1273_v3, %v1277_v5  ;;  %v7247_v0 = vcombine.high %v1281_v16, %v1285_v19  ;;  %v1328_v59 = vld [vmem:[#allocation14 + $0x510] sm:$0xff]  ;;  %v1329_v3 = vld [vmem:[#allocation14 + $0x518] sm:$0xff] }
 0x37e   :  { %3004 = vmatprep.subr.bf16.mxu0 %v7191_v62  ;;  %v7245_v62 = vcombine.high %v1280_v12, %v1284_v15  ;;  %v1332_v63 = vld [vmem:[#allocation14 + $0x530] sm:$0xff]  ;;  %v1333_v5 = vld [vmem:[#allocation14 + $0x538] sm:$0xff] }
 0x380   :  { %2923 = vmatpush1.bf16.msra.mxu1 %v7188_v23  ;;  %v1293_v23 = vld [vmem:[#allocation14 + $0x3f8] sm:$0xff] }
 0x381   :  { %3005 = vmatpush1.bf16.msra.mxu0 %v7190_v25  ;;  %2924 = vmatprep.subr.bf16.mxu1 %v7197_v27  ;;  %v7244_v25 = vcombine.low %v1280_v12, %v1284_v15  ;;  %v7246_v27 = vcombine.low %v1281_v16, %v1285_v19  ;;  %v7255_v30 = vcombine.high %v1289_v20, %v1293_v23  ;;  %v1340_v12 = vld [vmem:[#allocation14 + $0x570] sm:$0xff]  ;;  %v1337_v15 = vld [vmem:[#allocation14 + $0x558] sm:$0xff] }
 0x382   :  { %3006 = vmatprep.subr.bf16.mxu0 %v7199_v29  ;;  %v7253_v29 = vcombine.high %v1288_v1, %v1292_v2  ;;  %v1341_v16 = vld [vmem:[#allocation14 + $0x578] sm:$0xff]  ;;  %v7292_v19 = vcombine.low %v1328_v59, %v1332_v63 }
 0x384   :  { %2925 = vmatpush1.bf16.msra.mxu1 %v7196_v33  ;;  %v1301_v33 = vld [vmem:[#allocation14 + $0x438] sm:$0xff] }
 0x385   :  { %3007 = vmatpush1.bf16.msra.mxu0 %v7198_v34  ;;  %2926 = vmatprep.subr.bf16.mxu1 %v7205_v35  ;;  %v7252_v34 = vcombine.low %v1288_v1, %v1292_v2  ;;  %v7254_v35 = vcombine.low %v1289_v20, %v1293_v23  ;;  %v7263_v40 = vcombine.high %v1297_v32, %v1301_v33  ;;  %v1348_v1 = vld [vmem:[#allocation14 + $0x5b0] sm:$0xff]  ;;  %v1345_v2 = vld [vmem:[#allocation14 + $0x598] sm:$0xff] }
 0x386   :  { %3008 = vmatprep.subr.bf16.mxu0 %v7207_v38  ;;  %v7261_v38 = vcombine.high %v1296_v43, %v1300_v31  ;;  %v1349_v20 = vld [vmem:[#allocation14 + $0x5b8] sm:$0xff]  ;;  %v1356_v43 = vld [vmem:[#allocation14 + $0x5f0] sm:$0xff] }
 0x387   :  { %v1353_v31 = vld [vmem:[#allocation14 + $0x5d8] sm:$0xff] }
 0x388   :  { %2927 = vmatpush1.bf16.msra.mxu1 %v7204_v26  ;;  %v1305_v26 = vld [vmem:[#allocation14 + $0x458] sm:$0xff] }
 0x389   :  { %3009 = vmatpush1.bf16.msra.mxu0 %v7206_v18  ;;  %2928 = vmatprep.subr.bf16.mxu1 %v7213_v17  ;;  %v1309_v18 = vld [vmem:[#allocation14 + $0x478] sm:$0xff]  ;;  %v7262_v17 = vcombine.low %v1297_v32, %v1301_v33 }
 0x38a   :  { %3010 = vmatprep.subr.bf16.mxu0 %v7215_v13  ;;  %v7269_v13 = vcombine.high %v1304_v41, %v1308_v22  ;;  %v7271_v28 = vcombine.high %v1305_v26, %v1309_v18  ;;  %v1357_v32 = vld [vmem:[#allocation14 + $0x5f8] sm:$0xff] }
 0x38c   :  { %2929 = vmatpush1.bf16.msra.mxu1 %v7212_v44  ;;  %v1317_v44 = vld [vmem:[#allocation14 + $0x4b8] sm:$0xff] }
 0x38d   :  { %3011 = vmatpush1.bf16.msra.mxu0 %v7214_v45  ;;  %2930 = vmatprep.subr.bf16.mxu1 %v7221_v46  ;;  %v7268_v45 = vcombine.low %v1304_v41, %v1308_v22  ;;  %v7270_v46 = vcombine.low %v1305_v26, %v1309_v18  ;;  %v7279_v48 = vcombine.high %v1313_v42, %v1317_v44  ;;  %v1364_v41 = vld [vmem:[#allocation14 + $0x630] sm:$0xff]  ;;  %v1361_v22 = vld [vmem:[#allocation14 + $0x618] sm:$0xff] }
 0x38e   :  { %3012 = vmatprep.subr.bf16.mxu0 %v7223_v47  ;;  %v7277_v47 = vcombine.high %v1312_v14, %v1316_v53  ;;  %v7318_v18 = vcombine.low %v1353_v31, %v1357_v32 }
 0x390   :  { %2931 = vmatpush1.bf16.msra.mxu1 %v7220_v52  ;;  %v1325_v52 = vld [vmem:[#allocation14 + $0x4f8] sm:$0xff] }
 0x391   :  { %3013 = vmatpush1.bf16.msra.mxu0 %v7222_v55  ;;  %2932 = vmatprep.subr.bf16.mxu1 %v7229_v56  ;;  %v7276_v55 = vcombine.low %v1312_v14, %v1316_v53  ;;  %v7285_v56 = vcombine.high %v1320_v49, %v1324_v50  ;;  %v1368_v14 = vld [vmem:[#allocation14 + $0x650] sm:$0xff] }
 0x392   :  { %3014 = vmatprep.subr.bf16.mxu0 %v7231_v57  ;;  %v7287_v57 = vcombine.high %v1321_v51, %v1325_v52  ;;  %v1372_v53 = vld [vmem:[#allocation14 + $0x670] sm:$0xff] }
 0x394   :  { %2933 = vmatpush1.bf16.msra.mxu1 %v7228_v8  ;;  %v7286_v8 = vcombine.low %v1321_v51, %v1325_v52  ;;  %v1381_v51 = vld [vmem:[#allocation14 + $0x6b8] sm:$0xff]  ;;  %v7332_v52 = vcombine.low %v1368_v14, %v1372_v53 }
 0x395   :  { %3015 = vmatpush1.bf16.msra.mxu0 %v7230_v9  ;;  %2934 = vmatprep.subr.bf16.mxu1 %v7237_v10  ;;  %v7293_v9 = vcombine.high %v1328_v59, %v1332_v63  ;;  %v7295_v10 = vcombine.high %v1329_v3, %v1333_v5  ;;  %v1388_v59 = vld [vmem:[#allocation14 + $0x6f0] sm:$0xff]  ;;  %v1385_v63 = vld [vmem:[#allocation14 + $0x6d8] sm:$0xff] }
 0x396   :  { %3016 = vmatprep.subr.bf16.mxu0 %v7239_v11  ;;  %v1336_v11 = vld [vmem:[#allocation14 + $0x550] sm:$0xff] }
 0x397   :  { %v7300_v23 = vcombine.low %v1336_v11, %v1340_v12 }
 0x398   :  { %2935 = vmatpush1.bf16.msra.mxu1 %v7236_v60  ;;  %v7294_v60 = vcombine.low %v1329_v3, %v1333_v5  ;;  %v1389_v3 = vld [vmem:[#allocation14 + $0x6f8] sm:$0xff] }
 0x399   :  { %3017 = vmatpush1.bf16.msra.mxu0 %v7238_v61  ;;  %2936 = vmatprep.subr.bf16.mxu1 %v7245_v62  ;;  %v7301_v61 = vcombine.high %v1336_v11, %v1340_v12  ;;  %v7303_v62 = vcombine.high %v1337_v15, %v1341_v16  ;;  %v1396_v11 = vld [vmem:[#allocation14 + $0x730] sm:$0xff]  ;;  %v1393_v12 = vld [vmem:[#allocation14 + $0x718] sm:$0xff] }
 0x39a   :  { %3018 = vmatprep.subr.bf16.mxu0 %v7247_v0  ;;  %v1344_v0 = vld [vmem:[#allocation14 + $0x590] sm:$0xff] }
 0x39b   :  { %v7308_v33 = vcombine.low %v1344_v0, %v1348_v1 }
 0x39c   :  { %2937 = vmatpush1.bf16.msra.mxu1 %v7244_v25  ;;  %v7302_v25 = vcombine.low %v1337_v15, %v1341_v16  ;;  %v1397_v15 = vld [vmem:[#allocation14 + $0x738] sm:$0xff] }
 0x39d   :  { %3019 = vmatpush1.bf16.msra.mxu0 %v7246_v27  ;;  %2938 = vmatprep.subr.bf16.mxu1 %v7253_v29  ;;  %v7309_v27 = vcombine.high %v1344_v0, %v1348_v1  ;;  %v7311_v29 = vcombine.high %v1345_v2, %v1349_v20  ;;  %v1404_v0 = vld [vmem:[#allocation14 + $0x770] sm:$0xff]  ;;  %v1401_v1 = vld [vmem:[#allocation14 + $0x758] sm:$0xff] }
 0x39e   :  { %3020 = vmatprep.subr.bf16.mxu0 %v7255_v30  ;;  %v1352_v30 = vld [vmem:[#allocation14 + $0x5d0] sm:$0xff] }
 0x39f   :  { %v7316_v26 = vcombine.low %v1352_v30, %v1356_v43 }
 0x3a0   :  { %2939 = vmatpush1.bf16.msra.mxu1 %v7252_v34  ;;  %v7310_v34 = vcombine.low %v1345_v2, %v1349_v20  ;;  %v1405_v2 = vld [vmem:[#allocation14 + $0x778] sm:$0xff] }
 0x3a1   :  { %3021 = vmatpush1.bf16.msra.mxu0 %v7254_v35  ;;  %2949 = vmatprep.subr.bf16.mxu1 %v7261_v38  ;;  %v7317_v35 = vcombine.high %v1352_v30, %v1356_v43  ;;  %v7319_v38 = vcombine.high %v1353_v31, %v1357_v32  ;;  %v1412_v30 = vld [vmem:[#allocation14 + $0x7b0] sm:$0xff]  ;;  %v1409_v43 = vld [vmem:[#allocation14 + $0x798] sm:$0xff] }
 0x3a2   :  { %3031 = vmatprep.subr.bf16.mxu0 %v7263_v40  ;;  %v1360_v40 = vld [vmem:[#allocation14 + $0x610] sm:$0xff]  ;;  %v1413_v31 = vld [vmem:[#allocation14 + $0x7b8] sm:$0xff] }
 0x3a3   :  { %2941 = vmatmul.mubr.bf16.vlgmr.msra.gmra.mrb[8].mxu1 %v9511_v54 }
 0x3a4   :  { %3023 = vmatmul.mubr.bf16.vlgmr.msra.gmra.mrb[12].mxu0 %v9511_v54  ;;  %2950 = vmatpush1.bf16.msra.mxu1 %v7260_v24  ;;  %v7278_v54 = vcombine.low %v1313_v42, %v1317_v44  ;;  %v1365_v24 = vld [vmem:[#allocation14 + $0x638] sm:$0xff]  ;;  %v7324_v44 = vcombine.low %v1360_v40, %v1364_v41 }
 0x3a5   :  { %2981 = vmatprep.mubr.bf16.mxu1 %v9517_v7  ;;  %3032 = vmatpush1.bf16.msra.mxu0 %v7262_v17  ;;  %v7325_v17 = vcombine.high %v1360_v40, %v1364_v41  ;;  %v1373_v42 = vld [vmem:[#allocation14 + $0x678] sm:$0xff]  ;;  %v1420_v40 = vld [vmem:[#allocation14 + $0x7f0] sm:$0xff] }
 0x3a6   :  { %3063 = vmatprep.mubr.bf16.mxu0 %v9517_v7  ;;  %2951 = vmatprep.subr.bf16.mxu1 %v7269_v13  ;;  %v7284_v7 = vcombine.low %v1320_v49, %v1324_v50  ;;  %v7327_v13 = vcombine.high %v1361_v22, %v1365_v24  ;;  %v1380_v49 = vld [vmem:[#allocation14 + $0x6b0] sm:$0xff]  ;;  %v1377_v50 = vld [vmem:[#allocation14 + $0x698] sm:$0xff] }
 0x3a7   :  { %3033 = vmatprep.subr.bf16.mxu0 %v7271_v28  ;;  %v1369_v28 = vld [vmem:[#allocation14 + $0x658] sm:$0xff] }
 0x3a8   :  { %2952 = vmatpush1.bf16.msra.mxu1 %v7268_v45  ;;  %v7326_v45 = vcombine.low %v1361_v22, %v1365_v24  ;;  %v1417_v41 = vld [vmem:[#allocation14 + $0x7d8] sm:$0xff] }
 0x3a9   :  { %3034 = vmatpush1.bf16.msra.mxu0 %v7270_v46  ;;  %2953 = vmatprep.subr.bf16.mxu1 %v7277_v47  ;;  %v7333_v46 = vcombine.high %v1368_v14, %v1372_v53  ;;  %v7335_v47 = vcombine.high %v1369_v28, %v1373_v42  ;;  %v1421_v22 = vld [vmem:[#allocation14 + $0x7f8] sm:$0xff]  ;;  %v9542_v53 = vld [vmem:[#allocation16] sm:$0xff] }
 0x3aa   :  { %3035 = vmatprep.subr.bf16.mxu0 %v7279_v48  ;;  %v1376_v48 = vld [vmem:[#allocation14 + $0x690] sm:$0xff]  ;;  %v7382_v14 = vcombine.low %v1417_v41, %v1421_v22 }
 0x3ab   :  { %v7340_v5 = vcombine.low %v1376_v48, %v1380_v49 }
 0x3ac   :  { %2954 = vmatpush1.bf16.msra.mxu1 %v7276_v55  ;;  %v7334_v55 = vcombine.low %v1369_v28, %v1373_v42  ;;  %v1427_v28 = vrot.slane %v9542_v53, %v9429_v37  ;;  %v1435_v42 = vrot.slane %v9542_v53, %v9453_v4 }
 0x3ad   :  { %3036 = vmatpush1.bf16.msra.mxu0 %v7278_v54  ;;  %2955 = vmatprep.subr.bf16.mxu1 %v7285_v56  ;;  %v7341_v54 = vcombine.high %v1376_v48, %v1380_v49  ;;  %v7343_v56 = vcombine.high %v1377_v50, %v1381_v51 }
 0x3ae   :  { %3037 = vmatprep.subr.bf16.mxu0 %v7287_v57  ;;  %v1384_v57 = vld [vmem:[#allocation14 + $0x6d0] sm:$0xff] }
 0x3af   :  { %v7348_v16 = vcombine.low %v1384_v57, %v1388_v59 }
 0x3b0   :  { %2956 = vmatpush1.bf16.msra.mxu1 %v7284_v7  ;;  %v7342_v7 = vcombine.low %v1377_v50, %v1381_v51 }
 0x3b1   :  { %3038 = vmatpush1.bf16.msra.mxu0 %v7286_v8  ;;  %2957 = vmatprep.subr.bf16.mxu1 %v7293_v9  ;;  %v7349_v8 = vcombine.high %v1384_v57, %v1388_v59  ;;  %v7351_v9 = vcombine.high %v1385_v63, %v1389_v3 }
 0x3b2   :  { %3039 = vmatprep.subr.bf16.mxu0 %v7295_v10  ;;  %v1392_v10 = vld [vmem:[#allocation14 + $0x710] sm:$0xff] }
 0x3b3   :  { %v7356_v20 = vcombine.low %v1392_v10, %v1396_v11 }
 0x3b4   :  { %2958 = vmatpush1.bf16.msra.mxu1 %v7292_v19  ;;  %v7350_v19 = vcombine.low %v1385_v63, %v1389_v3 }
 0x3b5   :  { %3040 = vmatpush1.bf16.msra.mxu0 %v7294_v60  ;;  %2959 = vmatprep.subr.bf16.mxu1 %v7301_v61  ;;  %v7357_v60 = vcombine.high %v1392_v10, %v1396_v11  ;;  %v7359_v61 = vcombine.high %v1393_v12, %v1397_v15 }
 0x3b6   :  { %3041 = vmatprep.subr.bf16.mxu0 %v7303_v62  ;;  %v1400_v62 = vld [vmem:[#allocation14 + $0x750] sm:$0xff] }
 0x3b7   :  { %v7364_v32 = vcombine.low %v1400_v62, %v1404_v0 }
 0x3b8   :  { %2960 = vmatpush1.bf16.msra.mxu1 %v7300_v23  ;;  %v7358_v23 = vcombine.low %v1393_v12, %v1397_v15 }
 0x3b9   :  { %3042 = vmatpush1.bf16.msra.mxu0 %v7302_v25  ;;  %2961 = vmatprep.subr.bf16.mxu1 %v7309_v27  ;;  %v7365_v25 = vcombine.high %v1400_v62, %v1404_v0  ;;  %v7367_v27 = vcombine.high %v1401_v1, %v1405_v2 }
 0x3ba   :  { %3043 = vmatprep.subr.bf16.mxu0 %v7311_v29  ;;  %v1408_v29 = vld [vmem:[#allocation14 + $0x790] sm:$0xff] }
 0x3bb   :  { %v7372_v24 = vcombine.low %v1408_v29, %v1412_v30 }
 0x3bc   :  { %2962 = vmatpush1.bf16.msra.mxu1 %v7308_v33  ;;  %v7366_v33 = vcombine.low %v1401_v1, %v1405_v2 }
 0x3bd   :  { %3044 = vmatpush1.bf16.msra.mxu0 %v7310_v34  ;;  %2963 = vmatprep.subr.bf16.mxu1 %v7317_v35  ;;  %v7373_v34 = vcombine.high %v1408_v29, %v1412_v30  ;;  %v7375_v35 = vcombine.high %v1409_v43, %v1413_v31 }
 0x3be   :  { %3045 = vmatprep.subr.bf16.mxu0 %v7319_v38  ;;  %v1416_v38 = vld [vmem:[#allocation14 + $0x7d0] sm:$0xff] }
 0x3c0   :  { %2964 = vmatpush1.bf16.msra.mxu1 %v7316_v26  ;;  %v7374_v26 = vcombine.low %v1409_v43, %v1413_v31 }
 0x3c1   :  { %3046 = vmatpush1.bf16.msra.mxu0 %v7318_v18  ;;  %2965 = vmatprep.subr.bf16.mxu1 %v7325_v17  ;;  %v7381_v18 = vcombine.high %v1416_v38, %v1420_v40  ;;  %v7383_v17 = vcombine.high %v1417_v41, %v1421_v22 }
 0x3c2   :  { %3047 = vmatprep.subr.bf16.mxu0 %v7327_v13  ;;  %v7380_v13 = vcombine.low %v1416_v38, %v1420_v40 }
 0x3c4   :  { %2966 = vmatpush1.bf16.msra.mxu1 %v7324_v44  ;;  %v1431_v44 = vrot.slane %v9542_v53, %v9432_v39 }
 0x3c5   :  { %3048 = vmatpush1.bf16.msra.mxu0 %v7326_v45  ;;  %2967 = vmatprep.subr.bf16.mxu1 %v7333_v46  ;;  %v1439_v45 = vrot.slane %v9542_v53, %v9456_v6 }
 0x3c6   :  { %3049 = vmatprep.subr.bf16.mxu0 %v7335_v47 }
 0x3c8   :  { %2968 = vmatpush1.bf16.msra.mxu1 %v7332_v52 }
 0x3c9   :  { %3050 = vmatpush1.bf16.msra.mxu0 %v7334_v55  ;;  %2969 = vmatprep.subr.bf16.mxu1 %v7341_v54 }
 0x3ca   :  { %3051 = vmatprep.subr.bf16.mxu0 %v7343_v56 }
 0x3cc   :  { %2970 = vmatpush1.bf16.msra.mxu1 %v7340_v5 }
 0x3cd   :  { %3052 = vmatpush1.bf16.msra.mxu0 %v7342_v7  ;;  %2971 = vmatprep.subr.bf16.mxu1 %v7349_v8 }
 0x3ce   :  { %3053 = vmatprep.subr.bf16.mxu0 %v7351_v9 }
 0x3d0   :  { %2972 = vmatpush1.bf16.msra.mxu1 %v7348_v16 }
 0x3d1   :  { %3054 = vmatpush1.bf16.msra.mxu0 %v7350_v19  ;;  %2973 = vmatprep.subr.bf16.mxu1 %v7357_v60 }
 0x3d2   :  { %3055 = vmatprep.subr.bf16.mxu0 %v7359_v61 }
 0x3d4   :  { %2974 = vmatpush1.bf16.msra.mxu1 %v7356_v20 }
 0x3d5   :  { %3056 = vmatpush1.bf16.msra.mxu0 %v7358_v23  ;;  %2975 = vmatprep.subr.bf16.mxu1 %v7365_v25 }
 0x3d6   :  { %3057 = vmatprep.subr.bf16.mxu0 %v7367_v27 }
 0x3d8   :  { %2976 = vmatpush1.bf16.msra.mxu1 %v7364_v32 }
 0x3d9   :  { %3058 = vmatpush1.bf16.msra.mxu0 %v7366_v33  ;;  %2977 = vmatprep.subr.bf16.mxu1 %v7373_v34 }
 0x3da   :  { %3059 = vmatprep.subr.bf16.mxu0 %v7375_v35 }
 0x3dc   :  { %2978 = vmatpush1.bf16.msra.mxu1 %v7372_v24 }
 0x3dd   :  { %3060 = vmatpush1.bf16.msra.mxu0 %v7374_v26  ;;  %2979 = vmatprep.subr.bf16.mxu1 %v7381_v18 }
 0x3de   :  { %3061 = vmatprep.subr.bf16.mxu0 %v7383_v17 }
 0x3e0   :  { %2980 = vmatpush1.bf16.msra.mxu1 %v7380_v13 }
 0x3e1   :  { %3062 = vmatpush1.bf16.msra.mxu0 %v7382_v14  ;;  %v8157_v14 = vld [vmem:[#allocation20 + $0x4] ss:$28 sps:$4 sm:$0xff]  }
 0x3e2   :  { %6343 = vmatprep.subr.bf16.mxu1 %v8157_v14  ;;  %v8184_v14 = vld [vmem:[#allocation20 + $0xec] ss:$28 sps:$4 sm:$0xff]  }
 0x3e3   :  { %2982 = vmatmul.mubr.bf16.vlgmr.msra.gmra.mrb[8].mxu1 %v9530_v21 }
 0x3e4   :  { %3064 = vmatmul.mubr.bf16.vlgmr.msra.gmra.mrb[12].mxu0 %v9530_v21 }
 0x436   :  { %v2819_v46 = vpop.f32.mrb[4].mxu1  ;;  %v2901_v47 = vpop.f32.mrb[8].mxu0 }
 0x437   :  { %v9552_v48 = vadd.f32 %v2819_v46, %v1427_v28  ;;  %v9554_v49 = vadd.f32 %v2901_v47, %v1435_v42  ;;  %v2821_v21 = vpop.f32.mrb[5].mxu1  ;;  %v2903_v50 = vpop.f32.mrb[9].mxu0  ;;  %v8160_v28 = vld [vmem:[#allocation20 + $0xc] ss:$28 sps:$4 sm:$0xff]   ;;  %v8155_v47 = vld [vmem:[#allocation20] ss:$28 sps:$4 sm:$0xff]  }
 0x438   :  { %v9556_v51 = vadd.f32 %v2821_v21, %v1431_v44  ;;  %v9558_v52 = vadd.f32 %v2903_v50, %v1439_v45  ;;  %v2823_v55 = vpop.f32.mrb[6].mxu1  ;;  %v2905_v54 = vpop.f32.mrb[10].mxu0  ;;  %v8158_v21 = vld [vmem:[#allocation20 + $0x8] ss:$28 sps:$4 sm:$0xff]   ;;  %6507 = vmatprep.subr.bf16.mxu0 %v8160_v28  ;;  %6344 = vmatpush1.bf16.msra.mxu1 %v8155_v47  ;;  %v8179_v28 = vld [vmem:[#allocation20 + $0xe0] ss:$28 sps:$4 sm:$0xff]  }
 0x439   :  { %v3074_v56 = vrot.slane %v9552_v48, 4  ;;  %v3130_v57 = vmul.f32 %v9552_v48, %v9552_v48  ;;  %v3086_v59 = vrot.slane %v9554_v49, 4  ;;  %v3132_v63 = vmul.f32 %v9554_v49, %v9554_v49  ;;  %v2824_v3 = vpop.f32.mrb[7].mxu1  ;;  %v2906_v5 = vpop.f32.mrb[11].mxu0  ;;  %6508 = vmatpush1.bf16.msra.mxu0 %v8158_v21  ;;  %v8188_v47 = vld [vmem:[#allocation20 + $0x120] ss:$28 sps:$4 sm:$0xff]  }
 0x43a   :  { %v3080_v7 = vrot.slane %v9556_v51, 4  ;;  %v3131_v8 = vmul.f32 %v9556_v51, %v9556_v51  ;;  %v3092_v9 = vrot.slane %v9558_v52, 4  ;;  %v3133_v10 = vmul.f32 %v9558_v52, %v9558_v52 }
 0x43b   :  { %v3075_v11 = vadd.f32 %v9552_v48, %v3074_v56  ;;  %v3138_v12 = vrot.slane %v3130_v57, 4  ;;  %v3087_v15 = vadd.f32 %v9554_v49, %v3086_v59  ;;  %v3150_v16 = vrot.slane %v3132_v63, 4 }
 0x43c   :  { %v3081_v19 = vadd.f32 %v9556_v51, %v3080_v7  ;;  %v3144_v60 = vrot.slane %v3131_v8, 4  ;;  %v3093_v61 = vadd.f32 %v9558_v52, %v3092_v9  ;;  %v3156_v62 = vrot.slane %v3133_v10, 4 }
 0x43d   :  { %v3076_v0 = vrot.slane %v3075_v11, 2  ;;  %v3139_v1 = vadd.f32 %v3138_v12, %v3130_v57  ;;  %v3088_v2 = vrot.slane %v3087_v15, 2  ;;  %v3151_v20 = vadd.f32 %v3150_v16, %v3132_v63 }
 0x43e   :  { %v3082_v23 = vrot.slane %v3081_v19, 2  ;;  %v3145_v25 = vadd.f32 %v3144_v60, %v3131_v8  ;;  %v3094_v27 = vrot.slane %v3093_v61, 2  ;;  %v3157_v29 = vadd.f32 %v3156_v62, %v3133_v10  ;;  %v8163_v10 = vld [vmem:[#allocation20 + $0x3c] ss:$28 sps:$4 sm:$0xff]  }
 0x43f   :  { %v3077_v30 = vadd.f32 %v3076_v0, %v3075_v11  ;;  %v3140_v43 = vrot.slane %v3139_v1, 2  ;;  %v3089_v31 = vadd.f32 %v3088_v2, %v3087_v15  ;;  %v3152_v32 = vrot.slane %v3151_v20, 2  ;;  %v8166_v11 = vld [vmem:[#allocation20 + $0x44] ss:$28 sps:$4 sm:$0xff]   ;;  %v8161_v60 = vld [vmem:[#allocation20 + $0x38] ss:$28 sps:$4 sm:$0xff]   ;;  %6345 = vmatprep.subr.bf16.mxu1 %v8163_v10 }
 0x440   :  { %v3083_v33 = vadd.f32 %v3082_v23, %v3081_v19  ;;  %v3146_v34 = vrot.slane %v3145_v25, 2  ;;  %v3095_v35 = vadd.f32 %v3094_v27, %v3093_v61  ;;  %v3158_v38 = vrot.slane %v3157_v29, 2  ;;  %v8164_v61 = vld [vmem:[#allocation20 + $0x40] ss:$28 sps:$4 sm:$0xff]   ;;  %6509 = vmatprep.subr.bf16.mxu0 %v8166_v11  ;;  %6346 = vmatpush1.bf16.msra.mxu1 %v8161_v60  ;;  %v8202_v60 = vld [vmem:[#allocation20 + $0x194] ss:$28 sps:$4 sm:$0xff]  }
 0x441   :  { %v3078_v40 = vrot.slane %v3077_v30, 1  ;;  %v3141_v41 = vadd.f32 %v3140_v43, %v3139_v1  ;;  %v3090_v22 = vrot.slane %v3089_v31, 1  ;;  %v3153_v24 = vadd.f32 %v3152_v32, %v3151_v20  ;;  %6510 = vmatpush1.bf16.msra.mxu0 %v8164_v61  ;;  %v8167_v32 = vld [vmem:[#allocation20 + $0x70] ss:$28 sps:$4 sm:$0xff]  }
 0x442   :  { %v3084_v26 = vrot.slane %v3083_v33, 1  ;;  %v3147_v18 = vadd.f32 %v3146_v34, %v3145_v25  ;;  %v3096_v17 = vrot.slane %v3095_v35, 1  ;;  %v3159_v13 = vadd.f32 %v3158_v38, %v3157_v29  ;;  %v8169_v29 = vld [vmem:[#allocation20 + $0x74] ss:$28 sps:$4 sm:$0xff]  }
 0x443   :  { %v3079_v42 = vadd.f32 %v3078_v40, %v3077_v30  ;;  %v3142_v44 = vrot.slane %v3141_v41, 1  ;;  %v3091_v45 = vadd.f32 %v3090_v22, %v3089_v31  ;;  %v3154_v46 = vrot.slane %v3153_v24, 1  ;;  %v8172_v30 = vld [vmem:[#allocation20 + $0x7c] ss:$28 sps:$4 sm:$0xff]   ;;  %6347 = vmatprep.subr.bf16.mxu1 %v8169_v29  ;;  %v8217_v29 = vld [vmem:[#allocation20 + $0x234] ss:$28 sps:$4 sm:$0xff]  }
 0x444   :  { %v3085_v50 = vadd.f32 %v3084_v26, %v3083_v33  ;;  %v3148_v55 = vrot.slane %v3147_v18, 1  ;;  %v3097_v54 = vadd.f32 %v3096_v17, %v3095_v35  ;;  %v3160_v56 = vrot.slane %v3159_v13, 1  ;;  %v8170_v33 = vld [vmem:[#allocation20 + $0x78] ss:$28 sps:$4 sm:$0xff]   ;;  %6511 = vmatprep.subr.bf16.mxu0 %v8172_v30  ;;  %6348 = vmatpush1.bf16.msra.mxu1 %v8167_v32  ;;  %v8173_v26 = vld [vmem:[#allocation20 + $0xa8] ss:$28 sps:$4 sm:$0xff]  }
 0x445   :  { %v9576_v57 = vmul.f32 0.125, %v3079_v42  ;;  %v3143_v59 = vadd.f32 %v3142_v44, %v3141_v41  ;;  %v9578_v63 = vmul.f32 0.125, %v3091_v45  ;;  %v3155_v3 = vadd.f32 %v3154_v46, %v3153_v24  ;;  %6512 = vmatpush1.bf16.msra.mxu0 %v8170_v33  ;;  %v8175_v24 = vld [vmem:[#allocation20 + $0xac] ss:$28 sps:$4 sm:$0xff]   ;;  %v8178_v17 = vld [vmem:[#allocation20 + $0xb4] ss:$28 sps:$4 sm:$0xff]  }
 0x446   :  { %v9580_v5 = vmul.f32 0.125, %v3085_v50  ;;  %v3149_v7 = vadd.f32 %v3148_v55, %v3147_v18  ;;  %v9582_v8 = vmul.f32 0.125, %v3097_v54  ;;  %v3161_v9 = vadd.f32 %v3160_v56, %v3159_v13  ;;  %v8176_v18 = vld [vmem:[#allocation20 + $0xb0] ss:$28 sps:$4 sm:$0xff]   ;;  %6349 = vmatprep.subr.bf16.mxu1 %v8175_v24  ;;  %6513 = vmatprep.subr.bf16.mxu0 %v8178_v17  ;;  %v8181_v13 = vld [vmem:[#allocation20 + $0xe4] ss:$28 sps:$4 sm:$0xff]  }
 0x447   :  { %v3186_v12 = vmul.f32 0.125, %v3143_v59  ;;  %v3194_v15 = vmul.f32 %v9576_v57, %v9576_v57  ;;  %v3188_v16 = vmul.f32 0.125, %v3155_v3  ;;  %v3196_v19 = vmul.f32 %v9578_v63, %v9578_v63  ;;  %v8182_v42 = vld [vmem:[#allocation20 + $0xe8] ss:$28 sps:$4 sm:$0xff]   ;;  %v8187_v44 = vld [vmem:[#allocation20 + $0x11c] ss:$28 sps:$4 sm:$0xff]  }
 0x448   :  { %v3187_v62 = vmul.f32 0.125, %v3149_v7  ;;  %v3195_v0 = vmul.f32 %v9580_v5, %v9580_v5  ;;  %v3189_v1 = vmul.f32 0.125, %v3161_v9  ;;  %v3197_v2 = vmul.f32 %v9582_v8, %v9582_v8  ;;  %6350 = vmatpush1.bf16.msra.mxu1 %v8173_v26  ;;  %v8190_v45 = vld [vmem:[#allocation20 + $0x124] ss:$28 sps:$4 sm:$0xff]   ;;  %v8185_v46 = vld [vmem:[#allocation20 + $0x118] ss:$28 sps:$4 sm:$0xff]  }
 0x449   :  { %v3202_v20 = vsub.f32 %v3186_v12, %v3194_v15  ;;  %v3204_v23 = vsub.f32 %v3188_v16, %v3196_v19  ;;  %6514 = vmatpush1.bf16.msra.mxu0 %v8176_v18  ;;  %6351 = vmatprep.subr.bf16.mxu1 %v8181_v13  ;;  %v8193_v55 = vld [vmem:[#allocation20 + $0x154] ss:$28 sps:$4 sm:$0xff]   ;;  %v8196_v54 = vld [vmem:[#allocation20 + $0x15c] ss:$28 sps:$4 sm:$0xff]   ;;  %v8199_v12 = vld [vmem:[#allocation20 + $0x18c] ss:$28 sps:$4 sm:$0xff]  }
 0x44a   :  { %v3203_v25 = vsub.f32 %v3187_v62, %v3195_v0  ;;  %v3205_v27 = vsub.f32 %v3189_v1, %v3197_v2  ;;  %6515 = vmatprep.subr.bf16.mxu0 %v8184_v14  ;;  %v8191_v59 = vld [vmem:[#allocation20 + $0x150] ss:$28 sps:$4 sm:$0xff]   ;;  %v8194_v3 = vld [vmem:[#allocation20 + $0x158] ss:$28 sps:$4 sm:$0xff]   ;;  %v8197_v16 = vld [vmem:[#allocation20 + $0x188] ss:$28 sps:$4 sm:$0xff]  }
 0x44b   :  { %v3210_v43 = vmax.f32 %v3202_v20, 0.0  ;;  %v3212_v31 = vmax.f32 %v3204_v23, 0.0  ;;  %v8200_v19 = vld [vmem:[#allocation20 + $0x190] ss:$28 sps:$4 sm:$0xff]   ;;  %v8205_v62 = vld [vmem:[#allocation20 + $0x1c4] ss:$28 sps:$4 sm:$0xff]  }
 0x44c   :  { %v3211_v34 = vmax.f32 %v3203_v25, 0.0  ;;  %v3213_v35 = vmax.f32 %v3205_v27, 0.0  ;;  %6352 = vmatpush1.bf16.msra.mxu1 %v8179_v28  ;;  %v8208_v0 = vld [vmem:[#allocation20 + $0x1cc] ss:$28 sps:$4 sm:$0xff]   ;;  %v8203_v1 = vld [vmem:[#allocation20 + $0x1c0] ss:$28 sps:$4 sm:$0xff]  }
 0x44d   :  { %v3218_v38 = vadd.f32 1e-05, %v3210_v43  ;;  %v3220_v40 = vadd.f32 1e-05, %v3212_v31  ;;  %6516 = vmatpush1.bf16.msra.mxu0 %v8182_v42  ;;  %6353 = vmatprep.subr.bf16.mxu1 %v8187_v44  ;;  %v8206_v2 = vld [vmem:[#allocation20 + $0x1c8] ss:$28 sps:$4 sm:$0xff]  }
 0x44e   :  { %v3219_v41 = vadd.f32 1e-05, %v3211_v34  ;;  %v3221_v22 = vadd.f32 1e-05, %v3213_v35  ;;  %6517 = vmatprep.subr.bf16.mxu0 %v8190_v45  ;;  %v8211_v20 = vld [vmem:[#allocation20 + $0x1fc] ss:$28 sps:$4 sm:$0xff]  }
 0x44f   :  { %8803 = vrsqrt.f32 %v3218_v38  ;;  %v8214_v23 = vld [vmem:[#allocation20 + $0x204] ss:$28 sps:$4 sm:$0xff]   ;;  %v8209_v25 = vld [vmem:[#allocation20 + $0x1f8] ss:$28 sps:$4 sm:$0xff]   ;;  %v8215_v43 = vld [vmem:[#allocation20 + $0x230] ss:$28 sps:$4 sm:$0xff]  }
 0x450   :  { %8805 = vrsqrt.f32 %v3220_v40  ;;  %6354 = vmatpush1.bf16.msra.mxu1 %v8185_v46  ;;  %v8212_v27 = vld [vmem:[#allocation20 + $0x200] ss:$28 sps:$4 sm:$0xff]   ;;  %v8218_v31 = vld [vmem:[#allocation20 + $0x238] ss:$28 sps:$4 sm:$0xff]   ;;  %v8223_v32 = vld [vmem:[#allocation20 + $0x26c] ss:$28 sps:$4 sm:$0xff]  }
 0x451   :  { %8807 = vrsqrt.f32 %v3219_v41  ;;  %6518 = vmatpush1.bf16.msra.mxu0 %v8188_v47  ;;  %6355 = vmatprep.subr.bf16.mxu1 %v8193_v55  ;;  %v8220_v30 = vld [vmem:[#allocation20 + $0x23c] ss:$28 sps:$4 sm:$0xff]   ;;  %v8226_v33 = vld [vmem:[#allocation20 + $0x274] ss:$28 sps:$4 sm:$0xff]   ;;  %v8221_v34 = vld [vmem:[#allocation20 + $0x268] ss:$28 sps:$4 sm:$0xff]  }
 0x452   :  { %8809 = vrsqrt.f32 %v3221_v22  ;;  %6519 = vmatprep.subr.bf16.mxu0 %v8196_v54  ;;  %v8224_v35 = vld [vmem:[#allocation20 + $0x270] ss:$28 sps:$4 sm:$0xff]   ;;  %v8229_v38 = vld [vmem:[#allocation20 + $0x2a4] ss:$28 sps:$4 sm:$0xff]   ;;  %v8235_v24 = vld [vmem:[#allocation20 + $0x2dc] ss:$28 sps:$4 sm:$0xff]  }
 0x453   :  { %v8232_v40 = vld [vmem:[#allocation20 + $0x2ac] ss:$28 sps:$4 sm:$0xff]   ;;  %v8227_v41 = vld [vmem:[#allocation20 + $0x2a0] ss:$28 sps:$4 sm:$0xff]   ;;  %v8233_v18 = vld [vmem:[#allocation20 + $0x2d8] ss:$28 sps:$4 sm:$0xff]  }
 0x454   :  { %6356 = vmatpush1.bf16.msra.mxu1 %v8191_v59  ;;  %v8230_v22 = vld [vmem:[#allocation20 + $0x2a8] ss:$28 sps:$4 sm:$0xff]   ;;  %v8236_v17 = vld [vmem:[#allocation20 + $0x2e0] ss:$28 sps:$4 sm:$0xff]   ;;  %v8241_v13 = vld [vmem:[#allocation20 + $0x314] ss:$28 sps:$4 sm:$0xff]  }
 0x455   :  { %6520 = vmatpush1.bf16.msra.mxu0 %v8194_v3  ;;  %6357 = vmatprep.subr.bf16.mxu1 %v8199_v12  ;;  %v8238_v26 = vld [vmem:[#allocation20 + $0x2e4] ss:$28 sps:$4 sm:$0xff]   ;;  %v8244_v14 = vld [vmem:[#allocation20 + $0x31c] ss:$28 sps:$4 sm:$0xff]   ;;  %v8239_v28 = vld [vmem:[#allocation20 + $0x310] ss:$28 sps:$4 sm:$0xff]  }
 0x456   :  { %6521 = vmatprep.subr.bf16.mxu0 %v8202_v60  ;;  %v8242_v42 = vld [vmem:[#allocation20 + $0x318] ss:$28 sps:$4 sm:$0xff]   ;;  %v8247_v44 = vld [vmem:[#allocation20 + $0x34c] ss:$28 sps:$4 sm:$0xff]   ;;  %v9601_v55 = vsub.s32 4, %v9426_v36  ;;  %v9604_v54 = vsub.s32 6, %v9426_v36 }
 0x457   :  { %v8245_v45 = vld [vmem:[#allocation20 + $0x348] ss:$28 sps:$4 sm:$0xff]   ;;  %v8250_v46 = vld [vmem:[#allocation20 + $0x354] ss:$28 sps:$4 sm:$0xff]   ;;  %v9610_v59 = vsub.s32 7, %v9426_v36 }
 0x458   :  { %6358 = vmatpush1.bf16.msra.mxu1 %v8197_v16  ;;  %v8248_v47 = vld [vmem:[#allocation20 + $0x350] ss:$28 sps:$4 sm:$0xff]   ;;  %v1443_v3 = vrot.slane %v9542_v53, %v9601_v55 }
 0x459   :  { %v8804_v21 = vpop.eup %8803  ;;  %6522 = vmatpush1.bf16.msra.mxu0 %v8200_v19  ;;  %6359 = vmatprep.subr.bf16.mxu1 %v8205_v62 }
 0x45a   :  { %v8806_v50 = vpop.eup %8805  ;;  %6523 = vmatprep.subr.bf16.mxu0 %v8208_v0 }
 0x45b   :  { %v8808_v56 = vpop.eup %8807 }
 0x45c   :  { %v8810_v7 = vpop.eup %8809  ;;  %v3242_v9 = vcombine.low %v8804_v21, %v8808_v56  ;;  %6360 = vmatpush1.bf16.msra.mxu1 %v8203_v1  ;;  %v8253_v21 = vld [vmem:[#allocation20 + $0x384] ss:$28 sps:$4 sm:$0xff]   ;;  %v9607_v56 = vsub.s32 5, %v9426_v36 }
 0x45d   :  { %v3243_v10 = vcombine.low %v8806_v50, %v8810_v7  ;;  %6524 = vmatpush1.bf16.msra.mxu0 %v8206_v2  ;;  %6361 = vmatprep.subr.bf16.mxu1 %v8211_v20  ;;  %v8256_v50 = vld [vmem:[#allocation20 + $0x38c] ss:$28 sps:$4 sm:$0xff]   ;;  %v1451_v7 = vrot.slane %v9542_v53, %v9604_v54 }
 0x45e   :  { %v9593_v11 = vrot.slane %v3242_v9, %v9487_v58  ;;  %6525 = vmatprep.subr.bf16.mxu0 %v8214_v23  ;;  %v1447_v9 = vrot.slane %v9542_v53, %v9607_v56 }
 0x45f   :  { %v9596_v15 = vrot.slane %v3243_v10, %v9487_v58  ;;  %v1455_v10 = vrot.slane %v9542_v53, %v9610_v59 }
 0x460   :  { %6362 = vmatpush1.bf16.msra.mxu1 %v8209_v25 }
 0x461   :  { %v3274_v61 = vcombine.low %v9593_v11, %v9596_v15  ;;  %6526 = vmatpush1.bf16.msra.mxu0 %v8212_v27  ;;  %6363 = vmatprep.subr.bf16.mxu1 %v8217_v29 }
 0x462   :  { %6527 = vmatprep.subr.bf16.mxu0 %v8220_v30 }
 0x464   :  { %6364 = vmatpush1.bf16.msra.mxu1 %v8215_v43 }
 0x465   :  { %6528 = vmatpush1.bf16.msra.mxu0 %v8218_v31  ;;  %6365 = vmatprep.subr.bf16.mxu1 %v8223_v32 }
 0x466   :  { %6529 = vmatprep.subr.bf16.mxu0 %v8226_v33 }
 0x468   :  { %6366 = vmatpush1.bf16.msra.mxu1 %v8221_v34 }
 0x469   :  { %6530 = vmatpush1.bf16.msra.mxu0 %v8224_v35  ;;  %6367 = vmatprep.subr.bf16.mxu1 %v8229_v38 }
 0x46a   :  { %6531 = vmatprep.subr.bf16.mxu0 %v8232_v40 }
 0x46c   :  { %6368 = vmatpush1.bf16.msra.mxu1 %v8227_v41 }
 0x46d   :  { %6532 = vmatpush1.bf16.msra.mxu0 %v8230_v22  ;;  %6369 = vmatprep.subr.bf16.mxu1 %v8235_v24 }
 0x46e   :  { %6533 = vmatprep.subr.bf16.mxu0 %v8238_v26 }
 0x470   :  { %6370 = vmatpush1.bf16.msra.mxu1 %v8233_v18 }
 0x471   :  { %6534 = vmatpush1.bf16.msra.mxu0 %v8236_v17  ;;  %6371 = vmatprep.subr.bf16.mxu1 %v8241_v13 }
 0x472   :  { %6535 = vmatprep.subr.bf16.mxu0 %v8244_v14 }
 0x474   :  { %6372 = vmatpush1.bf16.msra.mxu1 %v8239_v28 }
 0x475   :  { %6536 = vmatpush1.bf16.msra.mxu0 %v8242_v42  ;;  %6373 = vmatprep.subr.bf16.mxu1 %v8247_v44 }
 0x476   :  { %6537 = vmatprep.subr.bf16.mxu0 %v8250_v46 }
 0x478   :  { %6374 = vmatpush1.bf16.msra.mxu1 %v8245_v45 }
 0x479   :  { %6538 = vmatpush1.bf16.msra.mxu0 %v8248_v47  ;;  %6384 = vmatprep.subr.bf16.mxu1 %v8253_v21 }
 0x47a   :  { %6548 = vmatprep.subr.bf16.mxu0 %v8256_v50 }
 0x4b6   :  { %v2983_v12 = vpop.f32.mrb[8].mxu1 }
 0x4b7   :  { %v9620_v16 = vadd.f32 %v2983_v12, %v1443_v3  ;;  %v3065_v19 = vpop.f32.mrb[12].mxu0  ;;  %v2985_v60 = vpop.f32.mrb[9].mxu1 }
 0x4b8   :  { %v9622_v62 = vadd.f32 %v3065_v19, %v1451_v7  ;;  %v9624_v36 = vadd.f32 %v2985_v60, %v1447_v9  ;;  %v3067_v0 = vpop.f32.mrb[13].mxu0  ;;  %v2987_v1 = vpop.f32.mrb[10].mxu1 }
 0x4b9   :  { %v3098_v2 = vrot.slane %v9620_v16, 4  ;;  %v3134_v20 = vmul.f32 %v9620_v16, %v9620_v16  ;;  %v9629_v23 = vadd.f32 %v3067_v0, %v1455_v10  ;;  %v3069_v25 = vpop.f32.mrb[14].mxu0  ;;  %v2988_v53 = vpop.f32.mrb[11].mxu1 }
 0x4ba   :  { %v3110_v27 = vrot.slane %v9622_v62, 4  ;;  %v3136_v29 = vmul.f32 %v9622_v62, %v9622_v62  ;;  %v3104_v30 = vrot.slane %v9624_v36, 4  ;;  %v3135_v43 = vmul.f32 %v9624_v36, %v9624_v36  ;;  %v3070_v31 = vpop.f32.mrb[15].mxu0 }
 0x4bb   :  { %v3099_v32 = vadd.f32 %v9620_v16, %v3098_v2  ;;  %v3162_v33 = vrot.slane %v3134_v20, 4  ;;  %v3116_v34 = vrot.slane %v9629_v23, 4  ;;  %v3137_v35 = vmul.f32 %v9629_v23, %v9629_v23 }
 0x4bc   :  { %v3111_v38 = vadd.f32 %v9622_v62, %v3110_v27  ;;  %v3174_v40 = vrot.slane %v3136_v29, 4  ;;  %v3105_v41 = vadd.f32 %v9624_v36, %v3104_v30  ;;  %v3168_v22 = vrot.slane %v3135_v43, 4 }
 0x4bd   :  { %v3100_v24 = vrot.slane %v3099_v32, 2  ;;  %v3163_v26 = vadd.f32 %v3162_v33, %v3134_v20  ;;  %v3117_v18 = vadd.f32 %v9629_v23, %v3116_v34  ;;  %v3180_v17 = vrot.slane %v3137_v35, 4 }
 0x4be   :  { %v3112_v13 = vrot.slane %v3111_v38, 2  ;;  %v3175_v14 = vadd.f32 %v3174_v40, %v3136_v29  ;;  %v3106_v28 = vrot.slane %v3105_v41, 2  ;;  %v3169_v42 = vadd.f32 %v3168_v22, %v3135_v43 }
 0x4bf   :  { %v3101_v44 = vadd.f32 %v3100_v24, %v3099_v32  ;;  %v3164_v45 = vrot.slane %v3163_v26, 2  ;;  %v3118_v46 = vrot.slane %v3117_v18, 2  ;;  %v3181_v47 = vadd.f32 %v3180_v17, %v3137_v35 }
 0x4c0   :  { %v3113_v21 = vadd.f32 %v3112_v13, %v3111_v38  ;;  %v3176_v50 = vrot.slane %v3175_v14, 2  ;;  %v3107_v3 = vadd.f32 %v3106_v28, %v3105_v41  ;;  %v3170_v7 = vrot.slane %v3169_v42, 2 }
 0x4c1   :  { %v3102_v9 = vrot.slane %v3101_v44, 1  ;;  %v3165_v10 = vadd.f32 %v3164_v45, %v3163_v26  ;;  %v3119_v12 = vadd.f32 %v3118_v46, %v3117_v18  ;;  %v3182_v19 = vrot.slane %v3181_v47, 2 }
 0x4c2   :  { %v3114_v60 = vrot.slane %v3113_v21, 1  ;;  %v3177_v0 = vadd.f32 %v3176_v50, %v3175_v14  ;;  %v3108_v1 = vrot.slane %v3107_v3, 1  ;;  %v3171_v2 = vadd.f32 %v3170_v7, %v3169_v42 }
 0x4c3   :  { %v3103_v20 = vadd.f32 %v3102_v9, %v3101_v44  ;;  %v3166_v25 = vrot.slane %v3165_v10, 1  ;;  %v3120_v53 = vrot.slane %v3119_v12, 1  ;;  %v3183_v27 = vadd.f32 %v3182_v19, %v3181_v47 }
 0x4c4   :  { %v3115_v29 = vadd.f32 %v3114_v60, %v3113_v21  ;;  %v3178_v30 = vrot.slane %v3177_v0, 1  ;;  %v3109_v43 = vadd.f32 %v3108_v1, %v3107_v3  ;;  %v3172_v31 = vrot.slane %v3171_v2, 1 }
 0x4c5   :  { %v3126_v32 = vmul.f32 0.125, %v3103_v20  ;;  %v3167_v33 = vadd.f32 %v3166_v25, %v3165_v10  ;;  %v3121_v34 = vadd.f32 %v3120_v53, %v3119_v12  ;;  %v3184_v35 = vrot.slane %v3183_v27, 1 }
 0x4c6   :  { %v3128_v38 = vmul.f32 0.125, %v3115_v29  ;;  %v3179_v40 = vadd.f32 %v3178_v30, %v3177_v0  ;;  %v3127_v41 = vmul.f32 0.125, %v3109_v43  ;;  %v3173_v22 = vadd.f32 %v3172_v31, %v3171_v2 }
 0x4c7   :  { %v3190_v24 = vmul.f32 0.125, %v3167_v33  ;;  %v3198_v26 = vmul.f32 %v3126_v32, %v3126_v32  ;;  %v3129_v18 = vmul.f32 0.125, %v3121_v34  ;;  %v3185_v17 = vadd.f32 %v3184_v35, %v3183_v27  ;;  %v3072_v34 = vld [vmem:[#allocation17] sm:$0xff] }
 0x4c8   :  { %v3192_v13 = vmul.f32 0.125, %v3179_v40  ;;  %v3200_v14 = vmul.f32 %v3128_v38, %v3128_v38  ;;  %v3191_v28 = vmul.f32 0.125, %v3173_v22  ;;  %v3199_v42 = vmul.f32 %v3127_v41, %v3127_v41 }
 0x4c9   :  { %v3206_v44 = vsub.f32 %v3190_v24, %v3198_v26  ;;  %v3193_v45 = vmul.f32 0.125, %v3185_v17  ;;  %v3201_v46 = vmul.f32 %v3129_v18, %v3129_v18  ;;  %v3282_v31 = vrot.slane %v3274_v61, %v9487_v58 }
 0x4ca   :  { %v3208_v47 = vsub.f32 %v3192_v13, %v3200_v14  ;;  %v3207_v21 = vsub.f32 %v3191_v28, %v3199_v42 }
 0x4cb   :  { %v3214_v50 = vmax.f32 %v3206_v44, 0.0  ;;  %v3209_v3 = vsub.f32 %v3193_v45, %v3201_v46 }
 0x4cc   :  { %v3216_v7 = vmax.f32 %v3208_v47, 0.0  ;;  %v3215_v9 = vmax.f32 %v3207_v21, 0.0 }
 0x4cd   :  { %v3222_v10 = vadd.f32 1e-05, %v3214_v50  ;;  %v3217_v12 = vmax.f32 %v3209_v3, 0.0 }
 0x4ce   :  { %v3224_v19 = vadd.f32 1e-05, %v3216_v7  ;;  %v3223_v60 = vadd.f32 1e-05, %v3215_v9 }
 0x4cf   :  { %8811 = vrsqrt.f32 %v3222_v10  ;;  %v3225_v0 = vadd.f32 1e-05, %v3217_v12 }
 0x4d0   :  { %8813 = vrsqrt.f32 %v3224_v19 }
 0x4d1   :  { %8815 = vrsqrt.f32 %v3223_v60  ;;  %v3073_v60 = vld [vmem:[#allocation19] sm:$0xff] }
 0x4d2   :  { %8817 = vrsqrt.f32 %v3225_v0 }
 0x4d9   :  { %v8812_v1 = vpop.eup %8811 }
 0x4da   :  { %v8814_v2 = vpop.eup %8813 }
 0x4db   :  { %v8816_v20 = vpop.eup %8815 }
 0x4dc   :  { %v8818_v25 = vpop.eup %8817  ;;  %v3244_v53 = vcombine.low %v8812_v1, %v8816_v20 }
 0x4dd   :  { %v3245_v27 = vcombine.low %v8814_v2, %v8818_v25 }
 0x4de   :  { %v3266_v29 = vrot.slane %v3244_v53, %v9487_v58 }
 0x4df   :  { %v3273_v30 = vrot.slane %v3245_v27, %v9487_v58 }
 0x4e1   :  { %v3275_v43 = vcombine.low %v3266_v29, %v3273_v30 }
 0x4e3   :  { %v3289_v33 = vrot.slane %v3275_v43, %v9487_v58 }
 0x4e5   :  { %v3290_v35 = vcombine.low %v3282_v31, %v3289_v33 }
 0x4e7   :  { %v3292_v40 = vmul.f32 %v3290_v35, %v3072_v34 }
 0x4e9   :  { %v3297_v22 = vrot.slane %v3292_v40, %v9429_v37  ;;  %v3301_v24 = vrot.slane %v3292_v40, %v9432_v39  ;;  %v3305_v26 = vrot.slane %v3292_v40, %v9453_v4  ;;  %v3309_v17 = vrot.slane %v3292_v40, %v9456_v6 }
 0x4ea   :  { %v3313_v13 = vrot.slane %v3292_v40, %v9601_v55  ;;  %v3317_v14 = vrot.slane %v3292_v40, %v9607_v56  ;;  %v3321_v11 = vrot.slane %v3292_v40, %v9604_v54  ;;  %v3325_v15 = vrot.slane %v3292_v40, %v9610_v59 }
 0x4eb   :  { %v3334_v61 = vmul.f32 %v3297_v22, %v9576_v57  ;;  %v3335_v28 = vmul.f32 %v3301_v24, %v9580_v5  ;;  %v3336_v42 = vmul.f32 %v3305_v26, %v9578_v63  ;;  %v3337_v44 = vmul.f32 %v3309_v17, %v9582_v8 }
 0x4ec   :  { %v3338_v45 = vmul.f32 %v3313_v13, %v3126_v32  ;;  %v3339_v46 = vmul.f32 %v3317_v14, %v3127_v41  ;;  %v3340_v47 = vmul.f32 %v3321_v11, %v3128_v38  ;;  %v3341_v21 = vmul.f32 %v3325_v15, %v3129_v18 }
 0x4ed   :  { %v3350_v50 = vcombine.low %v3334_v61, %v3335_v28  ;;  %v3351_v3 = vcombine.low %v3336_v42, %v3337_v44  ;;  %v3408_v7 = vmul.f32 %v9629_v23, %v3325_v15  ;;  %v3402_v9 = vmul.f32 %v9556_v51, %v3301_v24  ;;  %v8259_v61 = vld [vmem:[#allocation20 + $0x3bc] ss:$28 sps:$4 sm:$0xff]   ;;  %v8262_v28 = vld [vmem:[#allocation20 + $0x3c4] ss:$28 sps:$4 sm:$0xff]  }
 0x4ee   :  { %v3352_v10 = vcombine.low %v3338_v45, %v3339_v46  ;;  %v3353_v12 = vcombine.low %v3340_v47, %v3341_v21  ;;  %v3401_v57 = vmul.f32 %v9552_v48, %v3297_v22  ;;  %v3404_v5 = vmul.f32 %v9558_v52, %v3309_v17  ;;  %v8257_v44 = vld [vmem:[#allocation20 + $0x3b8] ss:$28 sps:$4 sm:$0xff]   ;;  %v8260_v45 = vld [vmem:[#allocation20 + $0x3c0] ss:$28 sps:$4 sm:$0xff]   ;;  %v8263_v21 = vld [vmem:[#allocation20 + $0x3f0] ss:$28 sps:$4 sm:$0xff]  }
 0x4ef   :  { %v3360_v63 = vrot.slane %v3350_v50, %v9487_v58  ;;  %v3367_v8 = vrot.slane %v3351_v3, %v9487_v58  ;;  %v3406_v32 = vmul.f32 %v9624_v36, %v3317_v14  ;;  %v3405_v23 = vmul.f32 %v9620_v16, %v3313_v13  ;;  %v8251_v13 = vld [vmem:[#allocation20 + $0x380] ss:$28 sps:$4 sm:$0xff]   ;;  %v8254_v14 = vld [vmem:[#allocation20 + $0x388] ss:$28 sps:$4 sm:$0xff]   ;;  %v8265_v46 = vld [vmem:[#allocation20 + $0x3f4] ss:$28 sps:$4 sm:$0xff]  }
 0x4f0   :  { %v3374_v38 = vrot.slane %v3352_v10, %v9487_v58  ;;  %v3381_v41 = vrot.slane %v3353_v12, %v9487_v58  ;;  %v3407_v51 = vmul.f32 %v9622_v62, %v3321_v11  ;;  %v3403_v2 = vmul.f32 %v9554_v49, %v3305_v26  ;;  %v8268_v47 = vld [vmem:[#allocation20 + $0x3fc] ss:$28 sps:$4 sm:$0xff]   ;;  %v8271_v3 = vld [vmem:[#allocation20 + $0x42c] ss:$28 sps:$4 sm:$0xff]   ;;  %v8277_v12 = vld [vmem:[#allocation20 + $0x464] ss:$28 sps:$4 sm:$0xff]  }
 0x4f1   :  { %v3382_v18 = vcombine.low %v3360_v63, %v3367_v8  ;;  %v8266_v50 = vld [vmem:[#allocation20 + $0x3f8] ss:$28 sps:$4 sm:$0xff]   ;;  %v8272_v10 = vld [vmem:[#allocation20 + $0x430] ss:$28 sps:$4 sm:$0xff]   ;;  %v8278_v63 = vld [vmem:[#allocation20 + $0x468] ss:$28 sps:$4 sm:$0xff]  }
 0x4f2   :  { %v3383_v19 = vcombine.low %v3374_v38, %v3381_v41  ;;  %v8283_v8 = vld [vmem:[#allocation20 + $0x49c] ss:$28 sps:$4 sm:$0xff]  }
 0x4f3   :  { %v3390_v48 = vrot.slane %v3382_v18, %v9487_v58  ;;  %v8281_v38 = vld [vmem:[#allocation20 + $0x498] ss:$28 sps:$4 sm:$0xff]   ;;  %v8284_v41 = vld [vmem:[#allocation20 + $0x4a0] ss:$28 sps:$4 sm:$0xff]   ;;  %v8287_v18 = vld [vmem:[#allocation20 + $0x4d0] ss:$28 sps:$4 sm:$0xff]  }
 0x4f4   :  { %v3397_v52 = vrot.slane %v3383_v19, %v9487_v58  ;;  %v8290_v19 = vld [vmem:[#allocation20 + $0x4d8] ss:$28 sps:$4 sm:$0xff]  }
 0x4f6   :  { %v3398_v0 = vcombine.low %v3390_v48, %v3397_v52  ;;  %v8295_v48 = vld [vmem:[#allocation20 + $0x50c] ss:$28 sps:$4 sm:$0xff]   ;;  %v8298_v52 = vld [vmem:[#allocation20 + $0x514] ss:$28 sps:$4 sm:$0xff]  }
 0x4f8   :  { %v3400_v1 = vsub.f32 %v3073_v60, %v3398_v0  ;;  %v8293_v60 = vld [vmem:[#allocation20 + $0x508] ss:$28 sps:$4 sm:$0xff]   ;;  %v8296_v0 = vld [vmem:[#allocation20 + $0x510] ss:$28 sps:$4 sm:$0xff]  }
 0x4fa   :  { %v3441_v36 = vrot.slane %v3400_v1, %v9610_v59  ;;  %v3417_v20 = vrot.slane %v3400_v1, %v9432_v39  ;;  %v3413_v25 = vrot.slane %v3400_v1, %v9429_v37  ;;  %v3425_v16 = vrot.slane %v3400_v1, %v9456_v6 }
 0x4fb   :  { %v3421_v62 = vrot.slane %v3400_v1, %v9453_v4  ;;  %v3433_v53 = vrot.slane %v3400_v1, %v9607_v56  ;;  %v3429_v27 = vrot.slane %v3400_v1, %v9601_v55  ;;  %v3437_v58 = vrot.slane %v3400_v1, %v9604_v54  ;;  %v8301_v1 = vld [vmem:[#allocation20 + $0x544] ss:$28 sps:$4 sm:$0xff]  }
 0x4fc   :  { %v9685_v29 = vadd.f32 %v3441_v36, %v3408_v7  ;;  %v3451_v30 = vadd.f32 %v3417_v20, %v3402_v9  ;;  %v3450_v49 = vadd.f32 %v3413_v25, %v3401_v57  ;;  %v3453_v43 = vadd.f32 %v3425_v16, %v3404_v5  ;;  %v8274_v7 = vld [vmem:[#allocation20 + $0x434] ss:$28 sps:$4 sm:$0xff]   ;;  %v8269_v9 = vld [vmem:[#allocation20 + $0x428] ss:$28 sps:$4 sm:$0xff]   ;;  %v8275_v5 = vld [vmem:[#allocation20 + $0x460] ss:$28 sps:$4 sm:$0xff]  }
 0x4fd   :  { %v9687_v59 = vadd.f32 %v3421_v62, %v3403_v2  ;;  %v9689_v31 = vadd.f32 %v3433_v53, %v3406_v32  ;;  %v9691_v33 = vadd.f32 %v3429_v27, %v3405_v23  ;;  %v9693_v34 = vadd.f32 %v3437_v58, %v3407_v51  ;;  %v8280_v57 = vld [vmem:[#allocation20 + $0x46c] ss:$28 sps:$4 sm:$0xff]   ;;  %v8286_v32 = vld [vmem:[#allocation20 + $0x4a4] ss:$28 sps:$4 sm:$0xff]   ;;  %v8289_v23 = vld [vmem:[#allocation20 + $0x4d4] ss:$28 sps:$4 sm:$0xff]  }
 0x4fe   :  { %vm3459_vm6 = vcmp.gt.f32.partialorder %v3451_v30, 0.0  ;;  %v3467_v35 = vmul.f32 0.2, %v3451_v30  ;;  %vm3458_vm7 = vcmp.gt.f32.partialorder %v3450_v49, 0.0  ;;  %v3466_v40 = vmul.f32 0.2, %v3450_v49 }
 0x4ff   :  { %vm3461_vm8 = vcmp.gt.f32.partialorder %v3453_v43, 0.0  ;;  %v3469_v22 = vmul.f32 0.2, %v3453_v43  ;;  %v8292_v51 = vld [vmem:[#allocation20 + $0x4dc] ss:$28 sps:$4 sm:$0xff]   ;;  %vm3460_vm9 = vcmp.gt.f32.partialorder %v9687_v59, 0.0 }
 0x500   :  { %v3475_v24 = vsel %vm3459_vm6, %v3451_v30, %v3467_v35  ;;  %v3474_v26 = vsel %vm3458_vm7, %v3450_v49, %v3466_v40  ;;  %v8304_v2 = vld [vmem:[#allocation20 + $0x54c] ss:$28 sps:$4 sm:$0xff]   ;;  %v8299_v36 = vld [vmem:[#allocation20 + $0x540] ss:$28 sps:$4 sm:$0xff]   ;;  %v8305_v62 = vld [vmem:[#allocation20 + $0x578] ss:$28 sps:$4 sm:$0xff]  }
 0x501   :  { %v9695_v17 = vpack.c.bf16 %v3475_v24, %v3475_v24  ;;  %v9697_v11 = vpack.c.bf16 %v3474_v26, %v3474_v26  ;;  %v3477_v15 = vsel %vm3461_vm8, %v3453_v43, %v3469_v22  ;;  %v8302_v20 = vld [vmem:[#allocation20 + $0x548] ss:$28 sps:$4 sm:$0xff]   ;;  %v8307_v25 = vld [vmem:[#allocation20 + $0x57c] ss:$28 sps:$4 sm:$0xff]   ;;  %v8313_v27 = vld [vmem:[#allocation20 + $0x5b4] ss:$28 sps:$4 sm:$0xff]  }
 0x502   :  { %v9703_v42 = vpack.c.bf16 %v3477_v15, %v3477_v15  ;;  %v8310_v16 = vld [vmem:[#allocation20 + $0x584] ss:$28 sps:$4 sm:$0xff]   ;;  %v8316_v58 = vld [vmem:[#allocation20 + $0x5bc] ss:$28 sps:$4 sm:$0xff]   ;;  %v8311_v30 = vld [vmem:[#allocation20 + $0x5b0] ss:$28 sps:$4 sm:$0xff]  }
 0x503   :  { %6375 = vmatprep.mubr.bf16.mxu1 %v9695_v17  ;;  %6539 = vmatprep.mubr.bf16.mxu0 %v9695_v17  ;;  %v8308_v53 = vld [vmem:[#allocation20 + $0x580] ss:$28 sps:$4 sm:$0xff]   ;;  %v8314_v49 = vld [vmem:[#allocation20 + $0x5b8] ss:$28 sps:$4 sm:$0xff]   ;;  %v8319_v43 = vld [vmem:[#allocation20 + $0x5ec] ss:$28 sps:$4 sm:$0xff]  }
 0x504   :  { %6376 = vmatmul.mubr.bf16.vlgmr.msra.gmra.mrb[12].mxu1 %v9697_v11  ;;  %6540 = vmatmul.mubr.bf16.vlgmr.msra.gmra.mrb[16].mxu0 %v9697_v11  ;;  %v8322_v35 = vld [vmem:[#allocation20 + $0x5f4] ss:$28 sps:$4 sm:$0xff]   ;;  %v8317_v40 = vld [vmem:[#allocation20 + $0x5e8] ss:$28 sps:$4 sm:$0xff]   ;;  %v8331_v15 = vld [vmem:[#allocation20 + $0x65c] ss:$28 sps:$4 sm:$0xff]  }
 0x505   :  { %6385 = vmatpush1.bf16.msra.mxu1 %v8251_v13  ;;  %6549 = vmatpush1.bf16.msra.mxu0 %v8254_v14  ;;  %v8320_v22 = vld [vmem:[#allocation20 + $0x5f0] ss:$28 sps:$4 sm:$0xff]   ;;  %v8325_v24 = vld [vmem:[#allocation20 + $0x624] ss:$28 sps:$4 sm:$0xff]   ;;  %vm3463_vm10 = vcmp.gt.f32.partialorder %v9689_v31, 0.0  ;;  %vm3462_vm11 = vcmp.gt.f32.partialorder %v9691_v33, 0.0 }
 0x506   :  { %6416 = vmatprep.mubr.bf16.mxu1 %v9703_v42  ;;  %6580 = vmatprep.mubr.bf16.mxu0 %v9703_v42  ;;  %v8328_v26 = vld [vmem:[#allocation20 + $0x62c] ss:$28 sps:$4 sm:$0xff]   ;;  %v8323_v13 = vld [vmem:[#allocation20 + $0x620] ss:$28 sps:$4 sm:$0xff]   ;;  %vm3465_vm12 = vcmp.gt.f32.partialorder %v9685_v29, 0.0  ;;  %vm3464_vm13 = vcmp.gt.f32.partialorder %v9693_v34, 0.0 }
 0x507   :  { %6386 = vmatprep.subr.bf16.mxu1 %v8259_v61  ;;  %6550 = vmatprep.subr.bf16.mxu0 %v8262_v28  ;;  %v8326_v14 = vld [vmem:[#allocation20 + $0x628] ss:$28 sps:$4 sm:$0xff]   ;;  %v8329_v28 = vld [vmem:[#allocation20 + $0x658] ss:$28 sps:$4 sm:$0xff]  }
 0x508   :  { %v8334_v61 = vld [vmem:[#allocation20 + $0x664] ss:$28 sps:$4 sm:$0xff]  }
 0x509   :  { %6387 = vmatpush1.bf16.msra.mxu1 %v8257_v44  ;;  %6551 = vmatpush1.bf16.msra.mxu0 %v8260_v45  ;;  %v8332_v44 = vld [vmem:[#allocation20 + $0x660] ss:$28 sps:$4 sm:$0xff]   ;;  %v8337_v45 = vld [vmem:[#allocation20 + $0x694] ss:$28 sps:$4 sm:$0xff]  }
 0x50a   :  { %6388 = vmatprep.subr.bf16.mxu1 %v8265_v46  ;;  %6552 = vmatprep.subr.bf16.mxu0 %v8268_v47  ;;  %v8340_v46 = vld [vmem:[#allocation20 + $0x69c] ss:$28 sps:$4 sm:$0xff]   ;;  %v8335_v47 = vld [vmem:[#allocation20 + $0x690] ss:$28 sps:$4 sm:$0xff]  }
 0x50d   :  { %6389 = vmatpush1.bf16.msra.mxu1 %v8263_v21  ;;  %6553 = vmatpush1.bf16.msra.mxu0 %v8266_v50  ;;  %v8338_v21 = vld [vmem:[#allocation20 + $0x698] ss:$28 sps:$4 sm:$0xff]   ;;  %v8343_v50 = vld [vmem:[#allocation20 + $0x6cc] ss:$28 sps:$4 sm:$0xff]  }
 0x50e   :  { %6390 = vmatprep.subr.bf16.mxu1 %v8271_v3  ;;  %6554 = vmatprep.subr.bf16.mxu0 %v8274_v7  ;;  %v8346_v3 = vld [vmem:[#allocation20 + $0x6d4] ss:$28 sps:$4 sm:$0xff]   ;;  %v3468_v7 = vmul.f32 0.2, %v9687_v59 }
 0x511   :  { %6391 = vmatpush1.bf16.msra.mxu1 %v8269_v9  ;;  %6555 = vmatpush1.bf16.msra.mxu0 %v8272_v10  ;;  %v3471_v9 = vmul.f32 0.2, %v9689_v31  ;;  %v8341_v10 = vld [vmem:[#allocation20 + $0x6c8] ss:$28 sps:$4 sm:$0xff]  }
 0x512   :  { %6392 = vmatprep.subr.bf16.mxu1 %v8277_v12  ;;  %6556 = vmatprep.subr.bf16.mxu0 %v8280_v57  ;;  %v8344_v12 = vld [vmem:[#allocation20 + $0x6d0] ss:$28 sps:$4 sm:$0xff]   ;;  %v8349_v57 = vld [vmem:[#allocation20 + $0x704] ss:$28 sps:$4 sm:$0xff]  }
 0x515   :  { %6393 = vmatpush1.bf16.msra.mxu1 %v8275_v5  ;;  %6557 = vmatpush1.bf16.msra.mxu0 %v8278_v63  ;;  %v8352_v5 = vld [vmem:[#allocation20 + $0x70c] ss:$28 sps:$4 sm:$0xff]   ;;  %v3476_v63 = vsel %vm3460_vm9, %v9687_v59, %v3468_v7  ;;  %v8353_v59 = vld [vmem:[#allocation20 + $0x738] ss:$28 sps:$4 sm:$0xff]  }
 0x516   :  { %6394 = vmatprep.subr.bf16.mxu1 %v8283_v8  ;;  %6558 = vmatprep.subr.bf16.mxu0 %v8286_v32  ;;  %v3479_v8 = vsel %vm3463_vm10, %v9689_v31, %v3471_v9  ;;  %v8347_v32 = vld [vmem:[#allocation20 + $0x700] ss:$28 sps:$4 sm:$0xff]   ;;  %v8410_v7 = vld [vmem:[#allocation20 + $0x938] ss:$28 sps:$4 sm:$0xff]   ;;  %v8415_v9 = vld [vmem:[#allocation20 + $0x96c] ss:$28 sps:$4 sm:$0xff]  }
 0x517   :  { %v8356_v31 = vld [vmem:[#allocation20 + $0x740] ss:$28 sps:$4 sm:$0xff]  }
 0x519   :  { %6395 = vmatpush1.bf16.msra.mxu1 %v8281_v38  ;;  %6559 = vmatpush1.bf16.msra.mxu0 %v8284_v41  ;;  %v9713_v38 = vpack.c.bf16 %v3476_v63, %v3476_v63  ;;  %v8350_v41 = vld [vmem:[#allocation20 + $0x708] ss:$28 sps:$4 sm:$0xff]  }
 0x51a   :  { %6396 = vmatprep.subr.bf16.mxu1 %v8289_v23  ;;  %6560 = vmatprep.subr.bf16.mxu0 %v8292_v51  ;;  %v9715_v23 = vpack.c.bf16 %v3479_v8, %v3479_v8  ;;  %v8355_v51 = vld [vmem:[#allocation20 + $0x73c] ss:$28 sps:$4 sm:$0xff]   ;;  %v8424_v63 = vld [vmem:[#allocation20 + $0x9ac] ss:$28 sps:$4 sm:$0xff]  }
 0x51b   :  { %v8419_v8 = vld [vmem:[#allocation20 + $0x9a0] ss:$28 sps:$4 sm:$0xff]  }
 0x51d   :  { %6397 = vmatpush1.bf16.msra.mxu1 %v8287_v18  ;;  %6561 = vmatpush1.bf16.msra.mxu0 %v8290_v19  ;;  %v8358_v18 = vld [vmem:[#allocation20 + $0x744] ss:$28 sps:$4 sm:$0xff]   ;;  %v8361_v19 = vld [vmem:[#allocation20 + $0x774] ss:$28 sps:$4 sm:$0xff]  }
 0x51e   :  { %6398 = vmatprep.subr.bf16.mxu1 %v8295_v48  ;;  %6562 = vmatprep.subr.bf16.mxu0 %v8298_v52  ;;  %v8364_v48 = vld [vmem:[#allocation20 + $0x77c] ss:$28 sps:$4 sm:$0xff]   ;;  %v8359_v52 = vld [vmem:[#allocation20 + $0x770] ss:$28 sps:$4 sm:$0xff]  }
 0x521   :  { %6399 = vmatpush1.bf16.msra.mxu1 %v8293_v60  ;;  %6563 = vmatpush1.bf16.msra.mxu0 %v8296_v0  ;;  %v8362_v60 = vld [vmem:[#allocation20 + $0x778] ss:$28 sps:$4 sm:$0xff]   ;;  %v8367_v0 = vld [vmem:[#allocation20 + $0x7ac] ss:$28 sps:$4 sm:$0xff]  }
 0x522   :  { %6400 = vmatprep.subr.bf16.mxu1 %v8301_v1  ;;  %6564 = vmatprep.subr.bf16.mxu0 %v8304_v2  ;;  %v8370_v1 = vld [vmem:[#allocation20 + $0x7b4] ss:$28 sps:$4 sm:$0xff]   ;;  %v8365_v2 = vld [vmem:[#allocation20 + $0x7a8] ss:$28 sps:$4 sm:$0xff]  }
 0x525   :  { %6401 = vmatpush1.bf16.msra.mxu1 %v8299_v36  ;;  %6565 = vmatpush1.bf16.msra.mxu0 %v8302_v20  ;;  %v8368_v36 = vld [vmem:[#allocation20 + $0x7b0] ss:$28 sps:$4 sm:$0xff]   ;;  %v8373_v20 = vld [vmem:[#allocation20 + $0x7e4] ss:$28 sps:$4 sm:$0xff]  }
 0x526   :  { %6402 = vmatprep.subr.bf16.mxu1 %v8307_v25  ;;  %6566 = vmatprep.subr.bf16.mxu0 %v8310_v16  ;;  %v8376_v25 = vld [vmem:[#allocation20 + $0x7ec] ss:$28 sps:$4 sm:$0xff]   ;;  %v8371_v16 = vld [vmem:[#allocation20 + $0x7e0] ss:$28 sps:$4 sm:$0xff]  }
 0x529   :  { %6403 = vmatpush1.bf16.msra.mxu1 %v8305_v62  ;;  %6567 = vmatpush1.bf16.msra.mxu0 %v8308_v53  ;;  %v8374_v62 = vld [vmem:[#allocation20 + $0x7e8] ss:$28 sps:$4 sm:$0xff]   ;;  %v8379_v53 = vld [vmem:[#allocation20 + $0x81c] ss:$28 sps:$4 sm:$0xff]  }
 0x52a   :  { %6404 = vmatprep.subr.bf16.mxu1 %v8313_v27  ;;  %6568 = vmatprep.subr.bf16.mxu0 %v8316_v58  ;;  %v8382_v27 = vld [vmem:[#allocation20 + $0x824] ss:$28 sps:$4 sm:$0xff]   ;;  %v8377_v58 = vld [vmem:[#allocation20 + $0x818] ss:$28 sps:$4 sm:$0xff]  }
 0x52d   :  { %6405 = vmatpush1.bf16.msra.mxu1 %v8311_v30  ;;  %6569 = vmatpush1.bf16.msra.mxu0 %v8314_v49  ;;  %v8380_v30 = vld [vmem:[#allocation20 + $0x820] ss:$28 sps:$4 sm:$0xff]   ;;  %v8385_v49 = vld [vmem:[#allocation20 + $0x854] ss:$28 sps:$4 sm:$0xff]  }
 0x52e   :  { %6406 = vmatprep.subr.bf16.mxu1 %v8319_v43  ;;  %6570 = vmatprep.subr.bf16.mxu0 %v8322_v35  ;;  %v8388_v43 = vld [vmem:[#allocation20 + $0x85c] ss:$28 sps:$4 sm:$0xff]   ;;  %v8383_v35 = vld [vmem:[#allocation20 + $0x850] ss:$28 sps:$4 sm:$0xff]  }
 0x531   :  { %6407 = vmatpush1.bf16.msra.mxu1 %v8317_v40  ;;  %6571 = vmatpush1.bf16.msra.mxu0 %v8320_v22  ;;  %v8386_v40 = vld [vmem:[#allocation20 + $0x858] ss:$28 sps:$4 sm:$0xff]   ;;  %v8391_v22 = vld [vmem:[#allocation20 + $0x88c] ss:$28 sps:$4 sm:$0xff]  }
 0x532   :  { %6408 = vmatprep.subr.bf16.mxu1 %v8325_v24  ;;  %6572 = vmatprep.subr.bf16.mxu0 %v8328_v26  ;;  %v8394_v24 = vld [vmem:[#allocation20 + $0x894] ss:$28 sps:$4 sm:$0xff]   ;;  %v8389_v26 = vld [vmem:[#allocation20 + $0x888] ss:$28 sps:$4 sm:$0xff]  }
 0x535   :  { %6409 = vmatpush1.bf16.msra.mxu1 %v8323_v13  ;;  %6573 = vmatpush1.bf16.msra.mxu0 %v8326_v14  ;;  %v8392_v13 = vld [vmem:[#allocation20 + $0x890] ss:$28 sps:$4 sm:$0xff]   ;;  %v8397_v14 = vld [vmem:[#allocation20 + $0x8c4] ss:$28 sps:$4 sm:$0xff]  }
 0x536   :  { %6410 = vmatprep.subr.bf16.mxu1 %v8331_v15  ;;  %6574 = vmatprep.subr.bf16.mxu0 %v8334_v61  ;;  %v8400_v15 = vld [vmem:[#allocation20 + $0x8cc] ss:$28 sps:$4 sm:$0xff]   ;;  %v8395_v61 = vld [vmem:[#allocation20 + $0x8c0] ss:$28 sps:$4 sm:$0xff]  }
 0x539   :  { %6411 = vmatpush1.bf16.msra.mxu1 %v8329_v28  ;;  %6575 = vmatpush1.bf16.msra.mxu0 %v8332_v44  ;;  %v8398_v28 = vld [vmem:[#allocation20 + $0x8c8] ss:$28 sps:$4 sm:$0xff]   ;;  %v8403_v44 = vld [vmem:[#allocation20 + $0x8fc] ss:$28 sps:$4 sm:$0xff]  }
 0x53a   :  { %6412 = vmatprep.subr.bf16.mxu1 %v8337_v45  ;;  %6576 = vmatprep.subr.bf16.mxu0 %v8340_v46  ;;  %v8406_v45 = vld [vmem:[#allocation20 + $0x904] ss:$28 sps:$4 sm:$0xff]   ;;  %v8401_v46 = vld [vmem:[#allocation20 + $0x8f8] ss:$28 sps:$4 sm:$0xff]  }
 0x53d   :  { %6413 = vmatpush1.bf16.msra.mxu1 %v8335_v47  ;;  %6577 = vmatpush1.bf16.msra.mxu0 %v8338_v21  ;;  %v8404_v47 = vld [vmem:[#allocation20 + $0x900] ss:$28 sps:$4 sm:$0xff]   ;;  %v8409_v21 = vld [vmem:[#allocation20 + $0x934] ss:$28 sps:$4 sm:$0xff]  }
 0x53e   :  { %6414 = vmatprep.subr.bf16.mxu1 %v8343_v50  ;;  %6578 = vmatprep.subr.bf16.mxu0 %v8346_v3  ;;  %v8412_v50 = vld [vmem:[#allocation20 + $0x93c] ss:$28 sps:$4 sm:$0xff]   ;;  %v8407_v3 = vld [vmem:[#allocation20 + $0x930] ss:$28 sps:$4 sm:$0xff]  }
 0x541   :  { %6415 = vmatpush1.bf16.msra.mxu1 %v8341_v10  ;;  %6579 = vmatpush1.bf16.msra.mxu0 %v8344_v12  ;;  %v8418_v10 = vld [vmem:[#allocation20 + $0x974] ss:$28 sps:$4 sm:$0xff]   ;;  %v8413_v12 = vld [vmem:[#allocation20 + $0x968] ss:$28 sps:$4 sm:$0xff]  }
 0x542   :  { %6425 = vmatprep.subr.bf16.mxu1 %v8349_v57  ;;  %6589 = vmatprep.subr.bf16.mxu0 %v8352_v5  ;;  %v8416_v57 = vld [vmem:[#allocation20 + $0x970] ss:$28 sps:$4 sm:$0xff]   ;;  %v8421_v5 = vld [vmem:[#allocation20 + $0x9a4] ss:$28 sps:$4 sm:$0xff]  }
 0x544   :  { %6417 = vmatmul.mubr.bf16.vlgmr.msra.gmra.mrb[12].mxu1 %v9713_v38  ;;  %6581 = vmatmul.mubr.bf16.vlgmr.msra.gmra.mrb[16].mxu0 %v9713_v38 }
 0x545   :  { %6426 = vmatpush1.bf16.msra.mxu1 %v8347_v32  ;;  %6457 = vmatprep.mubr.bf16.mxu1 %v9715_v23  ;;  %v8422_v32 = vld [vmem:[#allocation20 + $0x9a8] ss:$28 sps:$4 sm:$0xff]  }
 0x546   :  { %6590 = vmatpush1.bf16.msra.mxu0 %v8350_v41  ;;  %6621 = vmatprep.mubr.bf16.mxu0 %v9715_v23  ;;  %v8427_v41 = vld [vmem:[#allocation20 + $0x9dc] ss:$28 sps:$4 sm:$0xff]  }
 0x547   :  { %6427 = vmatprep.subr.bf16.mxu1 %v8355_v51  ;;  %6591 = vmatprep.subr.bf16.mxu0 %v8358_v18  ;;  %v8430_v51 = vld [vmem:[#allocation20 + $0x9e4] ss:$28 sps:$4 sm:$0xff]   ;;  %v8425_v18 = vld [vmem:[#allocation20 + $0x9d8] ss:$28 sps:$4 sm:$0xff]  }
 0x549   :  { %6428 = vmatpush1.bf16.msra.mxu1 %v8353_v59  ;;  %v8428_v59 = vld [vmem:[#allocation20 + $0x9e0] ss:$28 sps:$4 sm:$0xff]  }
 0x54a   :  { %6592 = vmatpush1.bf16.msra.mxu0 %v8356_v31  ;;  %6429 = vmatprep.subr.bf16.mxu1 %v8361_v19  ;;  %v8433_v31 = vld [vmem:[#allocation20 + $0xa14] ss:$28 sps:$4 sm:$0xff]   ;;  %v8436_v19 = vld [vmem:[#allocation20 + $0xa1c] ss:$28 sps:$4 sm:$0xff]  }
 0x54b   :  { %6593 = vmatprep.subr.bf16.mxu0 %v8364_v48  ;;  %v8431_v48 = vld [vmem:[#allocation20 + $0xa10] ss:$28 sps:$4 sm:$0xff]  }
 0x54d   :  { %6430 = vmatpush1.bf16.msra.mxu1 %v8359_v52  ;;  %v8434_v52 = vld [vmem:[#allocation20 + $0xa18] ss:$28 sps:$4 sm:$0xff]  }
 0x54e   :  { %6594 = vmatpush1.bf16.msra.mxu0 %v8362_v60  ;;  %6431 = vmatprep.subr.bf16.mxu1 %v8367_v0  ;;  %v8439_v60 = vld [vmem:[#allocation20 + $0xa4c] ss:$28 sps:$4 sm:$0xff]   ;;  %v8442_v0 = vld [vmem:[#allocation20 + $0xa54] ss:$28 sps:$4 sm:$0xff]  }
 0x54f   :  { %6595 = vmatprep.subr.bf16.mxu0 %v8370_v1  ;;  %v3470_v1 = vmul.f32 0.2, %v9691_v33 }
 0x551   :  { %6432 = vmatpush1.bf16.msra.mxu1 %v8365_v2  ;;  %v8437_v2 = vld [vmem:[#allocation20 + $0xa48] ss:$28 sps:$4 sm:$0xff]  }
 0x552   :  { %6596 = vmatpush1.bf16.msra.mxu0 %v8368_v36  ;;  %6433 = vmatprep.subr.bf16.mxu1 %v8373_v20  ;;  %v3473_v36 = vmul.f32 0.2, %v9685_v29  ;;  %v8440_v20 = vld [vmem:[#allocation20 + $0xa50] ss:$28 sps:$4 sm:$0xff]  }
 0x553   :  { %6597 = vmatprep.subr.bf16.mxu0 %v8376_v25  ;;  %v8445_v25 = vld [vmem:[#allocation20 + $0xa84] ss:$28 sps:$4 sm:$0xff]  }
 0x555   :  { %6434 = vmatpush1.bf16.msra.mxu1 %v8371_v16  ;;  %v3478_v16 = vsel %vm3462_vm11, %v9691_v33, %v3470_v1  ;;  %v8449_v33 = vld [vmem:[#allocation20 + $0xab8] ss:$28 sps:$4 sm:$0xff]  }
 0x556   :  { %6598 = vmatpush1.bf16.msra.mxu0 %v8374_v62  ;;  %6435 = vmatprep.subr.bf16.mxu1 %v8379_v53  ;;  %v8448_v62 = vld [vmem:[#allocation20 + $0xa8c] ss:$28 sps:$4 sm:$0xff]   ;;  %v8443_v53 = vld [vmem:[#allocation20 + $0xa80] ss:$28 sps:$4 sm:$0xff]   ;;  %v8506_v1 = vld [vmem:[#allocation20 + $0xcb8] ss:$28 sps:$4 sm:$0xff]  }
 0x557   :  { %6599 = vmatprep.subr.bf16.mxu0 %v8382_v27  ;;  %v3481_v27 = vsel %vm3465_vm12, %v9685_v29, %v3473_v36  ;;  %v8452_v29 = vld [vmem:[#allocation20 + $0xac0] ss:$28 sps:$4 sm:$0xff]   ;;  %v8514_v36 = vld [vmem:[#allocation20 + $0xcf4] ss:$28 sps:$4 sm:$0xff]  }
 0x559   :  { %6436 = vmatpush1.bf16.msra.mxu1 %v8377_v58  ;;  %v9727_v58 = vpack.c.bf16 %v3478_v16, %v3478_v16  ;;  %v8517_v16 = vld [vmem:[#allocation20 + $0xd24] ss:$28 sps:$4 sm:$0xff]  }
 0x55a   :  { %6600 = vmatpush1.bf16.msra.mxu0 %v8380_v30  ;;  %6437 = vmatprep.subr.bf16.mxu1 %v8385_v49  ;;  %v8446_v30 = vld [vmem:[#allocation20 + $0xa88] ss:$28 sps:$4 sm:$0xff]   ;;  %v8451_v49 = vld [vmem:[#allocation20 + $0xabc] ss:$28 sps:$4 sm:$0xff]  }
 0x55b   :  { %6601 = vmatprep.subr.bf16.mxu0 %v8388_v43  ;;  %v9730_v43 = vpack.c.bf16 %v3481_v27, %v3481_v27  ;;  %v8518_v27 = vld [vmem:[#allocation20 + $0xd28] ss:$28 sps:$4 sm:$0xff]  }
 0x55d   :  { %6438 = vmatpush1.bf16.msra.mxu1 %v8383_v35  ;;  %v8454_v35 = vld [vmem:[#allocation20 + $0xac4] ss:$28 sps:$4 sm:$0xff]  }
 0x55e   :  { %6602 = vmatpush1.bf16.msra.mxu0 %v8386_v40  ;;  %6439 = vmatprep.subr.bf16.mxu1 %v8391_v22  ;;  %v8457_v40 = vld [vmem:[#allocation20 + $0xaf4] ss:$28 sps:$4 sm:$0xff]   ;;  %v8460_v22 = vld [vmem:[#allocation20 + $0xafc] ss:$28 sps:$4 sm:$0xff]  }
 0x55f   :  { %6603 = vmatprep.subr.bf16.mxu0 %v8394_v24  ;;  %v8455_v24 = vld [vmem:[#allocation20 + $0xaf0] ss:$28 sps:$4 sm:$0xff]  }
 0x561   :  { %6440 = vmatpush1.bf16.msra.mxu1 %v8389_v26  ;;  %v8458_v26 = vld [vmem:[#allocation20 + $0xaf8] ss:$28 sps:$4 sm:$0xff]  }
 0x562   :  { %6604 = vmatpush1.bf16.msra.mxu0 %v8392_v13  ;;  %6441 = vmatprep.subr.bf16.mxu1 %v8397_v14  ;;  %v8463_v13 = vld [vmem:[#allocation20 + $0xb2c] ss:$28 sps:$4 sm:$0xff]   ;;  %v8466_v14 = vld [vmem:[#allocation20 + $0xb34] ss:$28 sps:$4 sm:$0xff]  }
 0x563   :  { %6605 = vmatprep.subr.bf16.mxu0 %v8400_v15  ;;  %v8461_v15 = vld [vmem:[#allocation20 + $0xb28] ss:$28 sps:$4 sm:$0xff]  }
 0x565   :  { %6442 = vmatpush1.bf16.msra.mxu1 %v8395_v61  ;;  %v8464_v61 = vld [vmem:[#allocation20 + $0xb30] ss:$28 sps:$4 sm:$0xff]  }
 0x566   :  { %6606 = vmatpush1.bf16.msra.mxu0 %v8398_v28  ;;  %6443 = vmatprep.subr.bf16.mxu1 %v8403_v44  ;;  %v8469_v28 = vld [vmem:[#allocation20 + $0xb64] ss:$28 sps:$4 sm:$0xff]   ;;  %v8472_v44 = vld [vmem:[#allocation20 + $0xb6c] ss:$28 sps:$4 sm:$0xff]  }
 0x567   :  { %6607 = vmatprep.subr.bf16.mxu0 %v8406_v45  ;;  %v8467_v45 = vld [vmem:[#allocation20 + $0xb60] ss:$28 sps:$4 sm:$0xff]  }
 0x569   :  { %6444 = vmatpush1.bf16.msra.mxu1 %v8401_v46  ;;  %v8470_v46 = vld [vmem:[#allocation20 + $0xb68] ss:$28 sps:$4 sm:$0xff]  }
 0x56a   :  { %6608 = vmatpush1.bf16.msra.mxu0 %v8404_v47  ;;  %6445 = vmatprep.subr.bf16.mxu1 %v8409_v21  ;;  %v8475_v47 = vld [vmem:[#allocation20 + $0xb9c] ss:$28 sps:$4 sm:$0xff]   ;;  %v8478_v21 = vld [vmem:[#allocation20 + $0xba4] ss:$28 sps:$4 sm:$0xff]  }
 0x56b   :  { %6609 = vmatprep.subr.bf16.mxu0 %v8412_v50  ;;  %v8473_v50 = vld [vmem:[#allocation20 + $0xb98] ss:$28 sps:$4 sm:$0xff]  }
 0x56d   :  { %6446 = vmatpush1.bf16.msra.mxu1 %v8407_v3  ;;  %v8476_v3 = vld [vmem:[#allocation20 + $0xba0] ss:$28 sps:$4 sm:$0xff]  }
 0x56e   :  { %6610 = vmatpush1.bf16.msra.mxu0 %v8410_v7  ;;  %6447 = vmatprep.subr.bf16.mxu1 %v8415_v9  ;;  %v8481_v7 = vld [vmem:[#allocation20 + $0xbd4] ss:$28 sps:$4 sm:$0xff]   ;;  %v8484_v9 = vld [vmem:[#allocation20 + $0xbdc] ss:$28 sps:$4 sm:$0xff]  }
 0x56f   :  { %6611 = vmatprep.subr.bf16.mxu0 %v8418_v10  ;;  %v8479_v10 = vld [vmem:[#allocation20 + $0xbd0] ss:$28 sps:$4 sm:$0xff]  }
 0x571   :  { %6448 = vmatpush1.bf16.msra.mxu1 %v8413_v12  ;;  %v8482_v12 = vld [vmem:[#allocation20 + $0xbd8] ss:$28 sps:$4 sm:$0xff]  }
 0x572   :  { %6612 = vmatpush1.bf16.msra.mxu0 %v8416_v57  ;;  %6449 = vmatprep.subr.bf16.mxu1 %v8421_v5  ;;  %v8487_v57 = vld [vmem:[#allocation20 + $0xc0c] ss:$28 sps:$4 sm:$0xff]   ;;  %v8490_v5 = vld [vmem:[#allocation20 + $0xc14] ss:$28 sps:$4 sm:$0xff]  }
 0x573   :  { %6613 = vmatprep.subr.bf16.mxu0 %v8424_v63  ;;  %v8485_v63 = vld [vmem:[#allocation20 + $0xc08] ss:$28 sps:$4 sm:$0xff]  }
 0x575   :  { %6450 = vmatpush1.bf16.msra.mxu1 %v8419_v8  ;;  %v8488_v8 = vld [vmem:[#allocation20 + $0xc10] ss:$28 sps:$4 sm:$0xff]  }
 0x576   :  { %6614 = vmatpush1.bf16.msra.mxu0 %v8422_v32  ;;  %6451 = vmatprep.subr.bf16.mxu1 %v8427_v41  ;;  %v8493_v32 = vld [vmem:[#allocation20 + $0xc44] ss:$28 sps:$4 sm:$0xff]   ;;  %v8496_v41 = vld [vmem:[#allocation20 + $0xc4c] ss:$28 sps:$4 sm:$0xff]  }
 0x577   :  { %6615 = vmatprep.subr.bf16.mxu0 %v8430_v51  ;;  %v8491_v51 = vld [vmem:[#allocation20 + $0xc40] ss:$28 sps:$4 sm:$0xff]  }
 0x579   :  { %6452 = vmatpush1.bf16.msra.mxu1 %v8425_v18  ;;  %v8494_v18 = vld [vmem:[#allocation20 + $0xc48] ss:$28 sps:$4 sm:$0xff]  }
 0x57a   :  { %6616 = vmatpush1.bf16.msra.mxu0 %v8428_v59  ;;  %6453 = vmatprep.subr.bf16.mxu1 %v8433_v31  ;;  %v8499_v59 = vld [vmem:[#allocation20 + $0xc7c] ss:$28 sps:$4 sm:$0xff]   ;;  %v8502_v31 = vld [vmem:[#allocation20 + $0xc84] ss:$28 sps:$4 sm:$0xff]  }
 0x57b   :  { %6617 = vmatprep.subr.bf16.mxu0 %v8436_v19  ;;  %v8497_v19 = vld [vmem:[#allocation20 + $0xc78] ss:$28 sps:$4 sm:$0xff]  }
 0x57d   :  { %6454 = vmatpush1.bf16.msra.mxu1 %v8431_v48  ;;  %v8500_v48 = vld [vmem:[#allocation20 + $0xc80] ss:$28 sps:$4 sm:$0xff]  }
 0x57e   :  { %6618 = vmatpush1.bf16.msra.mxu0 %v8434_v52  ;;  %6455 = vmatprep.subr.bf16.mxu1 %v8439_v60  ;;  %v8505_v52 = vld [vmem:[#allocation20 + $0xcb4] ss:$28 sps:$4 sm:$0xff]   ;;  %v8508_v60 = vld [vmem:[#allocation20 + $0xcbc] ss:$28 sps:$4 sm:$0xff]  }
 0x57f   :  { %6619 = vmatprep.subr.bf16.mxu0 %v8442_v0  ;;  %v8503_v0 = vld [vmem:[#allocation20 + $0xcb0] ss:$28 sps:$4 sm:$0xff]  }
 0x581   :  { %6456 = vmatpush1.bf16.msra.mxu1 %v8437_v2  ;;  %v8511_v2 = vld [vmem:[#allocation20 + $0xcec] ss:$28 sps:$4 sm:$0xff]  }
 0x582   :  { %6620 = vmatpush1.bf16.msra.mxu0 %v8440_v20  ;;  %6466 = vmatprep.subr.bf16.mxu1 %v8445_v25  ;;  %v8509_v20 = vld [vmem:[#allocation20 + $0xce8] ss:$28 sps:$4 sm:$0xff]   ;;  %v8512_v25 = vld [vmem:[#allocation20 + $0xcf0] ss:$28 sps:$4 sm:$0xff]  }
 0x583   :  { %6630 = vmatprep.subr.bf16.mxu0 %v8448_v62  ;;  %v8520_v62 = vld [vmem:[#allocation20 + $0xd2c] ss:$28 sps:$4 sm:$0xff]  }
 0x584   :  { %6458 = vmatmul.mubr.bf16.vlgmr.msra.gmra.mrb[12].mxu1 %v9727_v58 }
 0x585   :  { %6622 = vmatmul.mubr.bf16.vlgmr.msra.gmra.mrb[16].mxu0 %v9727_v58  ;;  %6467 = vmatpush1.bf16.msra.mxu1 %v8443_v53  ;;  %v8515_v53 = vld [vmem:[#allocation20 + $0xd20] ss:$28 sps:$4 sm:$0xff]  }
 0x586   :  { %6498 = vmatprep.mubr.bf16.mxu1 %v9730_v43  ;;  %6631 = vmatpush1.bf16.msra.mxu0 %v8446_v30  ;;  %v8523_v30 = vld [vmem:[#allocation20 + $0xd5c] ss:$28 sps:$4 sm:$0xff]  }
 0x587   :  { %6662 = vmatprep.mubr.bf16.mxu0 %v9730_v43  ;;  %6468 = vmatprep.subr.bf16.mxu1 %v8451_v49  ;;  %v8526_v49 = vld [vmem:[#allocation20 + $0xd64] ss:$28 sps:$4 sm:$0xff]  }
 0x588   :  { %6632 = vmatprep.subr.bf16.mxu0 %v8454_v35  ;;  %v8521_v35 = vld [vmem:[#allocation20 + $0xd58] ss:$28 sps:$4 sm:$0xff]  }
 0x589   :  { %6469 = vmatpush1.bf16.msra.mxu1 %v8449_v33  ;;  %v8524_v33 = vld [vmem:[#allocation20 + $0xd60] ss:$28 sps:$4 sm:$0xff]  }
 0x58a   :  { %6633 = vmatpush1.bf16.msra.mxu0 %v8452_v29  ;;  %6470 = vmatprep.subr.bf16.mxu1 %v8457_v40  ;;  %v8529_v29 = vld [vmem:[#allocation20 + $0xd94] ss:$28 sps:$4 sm:$0xff]   ;;  %v8532_v40 = vld [vmem:[#allocation20 + $0xd9c] ss:$28 sps:$4 sm:$0xff]  }
 0x58b   :  { %6634 = vmatprep.subr.bf16.mxu0 %v8460_v22  ;;  %v8527_v22 = vld [vmem:[#allocation20 + $0xd90] ss:$28 sps:$4 sm:$0xff]  }
 0x58d   :  { %6471 = vmatpush1.bf16.msra.mxu1 %v8455_v24  ;;  %v8530_v24 = vld [vmem:[#allocation20 + $0xd98] ss:$28 sps:$4 sm:$0xff]  }
 0x58e   :  { %6635 = vmatpush1.bf16.msra.mxu0 %v8458_v26  ;;  %6472 = vmatprep.subr.bf16.mxu1 %v8463_v13  ;;  %v8535_v26 = vld [vmem:[#allocation20 + $0xdcc] ss:$28 sps:$4 sm:$0xff]   ;;  %v8538_v13 = vld [vmem:[#allocation20 + $0xdd4] ss:$28 sps:$4 sm:$0xff]  }
 0x58f   :  { %6636 = vmatprep.subr.bf16.mxu0 %v8466_v14  ;;  %v3472_v14 = vmul.f32 0.2, %v9693_v34 }
 0x591   :  { %6473 = vmatpush1.bf16.msra.mxu1 %v8461_v15  ;;  %v8533_v15 = vld [vmem:[#allocation20 + $0xdc8] ss:$28 sps:$4 sm:$0xff]  }
 0x592   :  { %6637 = vmatpush1.bf16.msra.mxu0 %v8464_v61  ;;  %6474 = vmatprep.subr.bf16.mxu1 %v8469_v28  ;;  %v8536_v61 = vld [vmem:[#allocation20 + $0xdd0] ss:$28 sps:$4 sm:$0xff]  }
 0x593   :  { %6638 = vmatprep.subr.bf16.mxu0 %v8472_v44  ;;  %v8541_v28 = vld [vmem:[#allocation20 + $0x14] ss:$28 sps:$4 sm:$0xff]   ;;  %v3480_v44 = vsel %vm3464_vm13, %v9693_v34, %v3472_v14 }
 0x594   :  { %v8548_v34 = vld [vmem:[#allocation20 + $0x50] ss:$28 sps:$4 sm:$0xff]   ;;  %v8594_v14 = vld [vmem:[#allocation20 + $0x278] ss:$28 sps:$4 sm:$0xff]  }
 0x595   :  { %6475 = vmatpush1.bf16.msra.mxu1 %v8467_v45  ;;  %v8542_v45 = vld [vmem:[#allocation20 + $0x1d8] ss:$28 sps:$4 sm:$0xff]  }
 0x596   :  { %6639 = vmatpush1.bf16.msra.mxu0 %v8470_v46  ;;  %6476 = vmatprep.subr.bf16.mxu1 %v8475_v47  ;;  %v8539_v46 = vld [vmem:[#allocation20 + $0x10] ss:$28 sps:$4 sm:$0xff]   ;;  %v9738_v47 = vpack.c.bf16 %v3480_v44, %v3480_v44 }
 0x597   :  { %6640 = vmatprep.subr.bf16.mxu0 %v8478_v21  ;;  %v8543_v21 = vld [vmem:[#allocation20 + $0x18] ss:$28 sps:$4 sm:$0xff]   ;;  %v8599_v44 = vld [vmem:[#allocation20 + $0x2b0] ss:$28 sps:$4 sm:$0xff]  }
 0x599   :  { %6477 = vmatpush1.bf16.msra.mxu1 %v8473_v50  ;;  %v8546_v50 = vld [vmem:[#allocation20 + $0x4c] ss:$28 sps:$4 sm:$0xff]  }
 0x59a   :  { %6641 = vmatpush1.bf16.msra.mxu0 %v8476_v3  ;;  %6478 = vmatprep.subr.bf16.mxu1 %v8481_v7  ;;  %v8547_v3 = vld [vmem:[#allocation20 + $0x210] ss:$28 sps:$4 sm:$0xff]   ;;  %v8544_v7 = vld [vmem:[#allocation20 + $0x48] ss:$28 sps:$4 sm:$0xff]  }
 0x59b   :  { %6642 = vmatprep.subr.bf16.mxu0 %v8484_v9  ;;  %v8551_v9 = vld [vmem:[#allocation20 + $0x84] ss:$28 sps:$4 sm:$0xff]  }
 0x59d   :  { %6479 = vmatpush1.bf16.msra.mxu1 %v8479_v10  ;;  %v8552_v10 = vld [vmem:[#allocation20 + $0x248] ss:$28 sps:$4 sm:$0xff]  }
 0x59e   :  { %6643 = vmatpush1.bf16.msra.mxu0 %v8482_v12  ;;  %6480 = vmatprep.subr.bf16.mxu1 %v8487_v57  ;;  %v8549_v12 = vld [vmem:[#allocation20 + $0x80] ss:$28 sps:$4 sm:$0xff]   ;;  %v8553_v57 = vld [vmem:[#allocation20 + $0x88] ss:$28 sps:$4 sm:$0xff]  }
 0x59f   :  { %6644 = vmatprep.subr.bf16.mxu0 %v8490_v5  ;;  %v8556_v5 = vld [vmem:[#allocation20 + $0xbc] ss:$28 sps:$4 sm:$0xff]  }
 0x5a1   :  { %6481 = vmatpush1.bf16.msra.mxu1 %v8485_v63  ;;  %v8557_v63 = vld [vmem:[#allocation20 + $0x280] ss:$28 sps:$4 sm:$0xff]  }
 0x5a2   :  { %6645 = vmatpush1.bf16.msra.mxu0 %v8488_v8  ;;  %6482 = vmatprep.subr.bf16.mxu1 %v8493_v32  ;;  %v8554_v8 = vld [vmem:[#allocation20 + $0xb8] ss:$28 sps:$4 sm:$0xff]   ;;  %v8558_v32 = vld [vmem:[#allocation20 + $0xc0] ss:$28 sps:$4 sm:$0xff]  }
 0x5a3   :  { %6646 = vmatprep.subr.bf16.mxu0 %v8496_v41  ;;  %v8561_v41 = vld [vmem:[#allocation20 + $0xf4] ss:$28 sps:$4 sm:$0xff]  }
 0x5a5   :  { %6483 = vmatpush1.bf16.msra.mxu1 %v8491_v51  ;;  %v8562_v51 = vld [vmem:[#allocation20 + $0x2b8] ss:$28 sps:$4 sm:$0xff]  }
 0x5a6   :  { %6647 = vmatpush1.bf16.msra.mxu0 %v8494_v18  ;;  %6484 = vmatprep.subr.bf16.mxu1 %v8499_v59  ;;  %v8563_v18 = vld [vmem:[#allocation20 + $0xf8] ss:$28 sps:$4 sm:$0xff]   ;;  %v8566_v59 = vld [vmem:[#allocation20 + $0x12c] ss:$28 sps:$4 sm:$0xff]  }
 0x5a7   :  { %6648 = vmatprep.subr.bf16.mxu0 %v8502_v31  ;;  %v8567_v31 = vld [vmem:[#allocation20 + $0x2f0] ss:$28 sps:$4 sm:$0xff]  }
 0x5a9   :  { %6485 = vmatpush1.bf16.msra.mxu1 %v8497_v19  ;;  %v8564_v19 = vld [vmem:[#allocation20 + $0x128] ss:$28 sps:$4 sm:$0xff]  }
 0x5aa   :  { %6649 = vmatpush1.bf16.msra.mxu0 %v8500_v48  ;;  %6486 = vmatprep.subr.bf16.mxu1 %v8505_v52  ;;  %v8568_v48 = vld [vmem:[#allocation20 + $0x130] ss:$28 sps:$4 sm:$0xff]   ;;  %v8571_v52 = vld [vmem:[#allocation20 + $0x164] ss:$28 sps:$4 sm:$0xff]  }
 0x5ab   :  { %6650 = vmatprep.subr.bf16.mxu0 %v8508_v60  ;;  %v8572_v60 = vld [vmem:[#allocation20 + $0x328] ss:$28 sps:$4 sm:$0xff]  }
 0x5ad   :  { %6487 = vmatpush1.bf16.msra.mxu1 %v8503_v0  ;;  %v8569_v0 = vld [vmem:[#allocation20 + $0x160] ss:$28 sps:$4 sm:$0xff]  }
 0x5ae   :  { %6651 = vmatpush1.bf16.msra.mxu0 %v8506_v1  ;;  %6488 = vmatprep.subr.bf16.mxu1 %v8511_v2  ;;  %v8573_v1 = vld [vmem:[#allocation20 + $0x168] ss:$28 sps:$4 sm:$0xff]   ;;  %v8576_v2 = vld [vmem:[#allocation20 + $0x19c] ss:$28 sps:$4 sm:$0xff]  }
 0x5af   :  { %6652 = vmatprep.subr.bf16.mxu0 %v8514_v36  ;;  %v8577_v36 = vld [vmem:[#allocation20 + $0x360] ss:$28 sps:$4 sm:$0xff]  }
 0x5b1   :  { %6489 = vmatpush1.bf16.msra.mxu1 %v8509_v20  ;;  %v8574_v20 = vld [vmem:[#allocation20 + $0x198] ss:$28 sps:$4 sm:$0xff]  }
 0x5b2   :  { %6653 = vmatpush1.bf16.msra.mxu0 %v8512_v25  ;;  %6490 = vmatprep.subr.bf16.mxu1 %v8517_v16  ;;  %v8578_v25 = vld [vmem:[#allocation20 + $0x1a0] ss:$28 sps:$4 sm:$0xff]   ;;  %v8581_v16 = vld [vmem:[#allocation20 + $0x1d4] ss:$28 sps:$4 sm:$0xff]  }
 0x5b3   :  { %6654 = vmatprep.subr.bf16.mxu0 %v8520_v62  ;;  %v8582_v62 = vld [vmem:[#allocation20 + $0x558] ss:$28 sps:$4 sm:$0xff]  }
 0x5b5   :  { %6491 = vmatpush1.bf16.msra.mxu1 %v8515_v53  ;;  %v8579_v53 = vld [vmem:[#allocation20 + $0x1d0] ss:$28 sps:$4 sm:$0xff]  }
 0x5b6   :  { %6655 = vmatpush1.bf16.msra.mxu0 %v8518_v27  ;;  %6492 = vmatprep.subr.bf16.mxu1 %v8523_v30  ;;  %v8583_v27 = vld [vmem:[#allocation20 + $0x398] ss:$28 sps:$4 sm:$0xff]   ;;  %v8586_v30 = vld [vmem:[#allocation20 + $0x20c] ss:$28 sps:$4 sm:$0xff]  }
 0x5b7   :  { %6656 = vmatprep.subr.bf16.mxu0 %v8526_v49  ;;  %v8587_v49 = vld [vmem:[#allocation20 + $0x590] ss:$28 sps:$4 sm:$0xff]  }
 0x5b9   :  { %6493 = vmatpush1.bf16.msra.mxu1 %v8521_v35  ;;  %v8584_v35 = vld [vmem:[#allocation20 + $0x208] ss:$28 sps:$4 sm:$0xff]  }
 0x5ba   :  { %6657 = vmatpush1.bf16.msra.mxu0 %v8524_v33  ;;  %6494 = vmatprep.subr.bf16.mxu1 %v8529_v29  ;;  %v8588_v33 = vld [vmem:[#allocation20 + $0x3d0] ss:$28 sps:$4 sm:$0xff]   ;;  %v8591_v29 = vld [vmem:[#allocation20 + $0x244] ss:$28 sps:$4 sm:$0xff]  }
 0x5bb   :  { %6658 = vmatprep.subr.bf16.mxu0 %v8532_v40  ;;  %v8592_v40 = vld [vmem:[#allocation20 + $0x5c8] ss:$28 sps:$4 sm:$0xff]  }
 0x5bd   :  { %6495 = vmatpush1.bf16.msra.mxu1 %v8527_v22  ;;  %v8589_v22 = vld [vmem:[#allocation20 + $0x240] ss:$28 sps:$4 sm:$0xff]  }
 0x5be   :  { %6659 = vmatpush1.bf16.msra.mxu0 %v8530_v24  ;;  %6496 = vmatprep.subr.bf16.mxu1 %v8535_v26  ;;  %v8593_v24 = vld [vmem:[#allocation20 + $0x408] ss:$28 sps:$4 sm:$0xff]   ;;  %v8596_v26 = vld [vmem:[#allocation20 + $0x27c] ss:$28 sps:$4 sm:$0xff]  }
 0x5bf   :  { %6660 = vmatprep.subr.bf16.mxu0 %v8538_v13  ;;  %v8597_v13 = vld [vmem:[#allocation20 + $0x600] ss:$28 sps:$4 sm:$0xff]  }
 0x5c1   :  { %6497 = vmatpush1.bf16.msra.mxu1 %v8533_v15  ;;  %v8598_v15 = vld [vmem:[#allocation20 + $0x440] ss:$28 sps:$4 sm:$0xff]  }
 0x5c2   :  { %6661 = vmatpush1.bf16.msra.mxu0 %v8536_v61  ;;  %6671 = vmatprep.subr.bf16.mxu1 %v8541_v28  ;;  %v8601_v61 = vld [vmem:[#allocation20 + $0x2b4] ss:$28 sps:$4 sm:$0xff]  }
 0x5c3   :  { %7832 = vmatprep.subr.bf16.mxu0 %v8542_v45  ;;  %v8602_v28 = vld [vmem:[#allocation20 + $0x638] ss:$28 sps:$4 sm:$0xff]  }
 0x5c4   :  { %6499 = vmatmul.mubr.bf16.vlgmr.msra.gmra.mrb[12].mxu1 %v9738_v47  ;;  %v8603_v45 = vld [vmem:[#allocation20 + $0x478] ss:$28 sps:$4 sm:$0xff]  }
 0x5c5   :  { %6663 = vmatmul.mubr.bf16.vlgmr.msra.gmra.mrb[16].mxu0 %v9738_v47  ;;  %6672 = vmatpush1.bf16.msra.mxu1 %v8539_v46  ;;  %v8606_v46 = vld [vmem:[#allocation20 + $0x2ec] ss:$28 sps:$4 sm:$0xff]  }
 0x5c6   :  { %6703 = vmatprep.mubr.bf16.mxu1 %v9695_v17  ;;  %7833 = vmatpush3.bf16.msra.mxu0 %v8543_v21  ;;  %v8607_v21 = vld [vmem:[#allocation20 + $0x670] ss:$28 sps:$4 sm:$0xff]  }
 0x5c7   :  { %6867 = vmatprep.mubr.bf16.mxu0 %v9695_v17  ;;  %6673 = vmatprep.subr.bf16.mxu1 %v8546_v50  ;;  %v8559_v17 = vld [vmem:[#allocation20 + $0xf0] ss:$28 sps:$4 sm:$0xff]   ;;  %v8604_v50 = vld [vmem:[#allocation20 + $0x2e8] ss:$28 sps:$4 sm:$0xff]  }
 0x5c8   :  { %7834 = vmatprep.subr.bf16.mxu0 %v8547_v3  ;;  %v8608_v3 = vld [vmem:[#allocation20 + $0x4b0] ss:$28 sps:$4 sm:$0xff]  }
 0x5c9   :  { %6674 = vmatpush1.bf16.msra.mxu1 %v8544_v7  ;;  %v8611_v7 = vld [vmem:[#allocation20 + $0x324] ss:$28 sps:$4 sm:$0xff]  }
 0x5ca   :  { %7835 = vmatpush3.bf16.msra.mxu0 %v8548_v34  ;;  %6675 = vmatprep.subr.bf16.mxu1 %v8551_v9  ;;  %v8612_v34 = vld [vmem:[#allocation20 + $0x6a8] ss:$28 sps:$4 sm:$0xff]   ;;  %v8609_v9 = vld [vmem:[#allocation20 + $0x320] ss:$28 sps:$4 sm:$0xff]  }
 0x5cb   :  { %7836 = vmatprep.subr.bf16.mxu0 %v8552_v10  ;;  %v8613_v10 = vld [vmem:[#allocation20 + $0x4e8] ss:$28 sps:$4 sm:$0xff]  }
 0x5cd   :  { %6676 = vmatpush1.bf16.msra.mxu1 %v8549_v12  ;;  %v8616_v12 = vld [vmem:[#allocation20 + $0x35c] ss:$28 sps:$4 sm:$0xff]  }
 0x5ce   :  { %7837 = vmatpush3.bf16.msra.mxu0 %v8553_v57  ;;  %6677 = vmatprep.subr.bf16.mxu1 %v8556_v5  ;;  %v8617_v57 = vld [vmem:[#allocation20 + $0x6e0] ss:$28 sps:$4 sm:$0xff]   ;;  %v8614_v5 = vld [vmem:[#allocation20 + $0x358] ss:$28 sps:$4 sm:$0xff]  }
 0x5cf   :  { %7838 = vmatprep.subr.bf16.mxu0 %v8557_v63  ;;  %v8618_v63 = vld [vmem:[#allocation20 + $0x520] ss:$28 sps:$4 sm:$0xff]  }
 0x5d1   :  { %6678 = vmatpush1.bf16.msra.mxu1 %v8554_v8  ;;  %v8621_v8 = vld [vmem:[#allocation20 + $0x394] ss:$28 sps:$4 sm:$0xff]  }
 0x5d2   :  { %7839 = vmatpush3.bf16.msra.mxu0 %v8558_v32  ;;  %6679 = vmatprep.subr.bf16.mxu1 %v8561_v41  ;;  %v8622_v32 = vld [vmem:[#allocation20 + $0x8d8] ss:$28 sps:$4 sm:$0xff]   ;;  %v8619_v41 = vld [vmem:[#allocation20 + $0x390] ss:$28 sps:$4 sm:$0xff]  }
 0x5d3   :  { %7840 = vmatprep.subr.bf16.mxu0 %v8562_v51  ;;  %v8623_v51 = vld [vmem:[#allocation20 + $0x718] ss:$28 sps:$4 sm:$0xff]  }
 0x5d5   :  { %6680 = vmatpush1.bf16.msra.mxu1 %v8559_v17  ;;  %v8626_v17 = vld [vmem:[#allocation20 + $0x3cc] ss:$28 sps:$4 sm:$0xff]  }
 0x5d6   :  { %7841 = vmatpush3.bf16.msra.mxu0 %v8563_v18  ;;  %6681 = vmatprep.subr.bf16.mxu1 %v8566_v59  ;;  %v8627_v18 = vld [vmem:[#allocation20 + $0x910] ss:$28 sps:$4 sm:$0xff]   ;;  %v8624_v59 = vld [vmem:[#allocation20 + $0x3c8] ss:$28 sps:$4 sm:$0xff]  }
 0x5d7   :  { %7842 = vmatprep.subr.bf16.mxu0 %v8567_v31  ;;  %v8628_v31 = vld [vmem:[#allocation20 + $0x750] ss:$28 sps:$4 sm:$0xff]  }
 0x5d9   :  { %6682 = vmatpush1.bf16.msra.mxu1 %v8564_v19  ;;  %v8631_v19 = vld [vmem:[#allocation20 + $0x404] ss:$28 sps:$4 sm:$0xff]  }
 0x5da   :  { %7843 = vmatpush3.bf16.msra.mxu0 %v8568_v48  ;;  %6683 = vmatprep.subr.bf16.mxu1 %v8571_v52  ;;  %v8632_v48 = vld [vmem:[#allocation20 + $0x948] ss:$28 sps:$4 sm:$0xff]   ;;  %v8629_v52 = vld [vmem:[#allocation20 + $0x400] ss:$28 sps:$4 sm:$0xff]  }
 0x5db   :  { %7844 = vmatprep.subr.bf16.mxu0 %v8572_v60  ;;  %v8636_v60 = vld [vmem:[#allocation20 + $0x43c] ss:$28 sps:$4 sm:$0xff]  }
 0x5dd   :  { %6684 = vmatpush1.bf16.msra.mxu1 %v8569_v0  ;;  %v8637_v0 = vld [vmem:[#allocation20 + $0x980] ss:$28 sps:$4 sm:$0xff]  }
 0x5de   :  { %7845 = vmatpush3.bf16.msra.mxu0 %v8573_v1  ;;  %6685 = vmatprep.subr.bf16.mxu1 %v8576_v2  ;;  %v8634_v1 = vld [vmem:[#allocation20 + $0x438] ss:$28 sps:$4 sm:$0xff]  }
 0x5df   :  { %7846 = vmatprep.subr.bf16.mxu0 %v8577_v36  ;;  %v8641_v2 = vld [vmem:[#allocation20 + $0x474] ss:$28 sps:$4 sm:$0xff]  }
 0x5e0   :  { %v8642_v36 = vld [vmem:[#allocation20 + $0x9b8] ss:$28 sps:$4 sm:$0xff]  }
 0x5e1   :  { %6686 = vmatpush1.bf16.msra.mxu1 %v8574_v20  ;;  %v8639_v20 = vld [vmem:[#allocation20 + $0x470] ss:$28 sps:$4 sm:$0xff]  }
 0x5e2   :  { %7847 = vmatpush3.bf16.msra.mxu0 %v8578_v25  ;;  %6687 = vmatprep.subr.bf16.mxu1 %v8581_v16  ;;  %v8643_v25 = vld [vmem:[#allocation20 + $0x7f8] ss:$28 sps:$4 sm:$0xff]   ;;  %v8646_v16 = vld [vmem:[#allocation20 + $0x4ac] ss:$28 sps:$4 sm:$0xff]  }
 0x5e3   :  { %7854 = vmatprep.subr.bf16.mxu0 %v8582_v62  ;;  %v8647_v62 = vld [vmem:[#allocation20 + $0x9f0] ss:$28 sps:$4 sm:$0xff]  }
 0x5e5   :  { %6868 = vmatmul.mubr.bf16.vlgmr.msra.gmra.mrb[20].mxu0 %v9697_v11  ;;  %6688 = vmatpush1.bf16.msra.mxu1 %v8579_v53  ;;  %v8644_v53 = vld [vmem:[#allocation20 + $0x4a8] ss:$28 sps:$4 sm:$0xff]  }
 0x5e6   :  { %7855 = vmatpush3.bf16.msra.mxu0 %v8583_v27  ;;  %6907 = vmatprep.mubr.bf16.mxu0 %v9703_v42  ;;  %v8648_v27 = vld [vmem:[#allocation20 + $0x830] ss:$28 sps:$4 sm:$0xff]  }
 0x5e7   :  { %6689 = vmatprep.subr.bf16.mxu1 %v8586_v30  ;;  %7856 = vmatprep.subr.bf16.mxu0 %v8587_v49  ;;  %v8651_v30 = vld [vmem:[#allocation20 + $0x4e4] ss:$28 sps:$4 sm:$0xff]  }
 0x5e8   :  { %v8652_v49 = vld [vmem:[#allocation20 + $0xa28] ss:$28 sps:$4 sm:$0xff]  }
 0x5e9   :  { %6690 = vmatpush1.bf16.msra.mxu1 %v8584_v35  ;;  %v8649_v35 = vld [vmem:[#allocation20 + $0x4e0] ss:$28 sps:$4 sm:$0xff]  }
 0x5ea   :  { %7857 = vmatpush3.bf16.msra.mxu0 %v8588_v33  ;;  %6691 = vmatprep.subr.bf16.mxu1 %v8591_v29  ;;  %v8653_v33 = vld [vmem:[#allocation20 + $0x868] ss:$28 sps:$4 sm:$0xff]   ;;  %v8656_v29 = vld [vmem:[#allocation20 + $0x51c] ss:$28 sps:$4 sm:$0xff]  }
 0x5eb   :  { %7858 = vmatprep.subr.bf16.mxu0 %v8592_v40  ;;  %v8657_v40 = vld [vmem:[#allocation20 + $0xa60] ss:$28 sps:$4 sm:$0xff]  }
 0x5ed   :  { %6692 = vmatpush1.bf16.msra.mxu1 %v8589_v22  ;;  %v8654_v22 = vld [vmem:[#allocation20 + $0x518] ss:$28 sps:$4 sm:$0xff]  }
 0x5ee   :  { %7859 = vmatpush3.bf16.msra.mxu0 %v8593_v24  ;;  %6693 = vmatprep.subr.bf16.mxu1 %v8596_v26  ;;  %v8658_v24 = vld [vmem:[#allocation20 + $0x8a0] ss:$28 sps:$4 sm:$0xff]   ;;  %v8661_v26 = vld [vmem:[#allocation20 + $0x554] ss:$28 sps:$4 sm:$0xff]  }
 0x5ef   :  { %7860 = vmatprep.subr.bf16.mxu0 %v8597_v13  ;;  %v8662_v13 = vld [vmem:[#allocation20 + $0xc58] ss:$28 sps:$4 sm:$0xff]  }
 0x5f1   :  { %6694 = vmatpush1.bf16.msra.mxu1 %v8594_v14  ;;  %v8659_v14 = vld [vmem:[#allocation20 + $0x550] ss:$28 sps:$4 sm:$0xff]  }
 0x5f2   :  { %7861 = vmatpush3.bf16.msra.mxu0 %v8598_v15  ;;  %6695 = vmatprep.subr.bf16.mxu1 %v8601_v61  ;;  %v8663_v15 = vld [vmem:[#allocation20 + $0xa98] ss:$28 sps:$4 sm:$0xff]   ;;  %v8666_v61 = vld [vmem:[#allocation20 + $0x58c] ss:$28 sps:$4 sm:$0xff]  }
 0x5f3   :  { %7862 = vmatprep.subr.bf16.mxu0 %v8602_v28  ;;  %v8667_v28 = vld [vmem:[#allocation20 + $0xc90] ss:$28 sps:$4 sm:$0xff]  }
 0x5f5   :  { %6696 = vmatpush1.bf16.msra.mxu1 %v8599_v44  ;;  %v8664_v44 = vld [vmem:[#allocation20 + $0x588] ss:$28 sps:$4 sm:$0xff]  }
 0x5f6   :  { %7863 = vmatpush3.bf16.msra.mxu0 %v8603_v45  ;;  %6697 = vmatprep.subr.bf16.mxu1 %v8606_v46  ;;  %v8668_v45 = vld [vmem:[#allocation20 + $0xad0] ss:$28 sps:$4 sm:$0xff]   ;;  %v8671_v46 = vld [vmem:[#allocation20 + $0x5c4] ss:$28 sps:$4 sm:$0xff]  }
 0x5f7   :  { %7864 = vmatprep.subr.bf16.mxu0 %v8607_v21  ;;  %v8672_v21 = vld [vmem:[#allocation20 + $0xcc8] ss:$28 sps:$4 sm:$0xff]  }
 0x5f9   :  { %6698 = vmatpush1.bf16.msra.mxu1 %v8604_v50  ;;  %v8669_v50 = vld [vmem:[#allocation20 + $0x5c0] ss:$28 sps:$4 sm:$0xff]  }
 0x5fa   :  { %7865 = vmatpush3.bf16.msra.mxu0 %v8608_v3  ;;  %6699 = vmatprep.subr.bf16.mxu1 %v8611_v7  ;;  %v8673_v3 = vld [vmem:[#allocation20 + $0xb08] ss:$28 sps:$4 sm:$0xff]   ;;  %v8676_v7 = vld [vmem:[#allocation20 + $0x5fc] ss:$28 sps:$4 sm:$0xff]  }
 0x5fb   :  { %7866 = vmatprep.subr.bf16.mxu0 %v8612_v34  ;;  %v8677_v34 = vld [vmem:[#allocation20 + $0xd00] ss:$28 sps:$4 sm:$0xff]  }
 0x5fd   :  { %6700 = vmatpush1.bf16.msra.mxu1 %v8609_v9  ;;  %v8674_v9 = vld [vmem:[#allocation20 + $0x5f8] ss:$28 sps:$4 sm:$0xff]  }
 0x5fe   :  { %7867 = vmatpush3.bf16.msra.mxu0 %v8613_v10  ;;  %6701 = vmatprep.subr.bf16.mxu1 %v8616_v12  ;;  %v8678_v10 = vld [vmem:[#allocation20 + $0xb40] ss:$28 sps:$4 sm:$0xff]   ;;  %v8681_v12 = vld [vmem:[#allocation20 + $0x634] ss:$28 sps:$4 sm:$0xff]  }
 0x5ff   :  { %7868 = vmatprep.subr.bf16.mxu0 %v8617_v57  ;;  %v8682_v57 = vld [vmem:[#allocation20 + $0xd38] ss:$28 sps:$4 sm:$0xff]  }
 0x601   :  { %6702 = vmatpush1.bf16.msra.mxu1 %v8614_v5  ;;  %v8679_v5 = vld [vmem:[#allocation20 + $0x630] ss:$28 sps:$4 sm:$0xff]  }
 0x602   :  { %7869 = vmatpush3.bf16.msra.mxu0 %v8618_v63  ;;  %6712 = vmatprep.subr.bf16.mxu1 %v8621_v8  ;;  %v8683_v63 = vld [vmem:[#allocation20 + $0xb78] ss:$28 sps:$4 sm:$0xff]   ;;  %v8686_v8 = vld [vmem:[#allocation20 + $0x66c] ss:$28 sps:$4 sm:$0xff]  }
 0x603   :  { %7876 = vmatprep.subr.bf16.mxu0 %v8622_v32  ;;  %v8687_v32 = vld [vmem:[#allocation20 + $0xd70] ss:$28 sps:$4 sm:$0xff]  }
 0x604   :  { %6704 = vmatmul.mubr.bf16.vlgmr.msra.gmra.mrb[16].mxu1 %v9697_v11  ;;  %v8633_v11 = vld [vmem:[#allocation20 + $0x788] ss:$28 sps:$4 sm:$0xff]  }
 0x605   :  { %6908 = vmatmul.mubr.bf16.vlgmr.msra.gmra.mrb[24].mxu0 %v9713_v38  ;;  %6713 = vmatpush1.bf16.msra.mxu1 %v8619_v41  ;;  %v8684_v41 = vld [vmem:[#allocation20 + $0x668] ss:$28 sps:$4 sm:$0xff]  }
 0x606   :  { %6744 = vmatprep.mubr.bf16.mxu1 %v9703_v42  ;;  %7877 = vmatpush3.bf16.msra.mxu0 %v8623_v51  ;;  %v8638_v42 = vld [vmem:[#allocation20 + $0x7c0] ss:$28 sps:$4 sm:$0xff]   ;;  %v8688_v51 = vld [vmem:[#allocation20 + $0xbb0] ss:$28 sps:$4 sm:$0xff]  }
 0x607   :  { %6947 = vmatprep.mubr.bf16.mxu0 %v9715_v23  ;;  %6714 = vmatprep.subr.bf16.mxu1 %v8626_v17  ;;  %v8691_v17 = vld [vmem:[#allocation20 + $0x6a4] ss:$28 sps:$4 sm:$0xff]  }
 0x608   :  { %7878 = vmatprep.subr.bf16.mxu0 %v8627_v18  ;;  %v8692_v18 = vld [vmem:[#allocation20 + $0xda8] ss:$28 sps:$4 sm:$0xff]  }
 0x609   :  { %6715 = vmatpush1.bf16.msra.mxu1 %v8624_v59  ;;  %v8689_v59 = vld [vmem:[#allocation20 + $0x6a0] ss:$28 sps:$4 sm:$0xff]  }
 0x60a   :  { %7879 = vmatpush3.bf16.msra.mxu0 %v8628_v31  ;;  %6716 = vmatprep.subr.bf16.mxu1 %v8631_v19  ;;  %v8693_v31 = vld [vmem:[#allocation20 + $0xbe8] ss:$28 sps:$4 sm:$0xff]   ;;  %v8696_v19 = vld [vmem:[#allocation20 + $0x6dc] ss:$28 sps:$4 sm:$0xff]  }
 0x60b   :  { %7880 = vmatprep.subr.bf16.mxu0 %v8632_v48  ;;  %v8697_v48 = vld [vmem:[#allocation20 + $0xde0] ss:$28 sps:$4 sm:$0xff]  }
 0x60d   :  { %6717 = vmatpush1.bf16.msra.mxu1 %v8629_v52  ;;  %v8694_v52 = vld [vmem:[#allocation20 + $0x6d8] ss:$28 sps:$4 sm:$0xff]  }
 0x60e   :  { %7881 = vmatpush3.bf16.msra.mxu0 %v8633_v11  ;;  %6718 = vmatprep.subr.bf16.mxu1 %v8636_v60  ;;  %v8698_v11 = vld [vmem:[#allocation20 + $0xc20] ss:$28 sps:$4 sm:$0xff]   ;;  %v8701_v60 = vld [vmem:[#allocation20 + $0x714] ss:$28 sps:$4 sm:$0xff]  }
 0x60f   :  { %7882 = vmatprep.subr.bf16.mxu0 %v8637_v0  ;;  %v8699_v0 = vld [vmem:[#allocation20 + $0x710] ss:$28 sps:$4 sm:$0xff]  }
 0x611   :  { %6719 = vmatpush1.bf16.msra.mxu1 %v8634_v1  ;;  %v8704_v1 = vld [vmem:[#allocation20 + $0x74c] ss:$28 sps:$4 sm:$0xff]  }
 0x612   :  { %7883 = vmatpush3.bf16.msra.mxu0 %v8638_v42  ;;  %6720 = vmatprep.subr.bf16.mxu1 %v8641_v2  ;;  %v8702_v42 = vld [vmem:[#allocation20 + $0x748] ss:$28 sps:$4 sm:$0xff]  }
 0x613   :  { %7884 = vmatprep.subr.bf16.mxu0 %v8642_v36  ;;  %v8707_v2 = vld [vmem:[#allocation20 + $0x784] ss:$28 sps:$4 sm:$0xff]  }
 0x614   :  { %v8705_v36 = vld [vmem:[#allocation20 + $0x780] ss:$28 sps:$4 sm:$0xff]  }
 0x615   :  { %6721 = vmatpush1.bf16.msra.mxu1 %v8639_v20  ;;  %v8710_v20 = vld [vmem:[#allocation20 + $0x7bc] ss:$28 sps:$4 sm:$0xff]  }
 0x616   :  { %7885 = vmatpush3.bf16.msra.mxu0 %v8643_v25  ;;  %6722 = vmatprep.subr.bf16.mxu1 %v8646_v16  ;;  %v8708_v25 = vld [vmem:[#allocation20 + $0x7b8] ss:$28 sps:$4 sm:$0xff]  }
 0x617   :  { %7886 = vmatprep.subr.bf16.mxu0 %v8647_v62  ;;  %v8713_v16 = vld [vmem:[#allocation20 + $0x7f4] ss:$28 sps:$4 sm:$0xff]  }
 0x618   :  { %v8711_v62 = vld [vmem:[#allocation20 + $0x7f0] ss:$28 sps:$4 sm:$0xff]  }
 0x619   :  { %6723 = vmatpush1.bf16.msra.mxu1 %v8644_v53  ;;  %v8714_v53 = vld [vmem:[#allocation20 + $0x828] ss:$28 sps:$4 sm:$0xff]  }
 0x61a   :  { %7887 = vmatpush3.bf16.msra.mxu0 %v8648_v27  ;;  %6724 = vmatprep.subr.bf16.mxu1 %v8651_v30  ;;  %v8719_v27 = vld [vmem:[#allocation20 + $0x864] ss:$28 sps:$4 sm:$0xff]   ;;  %v8722_v30 = vld [vmem:[#allocation20 + $0x89c] ss:$28 sps:$4 sm:$0xff]  }
 0x61b   :  { %7888 = vmatprep.subr.bf16.mxu0 %v8652_v49  ;;  %v8720_v49 = vld [vmem:[#allocation20 + $0x898] ss:$28 sps:$4 sm:$0xff]  }
 0x61d   :  { %6725 = vmatpush1.bf16.msra.mxu1 %v8649_v35  ;;  %v8725_v35 = vld [vmem:[#allocation20 + $0x8d4] ss:$28 sps:$4 sm:$0xff]  }
 0x61e   :  { %7889 = vmatpush3.bf16.msra.mxu0 %v8653_v33  ;;  %6726 = vmatprep.subr.bf16.mxu1 %v8656_v29  ;;  %v8723_v33 = vld [vmem:[#allocation20 + $0x8d0] ss:$28 sps:$4 sm:$0xff]  }
 0x61f   :  { %7890 = vmatprep.subr.bf16.mxu0 %v8657_v40  ;;  %v8728_v29 = vld [vmem:[#allocation20 + $0x90c] ss:$28 sps:$4 sm:$0xff]  }
 0x620   :  { %v8726_v40 = vld [vmem:[#allocation20 + $0x908] ss:$28 sps:$4 sm:$0xff]  }
 0x621   :  { %6727 = vmatpush1.bf16.msra.mxu1 %v8654_v22  ;;  %v8731_v22 = vld [vmem:[#allocation20 + $0x944] ss:$28 sps:$4 sm:$0xff]  }
 0x622   :  { %7891 = vmatpush3.bf16.msra.mxu0 %v8658_v24  ;;  %6728 = vmatprep.subr.bf16.mxu1 %v8661_v26  ;;  %v8729_v24 = vld [vmem:[#allocation20 + $0x940] ss:$28 sps:$4 sm:$0xff]  }
 0x623   :  { %7898 = vmatprep.subr.bf16.mxu0 %v8662_v13  ;;  %v8734_v26 = vld [vmem:[#allocation20 + $0x97c] ss:$28 sps:$4 sm:$0xff]  }
 0x624   :  { %v8732_v13 = vld [vmem:[#allocation20 + $0x978] ss:$28 sps:$4 sm:$0xff]  }
 0x625   :  { %6948 = vmatmul.mubr.bf16.vlgmr.msra.gmra.mrb[28].mxu0 %v9727_v58  ;;  %6729 = vmatpush1.bf16.msra.mxu1 %v8659_v14  ;;  %v8737_v14 = vld [vmem:[#allocation20 + $0x9b4] ss:$28 sps:$4 sm:$0xff]  }
 0x626   :  { %7899 = vmatpush3.bf16.msra.mxu0 %v8663_v15  ;;  %6987 = vmatprep.mubr.bf16.mxu0 %v9730_v43  ;;  %v8735_v15 = vld [vmem:[#allocation20 + $0x9b0] ss:$28 sps:$4 sm:$0xff]  }
 0x627   :  { %6730 = vmatprep.subr.bf16.mxu1 %v8666_v61  ;;  %7900 = vmatprep.subr.bf16.mxu0 %v8667_v28  ;;  %v8740_v61 = vld [vmem:[#allocation20 + $0x9ec] ss:$28 sps:$4 sm:$0xff]  }
 0x628   :  { %v8738_v28 = vld [vmem:[#allocation20 + $0x9e8] ss:$28 sps:$4 sm:$0xff]  }
 0x629   :  { %6731 = vmatpush1.bf16.msra.mxu1 %v8664_v44  ;;  %v8743_v44 = vld [vmem:[#allocation20 + $0xa24] ss:$28 sps:$4 sm:$0xff]  }
 0x62a   :  { %7901 = vmatpush3.bf16.msra.mxu0 %v8668_v45  ;;  %6732 = vmatprep.subr.bf16.mxu1 %v8671_v46  ;;  %v8741_v45 = vld [vmem:[#allocation20 + $0xa20] ss:$28 sps:$4 sm:$0xff]  }
 0x62b   :  { %7902 = vmatprep.subr.bf16.mxu0 %v8672_v21  ;;  %v8746_v46 = vld [vmem:[#allocation20 + $0xa5c] ss:$28 sps:$4 sm:$0xff]  }
 0x62c   :  { %v8744_v21 = vld [vmem:[#allocation20 + $0xa58] ss:$28 sps:$4 sm:$0xff]  }
 0x62d   :  { %6733 = vmatpush1.bf16.msra.mxu1 %v8669_v50  ;;  %v8749_v50 = vld [vmem:[#allocation20 + $0xa94] ss:$28 sps:$4 sm:$0xff]  }
 0x62e   :  { %7903 = vmatpush3.bf16.msra.mxu0 %v8673_v3  ;;  %6734 = vmatprep.subr.bf16.mxu1 %v8676_v7  ;;  %v8747_v3 = vld [vmem:[#allocation20 + $0xa90] ss:$28 sps:$4 sm:$0xff]  }
 0x62f   :  { %7904 = vmatprep.subr.bf16.mxu0 %v8677_v34  ;;  %v8752_v7 = vld [vmem:[#allocation20 + $0xacc] ss:$28 sps:$4 sm:$0xff]  }
 0x630   :  { %v8750_v34 = vld [vmem:[#allocation20 + $0xac8] ss:$28 sps:$4 sm:$0xff]  }
 0x631   :  { %6735 = vmatpush1.bf16.msra.mxu1 %v8674_v9  ;;  %v8755_v9 = vld [vmem:[#allocation20 + $0xb04] ss:$28 sps:$4 sm:$0xff]  }
 0x632   :  { %7905 = vmatpush3.bf16.msra.mxu0 %v8678_v10  ;;  %6736 = vmatprep.subr.bf16.mxu1 %v8681_v12  ;;  %v8753_v10 = vld [vmem:[#allocation20 + $0xb00] ss:$28 sps:$4 sm:$0xff]  }
 0x633   :  { %7906 = vmatprep.subr.bf16.mxu0 %v8682_v57  ;;  %v8758_v12 = vld [vmem:[#allocation20 + $0xb3c] ss:$28 sps:$4 sm:$0xff]  }
 0x634   :  { %v8756_v57 = vld [vmem:[#allocation20 + $0xb38] ss:$28 sps:$4 sm:$0xff]  }
 0x635   :  { %6737 = vmatpush1.bf16.msra.mxu1 %v8679_v5  ;;  %v8761_v5 = vld [vmem:[#allocation20 + $0xb74] ss:$28 sps:$4 sm:$0xff]  }
 0x636   :  { %7907 = vmatpush3.bf16.msra.mxu0 %v8683_v63  ;;  %6738 = vmatprep.subr.bf16.mxu1 %v8686_v8  ;;  %v8759_v63 = vld [vmem:[#allocation20 + $0xb70] ss:$28 sps:$4 sm:$0xff]   ;;  %v9757_v8 = vld [vmem:[#allocation22] sm:$0xff] }
 0x637   :  { %7908 = vmatprep.subr.bf16.mxu0 %v8687_v32  ;;  %v4015_v32 = vrot.slane %v9757_v8, %v9453_v4 }
 0x639   :  { %6739 = vmatpush1.bf16.msra.mxu1 %v8684_v41  ;;  %v4011_v41 = vrot.slane %v9757_v8, %v9432_v39 }
 0x63a   :  { %7909 = vmatpush3.bf16.msra.mxu0 %v8688_v51  ;;  %6740 = vmatprep.subr.bf16.mxu1 %v8691_v17  ;;  %v8762_v51 = vld [vmem:[#allocation20 + $0xba8] ss:$28 sps:$4 sm:$0xff]   ;;  %v4019_v17 = vrot.slane %v9757_v8, %v9456_v6 }
 0x63b   :  { %7910 = vmatprep.subr.bf16.mxu0 %v8692_v18  ;;  %v8767_v18 = vld [vmem:[#allocation20 + $0xbe4] ss:$28 sps:$4 sm:$0xff]  }
 0x63d   :  { %6741 = vmatpush1.bf16.msra.mxu1 %v8689_v59 }
 0x63e   :  { %7911 = vmatpush3.bf16.msra.mxu0 %v8693_v31  ;;  %6742 = vmatprep.subr.bf16.mxu1 %v8696_v19 }
 0x63f   :  { %7912 = vmatprep.subr.bf16.mxu0 %v8697_v48 }
 0x641   :  { %6743 = vmatpush1.bf16.msra.mxu1 %v8694_v52 }
 0x642   :  { %7913 = vmatpush3.bf16.msra.mxu0 %v8698_v11  ;;  %6753 = vmatprep.subr.bf16.mxu1 %v8701_v60 }
 0x644   :  { %6745 = vmatmul.mubr.bf16.vlgmr.msra.gmra.mrb[16].mxu1 %v9713_v38  ;;  %v8716_v38 = vld [vmem:[#allocation20 + $0x82c] ss:$28 sps:$4 sm:$0xff]  }
 0x645   :  { %6988 = vmatmul.mubr.bf16.vlgmr.msra.gmra.mrb[32].mxu0 %v9738_v47  ;;  %6754 = vmatpush1.bf16.msra.mxu1 %v8699_v0  ;;  %v8765_v0 = vld [vmem:[#allocation20 + $0xbe0] ss:$28 sps:$4 sm:$0xff]  }
 0x646   :  { %6785 = vmatprep.mubr.bf16.mxu1 %v9715_v23  ;;  %6755 = vmatprep.subr.bf16.mxu1 %v8704_v1  ;;  %v8717_v23 = vld [vmem:[#allocation20 + $0x860] ss:$28 sps:$4 sm:$0xff]  }
 0x649   :  { %6756 = vmatpush1.bf16.msra.mxu1 %v8702_v42  ;;  %v8770_v42 = vld [vmem:[#allocation20 + $0xc1c] ss:$28 sps:$4 sm:$0xff]  }
 0x64a   :  { %6757 = vmatprep.subr.bf16.mxu1 %v8707_v2  ;;  %v8768_v2 = vld [vmem:[#allocation20 + $0xc18] ss:$28 sps:$4 sm:$0xff]  }
 0x64d   :  { %6758 = vmatpush1.bf16.msra.mxu1 %v8705_v36  ;;  %v8773_v36 = vld [vmem:[#allocation20 + $0xc54] ss:$28 sps:$4 sm:$0xff]  }
 0x64e   :  { %6759 = vmatprep.subr.bf16.mxu1 %v8710_v20  ;;  %v8771_v20 = vld [vmem:[#allocation20 + $0xc50] ss:$28 sps:$4 sm:$0xff]  }
 0x651   :  { %6760 = vmatpush1.bf16.msra.mxu1 %v8708_v25  ;;  %v8776_v25 = vld [vmem:[#allocation20 + $0xc8c] ss:$28 sps:$4 sm:$0xff]  }
 0x652   :  { %6761 = vmatprep.subr.bf16.mxu1 %v8713_v16 }
 0x655   :  { %6762 = vmatpush1.bf16.msra.mxu1 %v8711_v62 }
 0x656   :  { %6763 = vmatprep.subr.bf16.mxu1 %v8716_v38  ;;  %v8774_v38 = vld [vmem:[#allocation20 + $0xc88] ss:$28 sps:$4 sm:$0xff]  }
 0x659   :  { %6764 = vmatpush1.bf16.msra.mxu1 %v8714_v53 }
 0x65a   :  { %6765 = vmatprep.subr.bf16.mxu1 %v8719_v27  ;;  %v8779_v27 = vld [vmem:[#allocation20 + $0xcc4] ss:$28 sps:$4 sm:$0xff]  }
 0x65d   :  { %6766 = vmatpush1.bf16.msra.mxu1 %v8717_v23 }
 0x65e   :  { %6767 = vmatprep.subr.bf16.mxu1 %v8722_v30  ;;  %v8777_v30 = vld [vmem:[#allocation20 + $0xcc0] ss:$28 sps:$4 sm:$0xff]  }
 0x661   :  { %6768 = vmatpush1.bf16.msra.mxu1 %v8720_v49  ;;  %v8782_v49 = vld [vmem:[#allocation20 + $0xcfc] ss:$28 sps:$4 sm:$0xff]  }
 0x662   :  { %6769 = vmatprep.subr.bf16.mxu1 %v8725_v35  ;;  %v8780_v35 = vld [vmem:[#allocation20 + $0xcf8] ss:$28 sps:$4 sm:$0xff]  }
 0x665   :  { %6770 = vmatpush1.bf16.msra.mxu1 %v8723_v33  ;;  %v8785_v33 = vld [vmem:[#allocation20 + $0xd34] ss:$28 sps:$4 sm:$0xff]  }
 0x666   :  { %6771 = vmatprep.subr.bf16.mxu1 %v8728_v29  ;;  %v8783_v29 = vld [vmem:[#allocation20 + $0xd30] ss:$28 sps:$4 sm:$0xff]  }
 0x669   :  { %6772 = vmatpush1.bf16.msra.mxu1 %v8726_v40  ;;  %v8788_v40 = vld [vmem:[#allocation20 + $0xd6c] ss:$28 sps:$4 sm:$0xff]  }
 0x66a   :  { %6773 = vmatprep.subr.bf16.mxu1 %v8731_v22  ;;  %v8786_v22 = vld [vmem:[#allocation20 + $0xd68] ss:$28 sps:$4 sm:$0xff]  }
 0x66d   :  { %6774 = vmatpush1.bf16.msra.mxu1 %v8729_v24  ;;  %v8791_v24 = vld [vmem:[#allocation20 + $0xda4] ss:$28 sps:$4 sm:$0xff]  }
 0x66e   :  { %6775 = vmatprep.subr.bf16.mxu1 %v8734_v26 }
 0x671   :  { %6776 = vmatpush1.bf16.msra.mxu1 %v8732_v13 }
 0x672   :  { %6777 = vmatprep.subr.bf16.mxu1 %v8737_v14  ;;  %v8789_v14 = vld [vmem:[#allocation20 + $0xda0] ss:$28 sps:$4 sm:$0xff]  }
 0x675   :  { %6778 = vmatpush1.bf16.msra.mxu1 %v8735_v15 }
 0x676   :  { %6779 = vmatprep.subr.bf16.mxu1 %v8740_v61 }
 0x679   :  { %6780 = vmatpush1.bf16.msra.mxu1 %v8738_v28  ;;  %v8794_v28 = vld [vmem:[#allocation20 + $0xddc] ss:$28 sps:$4 sm:$0xff]  }
 0x67a   :  { %6781 = vmatprep.subr.bf16.mxu1 %v8743_v44 }
 0x67d   :  { %6782 = vmatpush1.bf16.msra.mxu1 %v8741_v45  ;;  %v8792_v45 = vld [vmem:[#allocation20 + $0xdd8] ss:$28 sps:$4 sm:$0xff]  }
 0x67e   :  { %6783 = vmatprep.subr.bf16.mxu1 %v8746_v46  ;;  %v4031_v46 = vrot.slane %v9757_v8, %v9604_v54 }
 0x681   :  { %6784 = vmatpush1.bf16.msra.mxu1 %v8744_v21 }
 0x682   :  { %6794 = vmatprep.subr.bf16.mxu1 %v8749_v50 }
 0x684   :  { %6786 = vmatmul.mubr.bf16.vlgmr.msra.gmra.mrb[16].mxu1 %v9727_v58  ;;  %v8764_v58 = vld [vmem:[#allocation20 + $0xbac] ss:$28 sps:$4 sm:$0xff]  }
 0x685   :  { %6795 = vmatpush1.bf16.msra.mxu1 %v8747_v3  ;;  %6826 = vmatprep.mubr.bf16.mxu1 %v9730_v43  ;;  %v4007_v43 = vrot.slane %v9757_v8, %v9429_v37 }
 0x686   :  { %6796 = vmatprep.subr.bf16.mxu1 %v8752_v7 }
 0x689   :  { %6797 = vmatpush1.bf16.msra.mxu1 %v8750_v34 }
 0x68a   :  { %6798 = vmatprep.subr.bf16.mxu1 %v8755_v9 }
 0x68d   :  { %6799 = vmatpush1.bf16.msra.mxu1 %v8753_v10 }
 0x68e   :  { %6800 = vmatprep.subr.bf16.mxu1 %v8758_v12 }
 0x691   :  { %6801 = vmatpush1.bf16.msra.mxu1 %v8756_v57 }
 0x692   :  { %6802 = vmatprep.subr.bf16.mxu1 %v8761_v5 }
 0x695   :  { %6803 = vmatpush1.bf16.msra.mxu1 %v8759_v63 }
 0x696   :  { %6804 = vmatprep.subr.bf16.mxu1 %v8764_v58 }
 0x697   :  { %v6500_v59 = vpop.f32.mrb[12].mxu1 }
 0x698   :  { %v7928_v31 = vadd.f32 %v6500_v59, %v4007_v43  ;;  %v6664_v19 = vpop.f32.mrb[16].mxu0  ;;  %v6502_v48 = vpop.f32.mrb[13].mxu1  ;;  %v4023_v59 = vrot.slane %v9757_v8, %v9601_v55 }
 0x699   :  { %v7930_v52 = vadd.f32 %v6664_v19, %v4015_v32  ;;  %v7929_v11 = vadd.f32 %v6502_v48, %v4011_v41  ;;  %v6666_v37 = vpop.f32.mrb[17].mxu0  ;;  %v6504_v60 = vpop.f32.mrb[14].mxu1  ;;  %6805 = vmatpush1.bf16.msra.mxu1 %v8762_v51 }
 0x69a   :  { %8819 = vtanh.f32 %v7928_v31  ;;  %v7931_v4 = vadd.f32 %v6666_v37, %v4019_v17  ;;  %v6668_v1 = vpop.f32.mrb[18].mxu0  ;;  %v6505_v39 = vpop.f32.mrb[15].mxu1  ;;  %6806 = vmatprep.subr.bf16.mxu1 %v8767_v18  ;;  %v4027_v31 = vrot.slane %v9757_v8, %v9607_v56 }
 0x69b   :  { %8821 = vtanh.f32 %v7930_v52  ;;  %v6669_v6 = vpop.f32.mrb[19].mxu0 }
 0x69c   :  { %8823 = vtanh.f32 %v7929_v11 }
 0x69d   :  { %8825 = vtanh.f32 %v7931_v4  ;;  %6807 = vmatpush1.bf16.msra.mxu1 %v8765_v0 }
 0x69e   :  { %6808 = vmatprep.subr.bf16.mxu1 %v8770_v42 }
 0x6a1   :  { %6809 = vmatpush1.bf16.msra.mxu1 %v8768_v2 }
 0x6a2   :  { %6810 = vmatprep.subr.bf16.mxu1 %v8773_v36 }
 0x6a4   :  { %v8820_v16 = vpop.eup %8819 }
 0x6a5   :  { %v8822_v62 = vpop.eup %8821  ;;  %7002 = vst [vmem:[#allocation23] sm:$0xff] %v8820_v16  ;;  %6811 = vmatpush1.bf16.msra.mxu1 %v8771_v20 }
 0x6a6   :  { %v8824_v53 = vpop.eup %8823  ;;  %7004 = vst [vmem:[#allocation23 + $0x10] sm:$0xff] %v8822_v62  ;;  %6812 = vmatprep.subr.bf16.mxu1 %v8776_v25 }
 0x6a7   :  { %v8826_v23 = vpop.eup %8825  ;;  %7003 = vst [vmem:[#allocation23 + $0x8] sm:$0xff] %v8824_v53 }
 0x6a8   :  { %7005 = vst [vmem:[#allocation23 + $0x18] sm:$0xff] %v8826_v23 }
 0x6a9   :  { %6813 = vmatpush1.bf16.msra.mxu1 %v8774_v38 }
 0x6aa   :  { %6814 = vmatprep.subr.bf16.mxu1 %v8779_v27 }
 0x6ad   :  { %6815 = vmatpush1.bf16.msra.mxu1 %v8777_v30 }
 0x6ae   :  { %6816 = vmatprep.subr.bf16.mxu1 %v8782_v49 }
 0x6b1   :  { %6817 = vmatpush1.bf16.msra.mxu1 %v8780_v35 }
 0x6b2   :  { %6818 = vmatprep.subr.bf16.mxu1 %v8785_v33 }
 0x6b5   :  { %6819 = vmatpush1.bf16.msra.mxu1 %v8783_v29 }
 0x6b6   :  { %6820 = vmatprep.subr.bf16.mxu1 %v8788_v40 }
 0x6b8   :  { %v7848_v26 = vpop.f32.mrb[20].mxu0 }
 0x6b9   :  { %v7849_v13 = vpop.f32.mrb[21].mxu0  ;;  %6821 = vmatpush1.bf16.msra.mxu1 %v8786_v22 }
 0x6ba   :  { %v7850_v15 = vadd.f32 %v7849_v13, %v7848_v26  ;;  %v7851_v61 = vpop.f32.mrb[22].mxu0  ;;  %6822 = vmatprep.subr.bf16.mxu1 %v8791_v24 }
 0x6bb   :  { %v7852_v44 = vpop.f32.mrb[23].mxu0 }
 0x6bc   :  { %v6870_v3 = vadd.f32 %v7850_v15, %v4031_v46 }
 0x6bd   :  { %6823 = vmatpush1.bf16.msra.mxu1 %v8789_v14 }
 0x6be   :  { %6824 = vmatprep.subr.bf16.mxu1 %v8794_v28 }
 0x6c1   :  { %6825 = vmatpush1.bf16.msra.mxu1 %v8792_v45 }
 0x6c4   :  { %6827 = vmatmul.mubr.bf16.vlgmr.msra.gmra.mrb[16].mxu1 %v9738_v47 }
 0x6d8   :  { %v7870_v21 = vpop.f32.mrb[24].mxu0 }
 0x6d9   :  { %v7871_v50 = vpop.f32.mrb[25].mxu0 }
 0x6da   :  { %v7872_v7 = vadd.f32 %v7871_v50, %v7870_v21  ;;  %v7873_v34 = vpop.f32.mrb[26].mxu0 }
 0x6db   :  { %v7874_v9 = vpop.f32.mrb[27].mxu0 }
 0x6dc   :  { %v6910_v10 = vadd.f32 %v7872_v7, %v6870_v3 }
 0x6f8   :  { %v7892_v12 = vpop.f32.mrb[28].mxu0 }
 0x6f9   :  { %v7893_v57 = vpop.f32.mrb[29].mxu0 }
 0x6fa   :  { %v7894_v5 = vadd.f32 %v7893_v57, %v7892_v12  ;;  %v7895_v63 = vpop.f32.mrb[30].mxu0 }
 0x6fb   :  { %v7896_v58 = vpop.f32.mrb[31].mxu0 }
 0x6fc   :  { %v6950_v43 = vadd.f32 %v7894_v5, %v6910_v10 }
 0x718   :  { %v7914_v32 = vpop.f32.mrb[32].mxu0 }
 0x719   :  { %v7915_v41 = vpop.f32.mrb[33].mxu0 }
 0x71a   :  { %v7916_v51 = vadd.f32 %v7915_v41, %v7914_v32  ;;  %v7917_v47 = vpop.f32.mrb[34].mxu0 }
 0x71b   :  { %v7918_v17 = vpop.f32.mrb[35].mxu0 }
 0x71c   :  { %v6990_v18 = vadd.f32 %v7916_v51, %v6950_v43 }
 0x71e   :  { %8827 = vtanh.f32 %v6990_v18 }
 0x728   :  { %v8828_v54 = vpop.eup %8827 }
 0x729   :  { %7008 = vst [vmem:[#allocation23 + $0x30] sm:$0xff] %v8828_v54 }
 0x797   :  { %v6828_v19 = vpop.f32.mrb[16].mxu1 }
 0x798   :  { %v7932_v48 = vadd.f32 %v6828_v19, %v4023_v59  ;;  %v6830_v52 = vpop.f32.mrb[17].mxu1 }
 0x799   :  { %v7933_v11 = vadd.f32 %v6830_v52, %v4027_v31  ;;  %v6832_v37 = vpop.f32.mrb[18].mxu1 }
 0x79a   :  { %8829 = vtanh.f32 %v7932_v48  ;;  %v6833_v60 = vpop.f32.mrb[19].mxu1 }
 0x79b   :  { %8831 = vtanh.f32 %v7933_v11 }
 0x7a4   :  { %v8830_v0 = vpop.eup %8829 }
 0x7a5   :  { %v8832_v4 = vpop.eup %8831  ;;  %7006 = vst [vmem:[#allocation23 + $0x20] sm:$0xff] %v8830_v0 }
 0x7a6   :  { %7007 = vst [vmem:[#allocation23 + $0x28] sm:$0xff] %v8832_v4 }
 0x7a7   :  { %9130 = shalt.err (!%p9127_p10)
}
 0x7a8   :  { %s9131_s26 = scalar_lea.hbm %s9799_s13, 896 }
 0x7a9   :  { %p9132_p11 = scmp.ne.s32.totalorder %s9799_s13, %s9131_s26  ;;  %p9135_p12 = scmp.lt.u32.totalorder %s9131_s26, %s9799_s13 }
 0x7ab   :  { %p9137_p13 = pnand %p9135_p12, %p9132_p11 }
 0x7ad   :  { %9140 = shalt.err (!%p9137_p13)
}
 0x7ae   :  { %7018 = dma.vmem_to_hbm [thread:$0]  %s7016_s17, 896, %s9799_s13, [#allocation4]  }
 0x7af   :  { %9155 = dma.done.wait [#allocation4], 896  }
 0x7b0   :  { %9156 = vsyncadd [#allocation4], 4294966400 }
 0x7b1   :  { %7022 = vsyncpa [#allocation3], 1 }
 0x7b2   :  { %7023 = vsyncpa [#allocation6], 1 }
 0x7b3   :  { %7024 = vsyncpa [#allocation9], 1 }
 0x7b4   :  { %7025 = vsyncpa [#allocation12], 1 }
 0x7b5   :  { %7026 = vsyncpa [#allocation15], 1 }
 0x7b6   :  { %7027 = vsyncpa [#allocation18], 1 }
 0x7b7   :  { %7028 = vsyncpa [#allocation21], 1 }
 0x7b8   :  { %7029 = vsyncpa [#allocation4], 1 }

</bundles_post_ra>
